<compile_context>
chip_gen: v6e
topology: v6e:2x2x1
jax: 0.10.0
libtpu: 0.0.40
codegen_flags: <defaults>
</compile_context>

<pallas_src>
import functools
import math

import jax
import jax.numpy as jnp
from jax import lax
from jax.experimental import pallas as pl
from jax.experimental.pallas import tpu as pltpu


def _round_up(x, m):
    return (x + m - 1) // m * m


def _dagnn_kernel(g0_hbm, adj_ref, norm_ref, s_ref, out_ref,
                  h_buf, pacc_ref, dma_sem, *, tm, tk):
    t = pl.program_id(0)            # hop index        0..k-1
    i = pl.program_id(1)            # dst-row tile
    j = pl.program_id(2)            # src / contraction tile
    n_j = pl.num_programs(2)

    p = lax.rem(t, 2)               # ping-pong parity: g_t lives in h_buf[p]
    ii = pl.multiple_of(i * tm, tm)
    jj = pl.multiple_of(j * tk, tk)

    # --- very first grid step: one-time DMA of g_0 = norm * feats (bf16) --
    @pl.when((t + i + j) == 0)
    def _():
        cp = pltpu.make_async_copy(g0_hbm, h_buf.at[0], dma_sem)
        cp.start()
        cp.wait()

    # --- start of a row-tile contraction: clear the f32 accumulator -------
    @pl.when(j == 0)
    def _():
        pacc_ref[...] = jnp.zeros_like(pacc_ref)

    # --- hot loop: pacc += A_ij @ g_t[jj:jj+tk]  (bf16 x bf16 on the MXU) --
    a = adj_ref[...].astype(jnp.bfloat16)        # int8 0/1 -> bf16, exact
    x = h_buf[p, pl.ds(jj, tk), :]               # bf16, already pre-normalized
    pacc_ref[...] += jnp.dot(a, x, preferred_element_type=jnp.float32)

    # --- row tile done: post-normalize, sigmoid gate, accumulate output ---
    @pl.when(j == n_j - 1)
    def _():
        nrm = norm_ref[...]                                       # (tm, 1)
        h_new = pacc_ref[...] * nrm                               # h_{t+1}, f32
        sc = jax.nn.sigmoid(
            jnp.sum(h_new * s_ref[...], axis=-1, keepdims=True))  # (tm, 1)
        contrib = sc * h_new

        @pl.when(t == 0)
        def _():
            out_ref[pl.ds(ii, tm), :] = contrib            # first hop: no RMW

        @pl.when(t != 0)
        def _():
            out_ref[pl.ds(ii, tm), :] = out_ref[pl.ds(ii, tm), :] + contrib

        # stash g_{t+1} = norm * h_{t+1} (bf16) for the next hop.
        h_buf[1 - p, pl.ds(ii, tm), :] = (h_new * nrm).astype(jnp.bfloat16)


def dagnn_conv(adj, feats, s, k, *, tm=512, tk=1024):
    """Pallas DAGNNConv forward.

    adj:   (N, N) adjacency, adj[dst, src] = edge weight (0/1).
    feats: (N, D) node features.
    s:     (D, 1) learned projection.
    k:     number of propagation steps (static python int).
    Returns (N, D) float32.
    """
    N, D = feats.shape
    assert adj.shape == (N, N)
    assert s.shape == (D, 1)

    feats32 = feats.astype(jnp.float32)
    s32 = s.astype(jnp.float32)

    # Hop-0 gated term computed outside the kernel; the kernel only
    # accumulates the k propagation hops.
    out0 = jax.nn.sigmoid(feats32 @ s32) * feats32           # (N, D) f32
    if k == 0:
        return out0

    # Degree normalization (clamp like DGL so isolated nodes don't give inf;
    # the literal module uses deg^-0.5 which is inf for deg==0).
    degs = jnp.sum(adj.astype(jnp.float32), axis=1)
    norm = lax.rsqrt(jnp.maximum(degs, 1.0))                  # (N,)

    # Don't over-tile tiny graphs; keep tiles powers of two so lcm == max.
    cap = pl.next_power_of_2(_round_up(N, 256))
    tm = min(tm, cap)
    tk = min(tk, cap)

    Np = _round_up(N, math.lcm(tm, tk))        # nodes padded to tile lcm
    Dp = _round_up(D, 128)                     # features padded to 128 lanes

    # Adjacency in HBM as 1 byte/elem; widened to bf16 on-chip before the dot.
    adj_p = jnp.zeros((Np, Np), jnp.int8).at[:N, :N].set(adj.astype(jnp.int8))
    # Pre-normalized hop-0 state g_0 = norm * feats in bf16 (MXU operand
    # precision), DMA'd once into the ping-pong scratch.
    g0_p = jnp.zeros((Np, Dp), jnp.bfloat16).at[:N, :D].set(
        (feats32 * norm[:, None]).astype(jnp.bfloat16))
    norm_p = jnp.ones((Np, 1), jnp.float32).at[:N, 0].set(norm)
    s_p = jnp.zeros((1, Dp), jnp.float32).at[0, :D].set(s32[:, 0])

    n_i = Np // tm
    n_j = Np // tk

    kernel = functools.partial(_dagnn_kernel, tm=tm, tk=tk)

    grid_spec = pltpu.PrefetchScalarGridSpec(
        num_scalar_prefetch=0,
        grid=(k, n_i, n_j),
        in_specs=[
            pl.BlockSpec(memory_space=pl.ANY),                 # g_0 stays in HBM
            pl.BlockSpec((tm, tk), lambda t, i, j: (i, j)),    # adj: streamed
            pl.BlockSpec((tm, 1), lambda t, i, j: (i, 0)),     # norm row tile
            pl.BlockSpec((1, Dp), lambda t, i, j: (0, 0)),     # s (tiny)
        ],
        # Constant-index resident output accumulator; single-buffered since
        # its block index never changes.
        out_specs=pl.BlockSpec((Np, Dp), lambda t, i, j: (0, 0),
                               pipeline_mode=pl.Buffered(1)),
        scratch_shapes=[
            pltpu.VMEM((2, Np, Dp), jnp.bfloat16),  # ping-pong hop state g_t
            pltpu.VMEM((tm, Dp), jnp.float32),      # per-row-tile matmul acc
            pltpu.SemaphoreType.DMA,                # one-time g_0 seed DMA
        ],
    )

    # Explicit VMEM budget: streamed adj tiles (x2) + hop state + resident
    # output + accumulator + norm/s blocks + widened-operand temp + headroom.
    vmem_bytes = (
        2 * tm * tk * 1          # adj int8 tiles, double-buffered
        + 2 * Np * Dp * 2        # bf16 ping-pong hop state
        + Np * Dp * 4            # resident f32 output (single-buffered)
        + tm * Dp * 4            # f32 matmul accumulator
        + 2 * tm * 128 * 4       # norm row blocks (lane-padded)
        + 8 * Dp * 4             # s (sublane-padded)
        + 2 * tm * tk * 2        # bf16 widened adjacency tile temp
    )
    vmem_limit = int(min(2 * vmem_bytes + (8 << 20), 56 << 20))

    cost = pl.CostEstimate(
        flops=2 * k * Np * Np * Dp,
        transcendentals=k * Np,
        bytes_accessed=k * Np * Np + Np * Dp * (2 + 4) + k * Np * 4,
    )

    out_p = pl.pallas_call(
        kernel,
        grid_spec=grid_spec,
        out_shape=jax.ShapeDtypeStruct((Np, Dp), jnp.float32),
        compiler_params=pltpu.CompilerParams(
            dimension_semantics=("arbitrary", "arbitrary", "arbitrary"),
            vmem_limit_bytes=vmem_limit),
        cost_estimate=cost,
    )(g0_p, adj_p, norm_p, s_p)

    return out0 + out_p[:N, :D]


def _reference(adj, feats, s, k):
    """Pure-JAX f32 reference mirroring the PyTorch forward literally."""
    degs = jnp.sum(adj, axis=1)
    norm = jnp.power(degs, -0.5)[:, None]
    results = [feats]
    h = feats
    for _ in range(k):
        h = h * norm
        h = adj @ h
        h = h * norm
        results.append(h)
    H = jnp.stack(results, axis=1)                       # (N, k+1, D)
    S = jax.nn.sigmoid(jnp.matmul(H, s))                 # (N, k+1, 1)
    S = jnp.transpose(S, (0, 2, 1))                      # (N, 1, k+1)
    return jnp.squeeze(jnp.matmul(S, H))                 # (N, D)


if __name__ == "__main__":
    # Non-multiples of the tile sizes on purpose (exercises padding).
    N, D, K = 600, 48, 3

    key = jax.random.PRNGKey(0)
    k_adj, k_feat, k_s = jax.random.split(key, 3)

    # Random graph with self-loops so every node has in-degree >= 1.
    adj = jax.random.bernoulli(k_adj, p=0.02, shape=(N, N)).astype(jnp.float32)
    adj = jnp.maximum(adj, jnp.eye(N, dtype=jnp.float32))

    feats = jax.random.normal(k_feat, (N, D), dtype=jnp.float32)

    # Deterministic xavier_uniform init for s with sigmoid gain (= 1.0).
    gain = 1.0
    bound = gain * (6.0 / (D + 1)) ** 0.5
    s = jax.random.uniform(k_s, (D, 1), dtype=jnp.float32,
                           minval=-bound, maxval=bound)

    out = dagnn_conv(adj, feats, s, K)
    out = jax.block_until_ready(out)

    ref = _reference(adj, feats, s, K)
    assert out.shape == (N, D)
    max_err = float(jnp.max(jnp.abs(out - ref)))
    # bf16 MXU operands (adjacency exact int8->bf16, activations bf16-rounded)
    # over K hops give ~1e-3 abs error vs. the f32 reference; assert with
    # comfortable margin.
    assert jnp.allclose(out, ref, atol=2e-2, rtol=2e-2), f"max err {max_err}"

    print("KERNEL_OK")
</pallas_src>

<mosaic_0001>
module attributes {stable_mosaic.version = 11 : i64} {
  func.func @_dagnn_kernel(%arg0: i32, %arg1: i32, %arg2: i32, %arg3: memref<1024x128xbf16, #tpu.memory_space<any>>, %arg4: memref<512x1024xi8, #tpu.memory_space<vmem>>, %arg5: memref<512x1xf32, #tpu.memory_space<vmem>>, %arg6: memref<1x128xf32, #tpu.memory_space<vmem>>, %arg7: memref<1024x128xf32, #tpu.memory_space<vmem>>, %arg8: memref<2x1024x128xbf16, #tpu.memory_space<vmem>>, %arg9: memref<512x128xf32, #tpu.memory_space<vmem>>, %arg10: memref<!tpu.dma_semaphore, #tpu.memory_space<semaphore_mem>>) attributes {dimension_semantics = [#tpu.dimension_semantics<arbitrary>, #tpu.dimension_semantics<arbitrary>, #tpu.dimension_semantics<arbitrary>], iteration_bounds = array<i64: 3, 2, 1>, scalar_prefetch = 0 : i64, scratch_operands = 3 : i64, tpu.core_type = #tpu.core_type<tc>, window_params = [{}, {transform_indices = @transform_1, window_bounds = array<i64: 512, 1024>}, {transform_indices = @transform_2, window_bounds = array<i64: 512, 1>}, {pipeline_mode = #tpu.pipeline_mode<synchronous>, transform_indices = @transform_3, window_bounds = array<i64: 1, 128>}, {pipeline_mode = #tpu.pipeline_mode<synchronous>, transform_indices = @transform_4, window_bounds = array<i64: 1024, 128>}]} {
    %c2_i32 = arith.constant 2 : i32
    %0 = arith.remsi %arg0, %c2_i32 : i32
    %c512_i32 = arith.constant 512 : i32
    %1 = arith.muli %arg1, %c512_i32 : i32
    %2 = tpu.assume_multiple %1, 512 : i32
    %c1024_i32 = arith.constant 1024 : i32
    %3 = arith.muli %arg2, %c1024_i32 : i32
    %4 = tpu.assume_multiple %3, 1024 : i32
    %5 = arith.addi %arg0, %arg1 : i32
    %6 = arith.addi %5, %arg2 : i32
    %c0_i32 = arith.constant 0 : i32
    %7 = arith.cmpi eq, %6, %c0_i32 : i32
    %8 = arith.extui %7 : i1 to i32
    %c0_i32_0 = arith.constant 0 : i32
    %9 = arith.cmpi ne, %8, %c0_i32_0 : i32
    scf.if %9 {
      %c0_i32_11 = arith.constant 0 : i32
      %c0_i32_12 = arith.constant 0 : i32
      %c0_i32_13 = arith.constant 0 : i32
      %26 = tpu.memref_slice %arg8[%c0_i32_11, %c0_i32_12, %c0_i32_13] : memref<2x1024x128xbf16, #tpu.memory_space<vmem>> -> memref<1x1024x128xbf16, #tpu.memory_space<vmem>>
      %27 = tpu.memref_squeeze %26 : memref<1x1024x128xbf16, #tpu.memory_space<vmem>> -> memref<1024x128xbf16, #tpu.memory_space<vmem>>
      tpu.enqueue_dma source(%arg3 : memref<1024x128xbf16, #tpu.memory_space<any>>) target(%27 : memref<1024x128xbf16, #tpu.memory_space<vmem>>) target_semaphore(%arg10 : memref<!tpu.dma_semaphore, #tpu.memory_space<semaphore_mem>>)
      %c0_i32_14 = arith.constant 0 : i32
      %c0_i32_15 = arith.constant 0 : i32
      %c0_i32_16 = arith.constant 0 : i32
      %28 = tpu.memref_slice %arg8[%c0_i32_14, %c0_i32_15, %c0_i32_16] : memref<2x1024x128xbf16, #tpu.memory_space<vmem>> -> memref<1x1024x128xbf16, #tpu.memory_space<vmem>>
      %29 = tpu.memref_squeeze %28 : memref<1x1024x128xbf16, #tpu.memory_space<vmem>> -> memref<1024x128xbf16, #tpu.memory_space<vmem>>
      tpu.wait_dma2 semaphore(%arg10 : memref<!tpu.dma_semaphore, #tpu.memory_space<semaphore_mem>>) src(%arg3 : memref<1024x128xbf16, #tpu.memory_space<any>>) dst(%29 : memref<1024x128xbf16, #tpu.memory_space<vmem>>)
    } else {
    }
    %c0_i32_1 = arith.constant 0 : i32
    %10 = arith.cmpi eq, %arg2, %c0_i32_1 : i32
    %11 = arith.extui %10 : i1 to i32
    %c0_i32_2 = arith.constant 0 : i32
    %12 = arith.cmpi ne, %11, %c0_i32_2 : i32
    scf.if %12 {
      %cst_11 = arith.constant 0.000000e+00 : f32
      %26 = vector.broadcast %cst_11 : f32 to vector<512x128xf32>
      %c0_12 = arith.constant 0 : index
      %c0_13 = arith.constant 0 : index
      %27 = vector.load %arg9[%c0_12, %c0_13] : memref<512x128xf32, #tpu.memory_space<vmem>>, vector<512x128xf32>
      tpu.vector_store %arg9[%c0_12, %c0_13], %26 {strides = array<i32>} : memref<512x128xf32, #tpu.memory_space<vmem>>, vector<512x128xf32>,
    } else {
    }
    %c0 = arith.constant 0 : index
    %c0_3 = arith.constant 0 : index
    %13 = vector.load %arg4[%c0, %c0_3] : memref<512x1024xi8, #tpu.memory_space<vmem>>, vector<512x1024xi8>
    %14 = arith.sitofp %13 : vector<512x1024xi8> to vector<512x1024xbf16>
    %15 = arith.index_cast %0 : i32 to index
    %16 = arith.index_cast %4 : i32 to index
    %c0_4 = arith.constant 0 : index
    %17 = vector.load %arg8[%15, %16, %c0_4] : memref<2x1024x128xbf16, #tpu.memory_space<vmem>>, vector<1x1024x128xbf16>
    %18 = vector.shape_cast %17 : vector<1x1024x128xbf16> to vector<1024x128xbf16>
    %c0_5 = arith.constant 0 : index
    %c0_6 = arith.constant 0 : index
    %19 = vector.load %arg9[%c0_5, %c0_6] : memref<512x128xf32, #tpu.memory_space<vmem>>, vector<512x128xf32>
    %cst = arith.constant dense<0.000000e+00> : vector<512x128xf32>
    %20 = tpu.matmul %14, %18, %cst {dimension_numbers = #tpu.dot_dimension_numbers<[1], [0], [0], [1], [0, 0, 1, 1], [], []>} : vector<512x1024xbf16>, vector<1024x128xbf16>, vector<512x128xf32> -> vector<512x128xf32>
    %21 = arith.addf %19, %20 : vector<512x128xf32>
    %c0_7 = arith.constant 0 : index
    %c0_8 = arith.constant 0 : index
    %22 = vector.load %arg9[%c0_7, %c0_8] : memref<512x128xf32, #tpu.memory_space<vmem>>, vector<512x128xf32>
    tpu.vector_store %arg9[%c0_7, %c0_8], %21 {strides = array<i32>} : memref<512x128xf32, #tpu.memory_space<vmem>>, vector<512x128xf32>,
    %c0_i32_9 = arith.constant 0 : i32
    %23 = arith.cmpi eq, %arg2, %c0_i32_9 : i32
    %24 = arith.extui %23 : i1 to i32
    %c0_i32_10 = arith.constant 0 : i32
    %25 = arith.cmpi ne, %24, %c0_i32_10 : i32
    scf.if %25 {
      %c0_11 = arith.constant 0 : index
      %c0_12 = arith.constant 0 : index
      %26 = vector.load %arg5[%c0_11, %c0_12] : memref<512x1xf32, #tpu.memory_space<vmem>>, vector<512x1xf32>
      %c0_13 = arith.constant 0 : index
      %c0_14 = arith.constant 0 : index
      %27 = vector.load %arg9[%c0_13, %c0_14] : memref<512x128xf32, #tpu.memory_space<vmem>>, vector<512x128xf32>
      %28 = vector.broadcast %26 : vector<512x1xf32> to vector<512x128xf32>
      %29 = arith.mulf %27, %28 : vector<512x128xf32>
      %c0_15 = arith.constant 0 : index
      %c0_16 = arith.constant 0 : index
      %30 = vector.load %arg6[%c0_15, %c0_16] : memref<1x128xf32, #tpu.memory_space<vmem>>, vector<1x128xf32>
      %31 = vector.broadcast %30 : vector<1x128xf32> to vector<512x128xf32>
      %32 = arith.mulf %29, %31 : vector<512x128xf32>
      %cst_17 = arith.constant dense<0.000000e+00> : vector<512xf32>
      %33 = vector.multi_reduction <add>, %32, %cst_17 [1] : vector<512x128xf32> to vector<512xf32>
      %34 = vector.shape_cast %33 : vector<512xf32> to vector<512x1xf32>
      %35 = arith.negf %34 : vector<512x1xf32>
      %36 = math.exp %35 : vector<512x1xf32>
      %cst_18 = arith.constant 1.000000e+00 : f32
      %37 = vector.broadcast %cst_18 : f32 to vector<512x1xf32>
      %38 = arith.addf %37, %36 : vector<512x1xf32>
      %39 = arith.divf %37, %38 : vector<512x1xf32>
      %40 = vector.broadcast %39 : vector<512x1xf32> to vector<512x128xf32>
      %41 = arith.mulf %40, %29 : vector<512x128xf32>
      %c0_i32_19 = arith.constant 0 : i32
      %42 = arith.cmpi eq, %arg0, %c0_i32_19 : i32
      %43 = arith.extui %42 : i1 to i32
      %c0_i32_20 = arith.constant 0 : i32
      %44 = arith.cmpi ne, %43, %c0_i32_20 : i32
      scf.if %44 {
        %57 = arith.index_cast %2 : i32 to index
        %c0_24 = arith.constant 0 : index
        %58 = vector.load %arg7[%57, %c0_24] : memref<1024x128xf32, #tpu.memory_space<vmem>>, vector<512x128xf32>
        tpu.vector_store %arg7[%57, %c0_24], %41 {strides = array<i32>} : memref<1024x128xf32, #tpu.memory_space<vmem>>, vector<512x128xf32>,
      } else {
      }
      %c0_i32_21 = arith.constant 0 : i32
      %45 = arith.cmpi ne, %arg0, %c0_i32_21 : i32
      %46 = arith.extui %45 : i1 to i32
      %c0_i32_22 = arith.constant 0 : i32
      %47 = arith.cmpi ne, %46, %c0_i32_22 : i32
      scf.if %47 {
        %57 = arith.index_cast %2 : i32 to index
        %c0_24 = arith.constant 0 : index
        %58 = vector.load %arg7[%57, %c0_24] : memref<1024x128xf32, #tpu.memory_space<vmem>>, vector<512x128xf32>
        %59 = arith.addf %58, %41 : vector<512x128xf32>
        %60 = arith.index_cast %2 : i32 to index
        %c0_25 = arith.constant 0 : index
        %61 = vector.load %arg7[%60, %c0_25] : memref<1024x128xf32, #tpu.memory_space<vmem>>, vector<512x128xf32>
        tpu.vector_store %arg7[%60, %c0_25], %59 {strides = array<i32>} : memref<1024x128xf32, #tpu.memory_space<vmem>>, vector<512x128xf32>,
      } else {
      }
      %48 = vector.broadcast %26 : vector<512x1xf32> to vector<512x128xf32>
      %49 = arith.mulf %29, %48 : vector<512x128xf32>
      %50 = arith.truncf %49 : vector<512x128xf32> to vector<512x128xbf16>
      %c1_i32 = arith.constant 1 : i32
      %51 = arith.subi %c1_i32, %0 : i32
      %52 = arith.index_cast %51 : i32 to index
      %53 = arith.index_cast %2 : i32 to index
      %c0_23 = arith.constant 0 : index
      %54 = vector.load %arg8[%52, %53, %c0_23] : memref<2x1024x128xbf16, #tpu.memory_space<vmem>>, vector<1x512x128xbf16>
      %55 = vector.shape_cast %54 : vector<1x512x128xbf16> to vector<512x128xbf16>
      %56 = vector.shape_cast %50 : vector<512x128xbf16> to vector<1x512x128xbf16>
      tpu.vector_store %arg8[%52, %53, %c0_23], %56 {strides = array<i32>} : memref<2x1024x128xbf16, #tpu.memory_space<vmem>>, vector<1x512x128xbf16>,
    } else {
    }
    return
  }
  func.func @transform_1(%arg0: i32, %arg1: i32, %arg2: i32) -> (i32, i32) {
    %c0_i32 = arith.constant 0 : i32
    return %arg1, %arg2 : i32, i32
  }
  func.func @transform_2(%arg0: i32, %arg1: i32, %arg2: i32) -> (i32, i32) {
    %c0_i32 = arith.constant 0 : i32
    %c0_i32_0 = arith.constant 0 : i32
    return %arg1, %c0_i32 : i32, i32
  }
  func.func @transform_3(%arg0: i32, %arg1: i32, %arg2: i32) -> (i32, i32) {
    %c0_i32 = arith.constant 0 : i32
    %c0_i32_0 = arith.constant 0 : i32
    %c0_i32_1 = arith.constant 0 : i32
    return %c0_i32, %c0_i32_0 : i32, i32
  }
  func.func @transform_4(%arg0: i32, %arg1: i32, %arg2: i32) -> (i32, i32) {
    %c0_i32 = arith.constant 0 : i32
    %c0_i32_0 = arith.constant 0 : i32
    %c0_i32_1 = arith.constant 0 : i32
    return %c0_i32, %c0_i32_0 : i32, i32
  }
}

</mosaic_0001>

<bundles_post_ra>
// kernel: tpu_custom_call.1
= control target key start
LH: loop header
LB: loop body
LE: loop exit
PB: predicated region body
PF: predicated region fallthrough
CT: control target
= control target key end

     0   :  { %9 = vsyncpa [#allocation6], 0  ;;  %s7713_s0 = inlined_call_operand.vmem [shape: bf16[1024,128], index: 0, kind: input, shape index: {}]   ;;  %s7714_s1 = inlined_call_operand.hbm [shape: s8[1024,1024], index: 1, kind: input, shape index: {}]   ;;  %s7715_s2 = inlined_call_operand.vmem [shape: f32[1024,1], index: 2, kind: input, shape index: {}]   ;;  %s7716_s3 = inlined_call_operand.vmem [shape: f32[1,128], index: 3, kind: input, shape index: {}]   ;;  %s7717_s4 = inlined_call_operand.hbm [shape: f32[1024,128], index: 4, kind: output, shape index: {}]  }
   0x1   :  { %11 = vsyncpa [#allocation6 + $0x1], 0 }
   0x2   :  { %12 = vsyncpa [#allocation7], 0  ;;  %s5706_s15 = smov 0   ;;  %s5708_s16 = smov 0  }
   0x3   :  { %s5710_s17 = smov 0   ;;  %s5712_s18 = smov 0  }
   0x4   :  { %s5714_s19 = smov 0   ;;  %s5716_s20 = smov 0  }
   0x5   :  { %s5718_s21 = smov 0   ;;  %s5720_s22 = smov 0  }
   0x6 LB: > { %s4666_s23 = sadd.s32 4294967295, %s5672_s22   ;;  %s33_s24 = sadd.s32 1, %s5664_s20  ;;  %s5672_s22 = sphi %s5720_s22, %s18_s22   ;;  %s5668_s21 = sphi %s5718_s21, %s8252_s21   ;;  %s5664_s20 = sphi %s5716_s20, %s8251_s20   ;;  %s5660_s19 = sphi %s5714_s19, %s8250_s19   ;;  %s5656_s18 = sphi %s5712_s18, %s8249_s18   ;;  %s5652_s17 = sphi %s5710_s17, %s8248_s17   ;;  %s5648_s16 = sphi %s5708_s16, %s8247_s16   ;;  %s5644_s15 = sphi %s5706_s15, %s8246_s15  }
   0x7   : > { %p35_p0 = scmp.ge.s32.totalorder %s33_s24, 2  ;;  %s37_s25 = sadd.s32 1, %s5668_s21 }
   0x8   : > { %s46_s26 = sadd.s32 1, %s5652_s17  ;;  %p53_p1 = scmp.ne.s32.totalorder %s5652_s17, %s5648_s16 }
   0x9   : > { %s8254_s24 = smov (%p35_p0, %s33_s24), 0  ;;  %s8256_s25 = smov (!%p35_p0, %s37_s25), %s5668_s21 }
   0xa   : > { %s41_s27 = ssub.s32 %s5664_s20, %s8254_s24  ;;  %p54_p2 = scmp.eq.s32.totalorder %s5672_s22, 0 }
   0xb   : > { %p39_p3 = scmp.ge.s32.totalorder %s8256_s25, 3  ;;  %p44_p4 = scmp.eq.s32.totalorder %s41_s27, 0 }
   0xc   : > { %p5756_p5 = por %p54_p2, %p53_p1  ;;  %p59_p6 = scmp.ne.s32.totalorder %s5648_s16, %s5644_s15 }
   0xd   : > { %s8258_s25 = smov (%p39_p3, %s8256_s25), 0  ;;  %p60_p7 = scmp.eq.s32.totalorder %s4666_s23, 0 }
   0xe   : > { %s5764_s29 = scalar_select %p44_p4, %s5652_s17, %s46_s26  }
   0xf   : > { %p5152_p8 = scmp.lt.s32.totalorder %s5672_s22, 6  ;;  %s154_s30 = sand.u32 1, %s5652_s17  }
  0x10   : > { %p5770_p9 = por %p60_p7, %p59_p6  ;;  %s4669_s6 = sshll.u32 %s154_s30, 10 }
  0x11   : > { %s4885_s7 = sshll.u32 %s5664_s20, 14  ;;  %s158_s11 = scalar_lea.vmem [#allocation5], %s4669_s6 }
  0x12   : > { %s167_s10 = scalar_lea.hbm %s7714_s1, %s4885_s7  ;;  %s168_s12 = sshll.u32 %s158_s11, 4  ;;  %s169_s12 = int_to_ptr.vmem [resolvable:$true] %s168_s12 }
  0x13   : > { %p5780_p10 = pnand %p5152_p8, %p5756_p5  ;;  %s155_s14 = scalar_lea.sflag [#allocation6], %s154_s30 }
  0x14   : > { %s5561_s15 = scalar_lea.vmem %s169_s12, 16384  ;;  %s5674_s26 = smov [#allocation5]  }
  0x15   : > { %p5550_p11 = pneg %p5780_p10  ;;  %p5562_p12 = scmp.ne.s32.totalorder %s169_s12, %s5561_s15 }
  0x16   : > { %s5566_s27 = sshll.u32 %s5674_s26, 4  ;;  %s5567_s27 = int_to_ptr.vmem [resolvable:$false] %s5566_s27 }
  0x17   : > { %p5564_p13 = pnand %p5562_p12, %p5550_p11  ;;  %s5568_s7 = scalar_lea.vmem %s5567_s27, 32768 }
  0x18   : > { %p5569_p1 = scmp.lt.s32.totalorder %s169_s12, %s5567_s27  ;;  %p5570_p2 = scmp.lt.s32.totalorder %s5568_s7, %s5561_s15 }
  0x19   : > { %p5565_p0 = pneg %p5564_p13 }
  0x1a   : > { %p5571_p3 = por %p5570_p2, %p5569_p1 }
  0x1c   : > { %p5572_p4 = pnand %p5571_p3, %p5565_p0 }
  0x1e   : > { %5575 = shalt.err (!%p5572_p4)
}
  0x1f   : > { %s5675_s28 = smov 1024   ;;  %s5676_s30 = smov 64  }
  0x20   : > { %5151 = dma.hbm_to_vmem [thread:$0]  (!%p5780_p10), %s167_s10, 16384, %s169_s12, %s155_s14, %s5675_s28, %s5675_s28, %s5676_s30  }
  0x21   : > { %p4673_p5 = scmp.ge.s32.totalorder %s5672_s22, 1  ;;  %p185_p6 = scmp.lt.s32.totalorder %s5672_s22, 7 }
  0x23   : > { %p186_p7 = pnand %p4673_p5, %p185_p6 }
  0x25   : > { %189 = sbr.rel (%p186_p7) target bundleno = 1179 (0x49b), region = 32 }
  0x2a   : > { %s191_s6 = sand.u32 1, %s5648_s16  }
  0x2b   : > { %s4674_s8 = sshll.u32 %s191_s6, 10  ;;  %s192_s9 = scalar_lea.sflag [#allocation6], %s191_s6 }
  0x2c   : > { %s5791_s11 = scalar_lea.vmem [#allocation5], %s4674_s8 }
  0x2d   : > { %5633 = dma.done.wait (%p5770_p9), %s192_s9, 16384  }
  0x2e   : > { %5635 = vsyncadd (%p5770_p9), %s192_s9, 4294950912  ;;  %s4675_s10 = sshll.u32 %s5656_s18, 6  ;;  %p227_p8 = scmp.lt.s32.totalorder %s5660_s19, 0 }
  0x2f   : > { %p221_p10 = scmp.lt.s32.totalorder %s4675_s10, 127  ;;  %s228_s12 = ssub.s32 0, %s5660_s19 }
  0x30   : > { %s4677_s13 = smin.u32 %s5660_s19, %s228_s12  ;;  %s5802_s14 = sshll.u32 %s5656_s18, 9 }
  0x31   : > { %s8260_s10 = smov (!%p221_p10, %s4675_s10), 127  ;;  %s230_s15 = sand.u32 1, %s4677_s13  }
  0x32   : > { %s235_s26 = sadd.s32 %s5656_s18, %s5660_s19  ;;  %s4676_s27 = sshll.u32 %s8260_s10, 3 }
  0x33   : > { %s231_s5 = ssub.s32 0, %s230_s15  ;;  %s5809_s30 = scalar_lea.vmem %s7715_s2, %s4676_s27 }
  0x34   : > { %s8262_s5 = smov (!%p227_p8, %s231_s5), %s230_s15  ;;  %p4679_p9 = scmp.ne.s32.totalorder %s235_s26, 0 }
  0x36   : > { %240 = sbr.rel (%p4679_p9) target bundleno = 95 (0x5f), region = 40 }
  0x3b   : > { %v274_v0 = vld [vmem:[%s7713_s0] sm:$0xff]  ;;  %v276_v1 = vld [vmem:[%s7713_s0 + $0x8] sm:$0xff]  ;;  %v278_v2 = vld [vmem:[%s7713_s0 + $0x10] sm:$0xff] }
  0x3c   : > { %275 = vst [vmem:[#allocation2] sm:$0xff] %v274_v0  ;;  %277 = vst [vmem:[#allocation2 + $0x8] sm:$0xff] %v276_v1  ;;  %v280_v3 = vld [vmem:[%s7713_s0 + $0x18] sm:$0xff]  ;;  %v282_v4 = vld [vmem:[%s7713_s0 + $0x20] sm:$0xff] }
  0x3d   : > { %279 = vst [vmem:[#allocation2 + $0x10] sm:$0xff] %v278_v2  ;;  %v284_v5 = vld [vmem:[%s7713_s0 + $0x28] sm:$0xff]  ;;  %281 = vst [vmem:[#allocation2 + $0x18] sm:$0xff] %v280_v3  ;;  %v286_v6 = vld [vmem:[%s7713_s0 + $0x30] sm:$0xff] }
  0x3e   : > { %283 = vst [vmem:[#allocation2 + $0x20] sm:$0xff] %v282_v4  ;;  %285 = vst [vmem:[#allocation2 + $0x28] sm:$0xff] %v284_v5  ;;  %v288_v7 = vld [vmem:[%s7713_s0 + $0x38] sm:$0xff]  ;;  %v290_v8 = vld [vmem:[%s7713_s0 + $0x40] sm:$0xff] }
  0x3f   : > { %287 = vst [vmem:[#allocation2 + $0x30] sm:$0xff] %v286_v6  ;;  %289 = vst [vmem:[#allocation2 + $0x38] sm:$0xff] %v288_v7  ;;  %v292_v9 = vld [vmem:[%s7713_s0 + $0x48] sm:$0xff]  ;;  %v294_v10 = vld [vmem:[%s7713_s0 + $0x50] sm:$0xff] }
  0x40   : > { %291 = vst [vmem:[#allocation2 + $0x40] sm:$0xff] %v290_v8  ;;  %v296_v11 = vld [vmem:[%s7713_s0 + $0x58] sm:$0xff]  ;;  %293 = vst [vmem:[#allocation2 + $0x48] sm:$0xff] %v292_v9  ;;  %v298_v12 = vld [vmem:[%s7713_s0 + $0x60] sm:$0xff] }
  0x41   : > { %295 = vst [vmem:[#allocation2 + $0x50] sm:$0xff] %v294_v10  ;;  %297 = vst [vmem:[#allocation2 + $0x58] sm:$0xff] %v296_v11  ;;  %v300_v13 = vld [vmem:[%s7713_s0 + $0x68] sm:$0xff]  ;;  %v302_v14 = vld [vmem:[%s7713_s0 + $0x70] sm:$0xff] }
  0x42   : > { %299 = vst [vmem:[#allocation2 + $0x60] sm:$0xff] %v298_v12  ;;  %301 = vst [vmem:[#allocation2 + $0x68] sm:$0xff] %v300_v13  ;;  %v304_v15 = vld [vmem:[%s7713_s0 + $0x78] sm:$0xff]  ;;  %v306_v16 = vld [vmem:[%s7713_s0 + $0x80] sm:$0xff] }
  0x43   : > { %303 = vst [vmem:[#allocation2 + $0x70] sm:$0xff] %v302_v14  ;;  %v308_v17 = vld [vmem:[%s7713_s0 + $0x88] sm:$0xff]  ;;  %305 = vst [vmem:[#allocation2 + $0x78] sm:$0xff] %v304_v15  ;;  %v310_v18 = vld [vmem:[%s7713_s0 + $0x90] sm:$0xff] }
  0x44   : > { %307 = vst [vmem:[#allocation2 + $0x80] sm:$0xff] %v306_v16  ;;  %309 = vst [vmem:[#allocation2 + $0x88] sm:$0xff] %v308_v17  ;;  %v312_v19 = vld [vmem:[%s7713_s0 + $0x98] sm:$0xff]  ;;  %v314_v20 = vld [vmem:[%s7713_s0 + $0xa0] sm:$0xff] }
  0x45   : > { %311 = vst [vmem:[#allocation2 + $0x90] sm:$0xff] %v310_v18  ;;  %313 = vst [vmem:[#allocation2 + $0x98] sm:$0xff] %v312_v19  ;;  %v316_v21 = vld [vmem:[%s7713_s0 + $0xa8] sm:$0xff]  ;;  %v318_v22 = vld [vmem:[%s7713_s0 + $0xb0] sm:$0xff] }
  0x46   : > { %315 = vst [vmem:[#allocation2 + $0xa0] sm:$0xff] %v314_v20  ;;  %v320_v23 = vld [vmem:[%s7713_s0 + $0xb8] sm:$0xff]  ;;  %317 = vst [vmem:[#allocation2 + $0xa8] sm:$0xff] %v316_v21  ;;  %v322_v24 = vld [vmem:[%s7713_s0 + $0xc0] sm:$0xff] }
  0x47   : > { %319 = vst [vmem:[#allocation2 + $0xb0] sm:$0xff] %v318_v22  ;;  %321 = vst [vmem:[#allocation2 + $0xb8] sm:$0xff] %v320_v23  ;;  %v324_v25 = vld [vmem:[%s7713_s0 + $0xc8] sm:$0xff]  ;;  %v326_v26 = vld [vmem:[%s7713_s0 + $0xd0] sm:$0xff] }
  0x48   : > { %323 = vst [vmem:[#allocation2 + $0xc0] sm:$0xff] %v322_v24  ;;  %325 = vst [vmem:[#allocation2 + $0xc8] sm:$0xff] %v324_v25  ;;  %v328_v27 = vld [vmem:[%s7713_s0 + $0xd8] sm:$0xff]  ;;  %v330_v28 = vld [vmem:[%s7713_s0 + $0xe0] sm:$0xff] }
  0x49   : > { %327 = vst [vmem:[#allocation2 + $0xd0] sm:$0xff] %v326_v26  ;;  %v332_v29 = vld [vmem:[%s7713_s0 + $0xe8] sm:$0xff]  ;;  %329 = vst [vmem:[#allocation2 + $0xd8] sm:$0xff] %v328_v27  ;;  %v334_v30 = vld [vmem:[%s7713_s0 + $0xf0] sm:$0xff] }
  0x4a   : > { %331 = vst [vmem:[#allocation2 + $0xe0] sm:$0xff] %v330_v28  ;;  %333 = vst [vmem:[#allocation2 + $0xe8] sm:$0xff] %v332_v29  ;;  %v336_v31 = vld [vmem:[%s7713_s0 + $0xf8] sm:$0xff]  ;;  %v338_v32 = vld [vmem:[%s7713_s0 + $0x100] sm:$0xff] }
  0x4b   : > { %335 = vst [vmem:[#allocation2 + $0xf0] sm:$0xff] %v334_v30  ;;  %337 = vst [vmem:[#allocation2 + $0xf8] sm:$0xff] %v336_v31  ;;  %v340_v33 = vld [vmem:[%s7713_s0 + $0x108] sm:$0xff]  ;;  %v342_v34 = vld [vmem:[%s7713_s0 + $0x110] sm:$0xff] }
  0x4c   : > { %339 = vst [vmem:[#allocation2 + $0x100] sm:$0xff] %v338_v32  ;;  %v344_v35 = vld [vmem:[%s7713_s0 + $0x118] sm:$0xff]  ;;  %341 = vst [vmem:[#allocation2 + $0x108] sm:$0xff] %v340_v33  ;;  %v346_v36 = vld [vmem:[%s7713_s0 + $0x120] sm:$0xff] }
  0x4d   : > { %343 = vst [vmem:[#allocation2 + $0x110] sm:$0xff] %v342_v34  ;;  %345 = vst [vmem:[#allocation2 + $0x118] sm:$0xff] %v344_v35  ;;  %v348_v37 = vld [vmem:[%s7713_s0 + $0x128] sm:$0xff]  ;;  %v350_v38 = vld [vmem:[%s7713_s0 + $0x130] sm:$0xff] }
  0x4e   : > { %347 = vst [vmem:[#allocation2 + $0x120] sm:$0xff] %v346_v36  ;;  %349 = vst [vmem:[#allocation2 + $0x128] sm:$0xff] %v348_v37  ;;  %v352_v39 = vld [vmem:[%s7713_s0 + $0x138] sm:$0xff]  ;;  %v354_v40 = vld [vmem:[%s7713_s0 + $0x140] sm:$0xff] }
  0x4f   : > { %351 = vst [vmem:[#allocation2 + $0x130] sm:$0xff] %v350_v38  ;;  %v356_v41 = vld [vmem:[%s7713_s0 + $0x148] sm:$0xff]  ;;  %353 = vst [vmem:[#allocation2 + $0x138] sm:$0xff] %v352_v39  ;;  %v358_v42 = vld [vmem:[%s7713_s0 + $0x150] sm:$0xff] }
  0x50   : > { %355 = vst [vmem:[#allocation2 + $0x140] sm:$0xff] %v354_v40  ;;  %357 = vst [vmem:[#allocation2 + $0x148] sm:$0xff] %v356_v41  ;;  %v360_v43 = vld [vmem:[%s7713_s0 + $0x158] sm:$0xff]  ;;  %v362_v44 = vld [vmem:[%s7713_s0 + $0x160] sm:$0xff] }
  0x51   : > { %359 = vst [vmem:[#allocation2 + $0x150] sm:$0xff] %v358_v42  ;;  %361 = vst [vmem:[#allocation2 + $0x158] sm:$0xff] %v360_v43  ;;  %v364_v45 = vld [vmem:[%s7713_s0 + $0x168] sm:$0xff]  ;;  %v366_v46 = vld [vmem:[%s7713_s0 + $0x170] sm:$0xff] }
  0x52   : > { %363 = vst [vmem:[#allocation2 + $0x160] sm:$0xff] %v362_v44  ;;  %v368_v47 = vld [vmem:[%s7713_s0 + $0x178] sm:$0xff]  ;;  %365 = vst [vmem:[#allocation2 + $0x168] sm:$0xff] %v364_v45  ;;  %v370_v48 = vld [vmem:[%s7713_s0 + $0x180] sm:$0xff] }
  0x53   : > { %367 = vst [vmem:[#allocation2 + $0x170] sm:$0xff] %v366_v46  ;;  %369 = vst [vmem:[#allocation2 + $0x178] sm:$0xff] %v368_v47  ;;  %v372_v49 = vld [vmem:[%s7713_s0 + $0x188] sm:$0xff]  ;;  %v374_v50 = vld [vmem:[%s7713_s0 + $0x190] sm:$0xff] }
  0x54   : > { %371 = vst [vmem:[#allocation2 + $0x180] sm:$0xff] %v370_v48  ;;  %373 = vst [vmem:[#allocation2 + $0x188] sm:$0xff] %v372_v49  ;;  %v376_v51 = vld [vmem:[%s7713_s0 + $0x198] sm:$0xff]  ;;  %v378_v52 = vld [vmem:[%s7713_s0 + $0x1a0] sm:$0xff] }
  0x55   : > { %375 = vst [vmem:[#allocation2 + $0x190] sm:$0xff] %v374_v50  ;;  %v380_v53 = vld [vmem:[%s7713_s0 + $0x1a8] sm:$0xff]  ;;  %377 = vst [vmem:[#allocation2 + $0x198] sm:$0xff] %v376_v51  ;;  %v382_v54 = vld [vmem:[%s7713_s0 + $0x1b0] sm:$0xff] }
  0x56   : > { %379 = vst [vmem:[#allocation2 + $0x1a0] sm:$0xff] %v378_v52  ;;  %381 = vst [vmem:[#allocation2 + $0x1a8] sm:$0xff] %v380_v53  ;;  %v384_v55 = vld [vmem:[%s7713_s0 + $0x1b8] sm:$0xff]  ;;  %v386_v56 = vld [vmem:[%s7713_s0 + $0x1c0] sm:$0xff] }
  0x57   : > { %383 = vst [vmem:[#allocation2 + $0x1b0] sm:$0xff] %v382_v54  ;;  %385 = vst [vmem:[#allocation2 + $0x1b8] sm:$0xff] %v384_v55  ;;  %v388_v57 = vld [vmem:[%s7713_s0 + $0x1c8] sm:$0xff]  ;;  %v390_v58 = vld [vmem:[%s7713_s0 + $0x1d0] sm:$0xff] }
  0x58   : > { %387 = vst [vmem:[#allocation2 + $0x1c0] sm:$0xff] %v386_v56  ;;  %v392_v59 = vld [vmem:[%s7713_s0 + $0x1d8] sm:$0xff]  ;;  %389 = vst [vmem:[#allocation2 + $0x1c8] sm:$0xff] %v388_v57  ;;  %v394_v60 = vld [vmem:[%s7713_s0 + $0x1e0] sm:$0xff] }
  0x59   : > { %391 = vst [vmem:[#allocation2 + $0x1d0] sm:$0xff] %v390_v58  ;;  %393 = vst [vmem:[#allocation2 + $0x1d8] sm:$0xff] %v392_v59  ;;  %v396_v61 = vld [vmem:[%s7713_s0 + $0x1e8] sm:$0xff]  ;;  %v398_v62 = vld [vmem:[%s7713_s0 + $0x1f0] sm:$0xff] }
  0x5a   : > { %395 = vst [vmem:[#allocation2 + $0x1e0] sm:$0xff] %v394_v60  ;;  %397 = vst [vmem:[#allocation2 + $0x1e8] sm:$0xff] %v396_v61  ;;  %v400_v63 = vld [vmem:[%s7713_s0 + $0x1f8] sm:$0xff] }
  0x5b   : > { %399 = vst [vmem:[#allocation2 + $0x1f0] sm:$0xff] %v398_v62  ;;  %401 = vst [vmem:[#allocation2 + $0x1f8] sm:$0xff] %v400_v63 }
  0x5c   : > { %409 = vsyncadd [#allocation4], 8192 }
  0x5d   : > { %5636 = dma.done.wait [#allocation4], 8192 }
  0x5e   : > { %5637 = vsyncadd [#allocation4], 4294959104 }
  0x5f PF: > { %s4886_s26 = sshll.u32 %s8262_s5, 9  ;;  %v6007_v0 = vld [vmem:[%s5791_s11 + $0x8] sm:$0xff]  ;;  %v6010_v1 = vld [vmem:[%s5791_s11 + $0x18] sm:$0xff]  ;;  %v5677_v2 = vmov 0   ;;  %v482_v35 = vld [vmem:[%s5791_s11] sm:$0xff]  ;;  %p4811_p11 = scmp.ne.s32.totalorder %s5660_s19, 0 }
  0x60   : > { %1448 = vmatprep.subr.bf16.mxu0 %v5677_v2  ;;  %1737 = vmatprep.subr.bf16.mxu1 %v5677_v2  ;;  %v611_v3 = vunpack.c.l.s8.bf16 %v6007_v0  ;;  %v613_v4 = vunpack.c.l.s8.bf16 %v6010_v1  ;;  %s6016_s27 = scalar_lea.vmem [#allocation2], %s4886_s26  ;;  %v484_v37 = vld [vmem:[%s5791_s11 + $0x10] sm:$0xff]  ;;  %v610_v40 = vunpack.c.l.s8.bf16 %v482_v35  ;;  %v619_v42 = vunpack.c.h.s8.bf16 %v6007_v0  ;;  %v491_v45 = vld [vmem:[%s5791_s11 + $0x48] sm:$0xff]  ;;  %v493_v46 = vld [vmem:[%s5791_s11 + $0x58] sm:$0xff]  ;;  %s7182_s6 = scalar_lea.vmem (!%p4811_p11), [#allocation8], %s5802_s14 }
  0x61   : > { %5226 = vset.pattern.permute.xlu1 %v5677_v2  ;;  %5225 = vset.pattern.permute.xlu0 %v5677_v2  ;;  %v612_v41 = vunpack.c.l.s8.bf16 %v484_v37  ;;  %v621_v44 = vunpack.c.h.s8.bf16 %v6010_v1  ;;  %v618_v49 = vunpack.c.h.s8.bf16 %v482_v35  ;;  %v620_v50 = vunpack.c.h.s8.bf16 %v484_v37  ;;  %v490_v55 = vld [vmem:[%s5791_s11 + $0x40] sm:$0xff]  ;;  %v492_v56 = vld [vmem:[%s5791_s11 + $0x50] sm:$0xff]  ;;  %v499_v1 = vld [vmem:[%s5791_s11 + $0x88] sm:$0xff] }
  0x62   : > { %v5227_v5 = vld [vmem:[%s6016_s27 + $0x38] sm:$0xff]   ;;  %1480 = vmatprep.mubr.bf16.mxu0 %v611_v3  ;;  %1769 = vmatprep.mubr.bf16.mxu1 %v613_v4  ;;  %v5229_v7 = vld [vmem:[%s6016_s27 + $0x30] sm:$0xff]   ;;  %v5231_v9 = vld [vmem:[%s6016_s27 + $0x28] sm:$0xff]   ;;  %v627_v51 = vunpack.c.l.s8.bf16 %v491_v45  ;;  %v629_v52 = vunpack.c.l.s8.bf16 %v493_v46  ;;  %v626_v59 = vunpack.c.l.s8.bf16 %v490_v55  ;;  %v628_v60 = vunpack.c.l.s8.bf16 %v492_v56 }
  0x63   : > { %v5228_v6 = vld [vmem:[%s6016_s27 + $0xb8] sm:$0xff]   ;;  %1449 = vmatpush1.bf16.msra.mxu0 %v5227_v5  ;;  %v5230_v8 = vld [vmem:[%s6016_s27 + $0xb0] sm:$0xff]   ;;  %v5232_v10 = vld [vmem:[%s6016_s27 + $0xa8] sm:$0xff]   ;;  %v635_v61 = vunpack.c.h.s8.bf16 %v491_v45  ;;  %v637_v62 = vunpack.c.h.s8.bf16 %v493_v46 }
  0x64   : > { %1738 = vmatpush1.bf16.msra.mxu1 %v5228_v6  ;;  %1450 = vmatprep.subr.bf16.mxu0 %v5677_v2  ;;  %v5233_v11 = vld [vmem:[%s6016_s27 + $0x20] sm:$0xff]   ;;  %v5235_v13 = vld [vmem:[%s6016_s27 + $0x18] sm:$0xff]   ;;  %v5237_v15 = vld [vmem:[%s6016_s27 + $0x10] sm:$0xff]   ;;  %v634_v6 = vunpack.c.h.s8.bf16 %v490_v55 }
  0x65   : > { %1739 = vmatprep.subr.bf16.mxu1 %v5677_v2  ;;  %v5234_v12 = vld [vmem:[%s6016_s27 + $0xa0] sm:$0xff]   ;;  %v5236_v14 = vld [vmem:[%s6016_s27 + $0x98] sm:$0xff]   ;;  %v5238_v16 = vld [vmem:[%s6016_s27 + $0x90] sm:$0xff]  }
  0x66   : > { %v5239_v17 = vld [vmem:[%s6016_s27 + $0x8] sm:$0xff]   ;;  %v5241_v19 = vld [vmem:[%s6016_s27] sm:$0xff]   ;;  %v5243_v21 = vld [vmem:[%s6016_s27 + $0x78] sm:$0xff]  }
  0x67   : > { %1451 = vmatpush1.bf16.msra.mxu0 %v5229_v7  ;;  %v5240_v18 = vld [vmem:[%s6016_s27 + $0x88] sm:$0xff]   ;;  %v5242_v20 = vld [vmem:[%s6016_s27 + $0x80] sm:$0xff]   ;;  %v5244_v22 = vld [vmem:[%s6016_s27 + $0xf8] sm:$0xff]   ;;  %v636_v7 = vunpack.c.h.s8.bf16 %v492_v56 }
  0x68   : > { %1740 = vmatpush1.bf16.msra.mxu1 %v5230_v8  ;;  %1452 = vmatprep.subr.bf16.mxu0 %v5677_v2  ;;  %v5245_v23 = vld [vmem:[%s6016_s27 + $0x70] sm:$0xff]   ;;  %v5247_v25 = vld [vmem:[%s6016_s27 + $0x68] sm:$0xff]   ;;  %v5249_v27 = vld [vmem:[%s6016_s27 + $0x60] sm:$0xff]   ;;  %v643_v8 = vunpack.c.l.s8.bf16 %v499_v1 }
  0x69   : > { %1741 = vmatprep.subr.bf16.mxu1 %v5677_v2  ;;  %v5246_v24 = vld [vmem:[%s6016_s27 + $0xf0] sm:$0xff]   ;;  %v5248_v26 = vld [vmem:[%s6016_s27 + $0xe8] sm:$0xff]   ;;  %v5250_v28 = vld [vmem:[%s6016_s27 + $0xe0] sm:$0xff]  }
  0x6a   : > { %v5251_v29 = vld [vmem:[%s6016_s27 + $0x58] sm:$0xff]   ;;  %v5253_v31 = vld [vmem:[%s6016_s27 + $0x50] sm:$0xff]   ;;  %v5255_v33 = vld [vmem:[%s6016_s27 + $0x48] sm:$0xff]  }
  0x6b   : > { %1453 = vmatpush1.bf16.msra.mxu0 %v5231_v9  ;;  %v5252_v30 = vld [vmem:[%s6016_s27 + $0xd8] sm:$0xff]   ;;  %v5254_v32 = vld [vmem:[%s6016_s27 + $0xd0] sm:$0xff]   ;;  %v5256_v34 = vld [vmem:[%s6016_s27 + $0xc8] sm:$0xff]  }
  0x6c   : > { %1742 = vmatpush1.bf16.msra.mxu1 %v5232_v10  ;;  %1454 = vmatprep.subr.bf16.mxu0 %v5677_v2  ;;  %v5257_v36 = vld [vmem:[%s6016_s27 + $0x40] sm:$0xff]   ;;  %v5259_v39 = vld [vmem:[%s6016_s27 + $0x138] sm:$0xff]   ;;  %v5261_v47 = vld [vmem:[%s6016_s27 + $0x130] sm:$0xff]  }
  0x6d   : > { %1743 = vmatprep.subr.bf16.mxu1 %v5677_v2  ;;  %v5258_v38 = vld [vmem:[%s6016_s27 + $0xc0] sm:$0xff]   ;;  %v5260_v43 = vld [vmem:[%s6016_s27 + $0x1b8] sm:$0xff]   ;;  %v5262_v48 = vld [vmem:[%s6016_s27 + $0x1b0] sm:$0xff]  }
  0x6e   : > { %v5263_v53 = vld [vmem:[%s6016_s27 + $0x128] sm:$0xff]   ;;  %v5265_v57 = vld [vmem:[%s6016_s27 + $0x120] sm:$0xff]   ;;  %v5267_v63 = vld [vmem:[%s6016_s27 + $0x118] sm:$0xff]  }
  0x6f   : > { %1455 = vmatpush1.bf16.msra.mxu0 %v5233_v11  ;;  %v5264_v54 = vld [vmem:[%s6016_s27 + $0x1a8] sm:$0xff]   ;;  %v5266_v58 = vld [vmem:[%s6016_s27 + $0x1a0] sm:$0xff]   ;;  %v5268_v0 = vld [vmem:[%s6016_s27 + $0x198] sm:$0xff]  }
  0x70   : > { %1744 = vmatpush1.bf16.msra.mxu1 %v5234_v12  ;;  %1456 = vmatprep.subr.bf16.mxu0 %v5677_v2  ;;  %v5269_v3 = vld [vmem:[%s6016_s27 + $0x110] sm:$0xff]   ;;  %v501_v4 = vld [vmem:[%s5791_s11 + $0x98] sm:$0xff]  ;;  %v5271_v10 = vld [vmem:[%s6016_s27 + $0x108] sm:$0xff]  }
  0x71   : > { %1745 = vmatprep.subr.bf16.mxu1 %v5677_v2  ;;  %v5270_v5 = vld [vmem:[%s6016_s27 + $0x190] sm:$0xff]   ;;  %v645_v9 = vunpack.c.l.s8.bf16 %v501_v4  ;;  %v5272_v11 = vld [vmem:[%s6016_s27 + $0x188] sm:$0xff]   ;;  %v498_v12 = vld [vmem:[%s5791_s11 + $0x80] sm:$0xff] }
  0x72   : > { %v514_v46 = vld [vmem:[%s5791_s11 + $0x100] sm:$0xff]  ;;  %v5284_v55 = vld [vmem:[%s6016_s27 + $0x1d8] sm:$0xff]  }
  0x73   : > { %1457 = vmatpush1.bf16.msra.mxu0 %v5235_v13  ;;  %v500_v13 = vld [vmem:[%s5791_s11 + $0x90] sm:$0xff]  ;;  %v682_v56 = vunpack.c.h.s8.bf16 %v514_v46 }
  0x74   : > { %1746 = vmatpush1.bf16.msra.mxu1 %v5236_v14  ;;  %1458 = vmatprep.subr.bf16.mxu0 %v5677_v2  ;;  %v5273_v14 = vld [vmem:[%s6016_s27 + $0x100] sm:$0xff]  }
  0x75   : > { %1747 = vmatprep.subr.bf16.mxu1 %v5677_v2 }
  0x77   : > { %1459 = vmatpush1.bf16.msra.mxu0 %v5237_v15  ;;  %v5274_v15 = vld [vmem:[%s6016_s27 + $0x180] sm:$0xff]  }
  0x78   : > { %1748 = vmatpush1.bf16.msra.mxu1 %v5238_v16  ;;  %1460 = vmatprep.subr.bf16.mxu0 %v5677_v2  ;;  %v642_v16 = vunpack.c.l.s8.bf16 %v498_v12 }
  0x79   : > { %1749 = vmatprep.subr.bf16.mxu1 %v5677_v2 }
  0x7b   : > { %1461 = vmatpush1.bf16.msra.mxu0 %v5239_v17  ;;  %v644_v17 = vunpack.c.l.s8.bf16 %v500_v13 }
  0x7c   : > { %1750 = vmatpush1.bf16.msra.mxu1 %v5240_v18  ;;  %1462 = vmatprep.subr.bf16.mxu0 %v5677_v2  ;;  %v651_v18 = vunpack.c.h.s8.bf16 %v499_v1 }
  0x7d   : > { %1751 = vmatprep.subr.bf16.mxu1 %v5677_v2 }
  0x7f   : > { %1463 = vmatpush1.bf16.msra.mxu0 %v5241_v19  ;;  %v653_v19 = vunpack.c.h.s8.bf16 %v501_v4  ;;  %v5285_v4 = vld [vmem:[%s6016_s27 + $0x150] sm:$0xff]  }
  0x80   : > { %1752 = vmatpush1.bf16.msra.mxu1 %v5242_v20  ;;  %1464 = vmatprep.subr.bf16.mxu0 %v5677_v2  ;;  %v5275_v20 = vld [vmem:[%s6016_s27 + $0x178] sm:$0xff]  }
  0x81   : > { %1753 = vmatprep.subr.bf16.mxu1 %v5677_v2 }
  0x83   : > { %1465 = vmatpush2.bf16.msra.mxu0 %v5243_v21  ;;  %v5276_v21 = vld [vmem:[%s6016_s27 + $0x1f8] sm:$0xff]  }
  0x84   : > { %1754 = vmatpush2.bf16.msra.mxu1 %v5244_v22  ;;  %1466 = vmatprep.subr.bf16.mxu0 %v5677_v2  ;;  %v507_v22 = vld [vmem:[%s5791_s11 + $0xc8] sm:$0xff] }
  0x85   : > { %1755 = vmatprep.subr.bf16.mxu1 %v5677_v2 }
  0x87   : > { %1467 = vmatpush2.bf16.msra.mxu0 %v5245_v23  ;;  %v5277_v23 = vld [vmem:[%s6016_s27 + $0x170] sm:$0xff]  }
  0x88   : > { %1756 = vmatpush2.bf16.msra.mxu1 %v5246_v24  ;;  %1468 = vmatprep.subr.bf16.mxu0 %v5677_v2  ;;  %v509_v24 = vld [vmem:[%s5791_s11 + $0xd8] sm:$0xff] }
  0x89   : > { %1757 = vmatprep.subr.bf16.mxu1 %v5677_v2  ;;  %v669_v37 = vunpack.c.h.s8.bf16 %v509_v24 }
  0x8b   : > { %1469 = vmatpush2.bf16.msra.mxu0 %v5247_v25  ;;  %v5278_v25 = vld [vmem:[%s6016_s27 + $0x1f0] sm:$0xff]  }
  0x8c   : > { %1758 = vmatpush2.bf16.msra.mxu1 %v5248_v26  ;;  %1470 = vmatprep.subr.bf16.mxu0 %v5677_v2  ;;  %v650_v26 = vunpack.c.h.s8.bf16 %v498_v12  ;;  %v532_v12 = vld [vmem:[%s5791_s11 + $0x190] sm:$0xff] }
  0x8d   : > { %1759 = vmatprep.subr.bf16.mxu1 %v5677_v2 }
  0x8f   : > { %1471 = vmatpush2.bf16.msra.mxu0 %v5249_v27  ;;  %v652_v27 = vunpack.c.h.s8.bf16 %v500_v13 }
  0x90   : > { %1760 = vmatpush2.bf16.msra.mxu1 %v5250_v28  ;;  %1472 = vmatprep.subr.bf16.mxu0 %v5677_v2  ;;  %v659_v28 = vunpack.c.l.s8.bf16 %v507_v22 }
  0x91   : > { %1761 = vmatprep.subr.bf16.mxu1 %v5677_v2 }
  0x93   : > { %1473 = vmatpush2.bf16.msra.mxu0 %v5251_v29  ;;  %v661_v29 = vunpack.c.l.s8.bf16 %v509_v24 }
  0x94   : > { %1762 = vmatpush2.bf16.msra.mxu1 %v5252_v30  ;;  %1474 = vmatprep.subr.bf16.mxu0 %v5677_v2  ;;  %v5279_v30 = vld [vmem:[%s6016_s27 + $0x168] sm:$0xff]  }
  0x95   : > { %1763 = vmatprep.subr.bf16.mxu1 %v5677_v2 }
  0x97   : > { %1475 = vmatpush2.bf16.msra.mxu0 %v5253_v31  ;;  %v5280_v31 = vld [vmem:[%s6016_s27 + $0x1e8] sm:$0xff]  }
  0x98   : > { %1764 = vmatpush2.bf16.msra.mxu1 %v5254_v32  ;;  %1476 = vmatprep.subr.bf16.mxu0 %v5677_v2  ;;  %v506_v32 = vld [vmem:[%s5791_s11 + $0xc0] sm:$0xff] }
  0x99   : > { %1765 = vmatprep.subr.bf16.mxu1 %v5677_v2 }
  0x9b   : > { %1477 = vmatpush2.bf16.msra.mxu0 %v5255_v33  ;;  %v508_v33 = vld [vmem:[%s5791_s11 + $0xd0] sm:$0xff] }
  0x9c   : > { %1766 = vmatpush2.bf16.msra.mxu1 %v5256_v34  ;;  %1478 = vmatprep.subr.bf16.mxu0 %v5677_v2  ;;  %v658_v34 = vunpack.c.l.s8.bf16 %v506_v32  ;;  %v660_v35 = vunpack.c.l.s8.bf16 %v508_v33 }
  0x9d   : > { %1767 = vmatprep.subr.bf16.mxu1 %v5677_v2 }
  0x9f   : > { %1479 = vmatpush2.bf16.msra.mxu0 %v5257_v36  ;;  %v667_v36 = vunpack.c.h.s8.bf16 %v507_v22  ;;  %v716_v22 = vunpack.c.h.s8.bf16 %v532_v12 }
  0xa0   : > { %1768 = vmatpush2.bf16.msra.mxu1 %v5258_v38  ;;  %2026 = vmatprep.subr.bf16.mxu0 %v5677_v2  ;;  %v5281_v38 = vld [vmem:[%s6016_s27 + $0x160] sm:$0xff]  }
  0xa1   : > { %2315 = vmatprep.subr.bf16.mxu1 %v5677_v2 }
  0xa2   : > { %1481 = vmatmul.mubr.bf16.vlgmr.msra.gmra.mxu0 %v610_v40  ;;  %v515_v40 = vld [vmem:[%s5791_s11 + $0x108] sm:$0xff] }
  0xa3   : > { %1770 = vmatmul.mubr.bf16.vlgmr.msra.gmra.mxu1 %v612_v41  ;;  %2027 = vmatpush1.bf16.msra.mxu0 %v5259_v39  ;;  %v5282_v39 = vld [vmem:[%s6016_s27 + $0x1e0] sm:$0xff]   ;;  %v517_v41 = vld [vmem:[%s5791_s11 + $0x118] sm:$0xff] }
  0xa4   : > { %2316 = vmatpush1.bf16.msra.mxu1 %v5260_v43  ;;  %1488 = vmatprep.mubr.bf16.mxu0 %v619_v42  ;;  %v666_v42 = vunpack.c.h.s8.bf16 %v506_v32  ;;  %v668_v43 = vunpack.c.h.s8.bf16 %v508_v33  ;;  %v677_v45 = vunpack.c.l.s8.bf16 %v517_v41  ;;  %v549_v32 = vld [vmem:[%s5791_s11 + $0x218] sm:$0xff]  ;;  %v5290_v33 = vld [vmem:[%s6016_s27 + $0x1c0] sm:$0xff]  }
  0xa5   : > { %1777 = vmatprep.mubr.bf16.mxu1 %v621_v44  ;;  %2028 = vmatprep.subr.bf16.mxu0 %v5677_v2  ;;  %v675_v44 = vunpack.c.l.s8.bf16 %v515_v40 }
  0xa6   : > { %2317 = vmatprep.subr.bf16.mxu1 %v5677_v2 }
  0xa7   : > { %2029 = vmatpush1.bf16.msra.mxu0 %v5261_v47  ;;  %v516_v47 = vld [vmem:[%s5791_s11 + $0x110] sm:$0xff] }
  0xa8   : > { %2318 = vmatpush1.bf16.msra.mxu1 %v5262_v48  ;;  %2030 = vmatprep.subr.bf16.mxu0 %v5677_v2  ;;  %v674_v48 = vunpack.c.l.s8.bf16 %v514_v46 }
  0xa9   : > { %2319 = vmatprep.subr.bf16.mxu1 %v5677_v2 }
  0xaa   : > { %1489 = vmatmul.mubr.bf16.gmra.mxu0 %v618_v49  ;;  %v676_v49 = vunpack.c.l.s8.bf16 %v516_v47 }
  0xab   : > { %1778 = vmatmul.mubr.bf16.gmra.mxu1 %v620_v50  ;;  %1496 = vmatprep.mubr.bf16.mxu0 %v627_v51  ;;  %v683_v50 = vunpack.c.h.s8.bf16 %v515_v40  ;;  %v685_v51 = vunpack.c.h.s8.bf16 %v517_v41 }
  0xac   : > { %1785 = vmatprep.mubr.bf16.mxu1 %v629_v52  ;;  %2031 = vmatpush1.bf16.msra.mxu0 %v5263_v53  ;;  %v523_v52 = vld [vmem:[%s5791_s11 + $0x148] sm:$0xff]  ;;  %v5283_v53 = vld [vmem:[%s6016_s27 + $0x158] sm:$0xff]  }
  0xad   : > { %2320 = vmatpush1.bf16.msra.mxu1 %v5264_v54  ;;  %2032 = vmatprep.subr.bf16.mxu0 %v5677_v2  ;;  %v525_v54 = vld [vmem:[%s5791_s11 + $0x158] sm:$0xff] }
  0xae   : > { %2321 = vmatprep.subr.bf16.mxu1 %v5677_v2  ;;  %v701_v1 = vunpack.c.h.s8.bf16 %v525_v54 }
  0xb0   : > { %2033 = vmatpush1.bf16.msra.mxu0 %v5265_v57  ;;  %v684_v57 = vunpack.c.h.s8.bf16 %v516_v47 }
  0xb1   : > { %2322 = vmatpush1.bf16.msra.mxu1 %v5266_v58  ;;  %2034 = vmatprep.subr.bf16.mxu0 %v5677_v2  ;;  %v691_v58 = vunpack.c.l.s8.bf16 %v523_v52 }
  0xb2   : > { %1497 = vmatmul.mubr.bf16.gmra.mxu0 %v626_v59  ;;  %2323 = vmatprep.subr.bf16.mxu1 %v5677_v2  ;;  %v693_v59 = vunpack.c.l.s8.bf16 %v525_v54 }
  0xb3   : > { %1786 = vmatmul.mubr.bf16.gmra.mxu1 %v628_v60  ;;  %1504 = vmatprep.mubr.bf16.mxu0 %v635_v61  ;;  %v522_v60 = vld [vmem:[%s5791_s11 + $0x140] sm:$0xff]  ;;  %v524_v61 = vld [vmem:[%s5791_s11 + $0x150] sm:$0xff] }
  0xb4   : > { %1793 = vmatprep.mubr.bf16.mxu1 %v637_v62  ;;  %2035 = vmatpush1.bf16.msra.mxu0 %v5267_v63  ;;  %v690_v62 = vunpack.c.l.s8.bf16 %v522_v60  ;;  %v692_v63 = vunpack.c.l.s8.bf16 %v524_v61 }
  0xb5   : > { %2324 = vmatpush1.bf16.msra.mxu1 %v5268_v0  ;;  %2036 = vmatprep.subr.bf16.mxu0 %v5677_v2  ;;  %v699_v0 = vunpack.c.h.s8.bf16 %v523_v52 }
  0xb6   : > { %2325 = vmatprep.subr.bf16.mxu1 %v5677_v2 }
  0xb8   : > { %2037 = vmatpush1.bf16.msra.mxu0 %v5269_v3  ;;  %v531_v3 = vld [vmem:[%s5791_s11 + $0x188] sm:$0xff] }
  0xb9   : > { %2326 = vmatpush1.bf16.msra.mxu1 %v5270_v5  ;;  %2038 = vmatprep.subr.bf16.mxu0 %v5677_v2  ;;  %v533_v5 = vld [vmem:[%s5791_s11 + $0x198] sm:$0xff] }
  0xba   : > { %1505 = vmatmul.mubr.bf16.gmra.mxu0 %v634_v6  ;;  %2327 = vmatprep.subr.bf16.mxu1 %v5677_v2  ;;  %v5286_v6 = vld [vmem:[%s6016_s27 + $0x1d0] sm:$0xff]  }
  0xbb   : > { %1794 = vmatmul.mubr.bf16.gmra.mxu1 %v636_v7  ;;  %1512 = vmatprep.mubr.bf16.mxu0 %v643_v8  ;;  %v698_v7 = vunpack.c.h.s8.bf16 %v522_v60  ;;  %v700_v8 = vunpack.c.h.s8.bf16 %v524_v61 }
  0xbc   : > { %1801 = vmatprep.mubr.bf16.mxu1 %v645_v9  ;;  %2039 = vmatpush1.bf16.msra.mxu0 %v5271_v10  ;;  %v707_v9 = vunpack.c.l.s8.bf16 %v531_v3  ;;  %v709_v10 = vunpack.c.l.s8.bf16 %v533_v5 }
  0xbd   : > { %2328 = vmatpush1.bf16.msra.mxu1 %v5272_v11  ;;  %2040 = vmatprep.subr.bf16.mxu0 %v5677_v2  ;;  %v530_v11 = vld [vmem:[%s5791_s11 + $0x180] sm:$0xff] }
  0xbe   : > { %2329 = vmatprep.subr.bf16.mxu1 %v5677_v2  ;;  %v706_v13 = vunpack.c.l.s8.bf16 %v530_v11 }
  0xc0   : > { %2041 = vmatpush1.bf16.msra.mxu0 %v5273_v14  ;;  %v708_v14 = vunpack.c.l.s8.bf16 %v532_v12  ;;  %v572_v12 = vld [vmem:[%s5791_s11 + $0x2d0] sm:$0xff] }
  0xc1   : > { %2330 = vmatpush1.bf16.msra.mxu1 %v5274_v15  ;;  %2042 = vmatprep.subr.bf16.mxu0 %v5677_v2  ;;  %v715_v15 = vunpack.c.h.s8.bf16 %v531_v3 }
  0xc2   : > { %1513 = vmatmul.mubr.bf16.gmra.mxu0 %v642_v16  ;;  %2331 = vmatprep.subr.bf16.mxu1 %v5677_v2  ;;  %v717_v16 = vunpack.c.h.s8.bf16 %v533_v5  ;;  %v571_v5 = vld [vmem:[%s5791_s11 + $0x2c8] sm:$0xff] }
  0xc3   : > { %1802 = vmatmul.mubr.bf16.gmra.mxu1 %v644_v17  ;;  %1520 = vmatprep.mubr.bf16.mxu0 %v651_v18  ;;  %v539_v17 = vld [vmem:[%s5791_s11 + $0x1c8] sm:$0xff] }
  0xc4   : > { %1809 = vmatprep.mubr.bf16.mxu1 %v653_v19  ;;  %2043 = vmatpush2.bf16.msra.mxu0 %v5275_v20  ;;  %v5287_v18 = vld [vmem:[%s6016_s27 + $0x148] sm:$0xff]   ;;  %v541_v19 = vld [vmem:[%s5791_s11 + $0x1d8] sm:$0xff] }
  0xc5   : > { %2332 = vmatpush2.bf16.msra.mxu1 %v5276_v21  ;;  %2044 = vmatprep.subr.bf16.mxu0 %v5677_v2  ;;  %v5288_v20 = vld [vmem:[%s6016_s27 + $0x1c8] sm:$0xff]   ;;  %v714_v21 = vunpack.c.h.s8.bf16 %v530_v11  ;;  %v725_v24 = vunpack.c.l.s8.bf16 %v541_v19  ;;  %v570_v11 = vld [vmem:[%s5791_s11 + $0x2c0] sm:$0xff] }
  0xc6   : > { %2333 = vmatprep.subr.bf16.mxu1 %v5677_v2 }
  0xc8   : > { %2045 = vmatpush2.bf16.msra.mxu0 %v5277_v23  ;;  %v723_v23 = vunpack.c.l.s8.bf16 %v539_v17 }
  0xc9   : > { %2334 = vmatpush2.bf16.msra.mxu1 %v5278_v25  ;;  %2046 = vmatprep.subr.bf16.mxu0 %v5677_v2  ;;  %v538_v25 = vld [vmem:[%s5791_s11 + $0x1c0] sm:$0xff] }
  0xca   : > { %1521 = vmatmul.mubr.bf16.gmra.mxu0 %v650_v26  ;;  %2335 = vmatprep.subr.bf16.mxu1 %v5677_v2  ;;  %v540_v26 = vld [vmem:[%s5791_s11 + $0x1d0] sm:$0xff] }
  0xcb   : > { %1810 = vmatmul.mubr.bf16.gmra.mxu1 %v652_v27  ;;  %1528 = vmatprep.mubr.bf16.mxu0 %v659_v28  ;;  %v722_v27 = vunpack.c.l.s8.bf16 %v538_v25  ;;  %v724_v28 = vunpack.c.l.s8.bf16 %v540_v26 }
  0xcc   : > { %1817 = vmatprep.mubr.bf16.mxu1 %v661_v29  ;;  %2047 = vmatpush2.bf16.msra.mxu0 %v5279_v30  ;;  %v731_v29 = vunpack.c.h.s8.bf16 %v539_v17  ;;  %v733_v30 = vunpack.c.h.s8.bf16 %v541_v19  ;;  %v2738_v19 = vld [vmem:[%s5809_s30 + $0x18] sm:$0xff] }
  0xcd   : > { %2336 = vmatpush2.bf16.msra.mxu1 %v5280_v31  ;;  %2048 = vmatprep.subr.bf16.mxu0 %v5677_v2  ;;  %v5289_v31 = vld [vmem:[%s6016_s27 + $0x140] sm:$0xff]  }
  0xce   : > { %2337 = vmatprep.subr.bf16.mxu1 %v5677_v2 }
  0xd0   : > { %2049 = vmatpush2.bf16.msra.mxu0 %v5281_v38  ;;  %v546_v38 = vld [vmem:[%s5791_s11 + $0x200] sm:$0xff] }
  0xd1   : > { %2338 = vmatpush2.bf16.msra.mxu1 %v5282_v39  ;;  %2050 = vmatprep.subr.bf16.mxu0 %v5677_v2  ;;  %v548_v39 = vld [vmem:[%s5791_s11 + $0x210] sm:$0xff]  ;;  %v738_v40 = vunpack.c.l.s8.bf16 %v546_v38  ;;  %v746_v46 = vunpack.c.h.s8.bf16 %v546_v38 }
  0xd2   : > { %1529 = vmatmul.mubr.bf16.gmra.mxu0 %v658_v34  ;;  %2339 = vmatprep.subr.bf16.mxu1 %v5677_v2  ;;  %v730_v34 = vunpack.c.h.s8.bf16 %v538_v25  ;;  %v740_v41 = vunpack.c.l.s8.bf16 %v548_v39  ;;  %v748_v47 = vunpack.c.h.s8.bf16 %v548_v39 }
  0xd3   : > { %1818 = vmatmul.mubr.bf16.gmra.mxu1 %v660_v35  ;;  %1536 = vmatprep.mubr.bf16.mxu0 %v667_v36  ;;  %v732_v35 = vunpack.c.h.s8.bf16 %v540_v26  ;;  %v2740_v26 = vld [vmem:[%s5809_s30 + $0x28] sm:$0xff] }
  0xd4   : > { %1825 = vmatprep.mubr.bf16.mxu1 %v669_v37  ;;  %2051 = vmatpush2.bf16.msra.mxu0 %v5283_v53  ;;  %v741_v37 = vunpack.c.l.s8.bf16 %v549_v32 }
  0xd5   : > { %2340 = vmatpush2.bf16.msra.mxu1 %v5284_v55  ;;  %2052 = vmatprep.subr.bf16.mxu0 %v5677_v2 }
  0xd6   : > { %2341 = vmatprep.subr.bf16.mxu1 %v5677_v2 }
  0xd8   : > { %2053 = vmatpush2.bf16.msra.mxu0 %v5285_v4 }
  0xd9   : > { %2342 = vmatpush2.bf16.msra.mxu1 %v5286_v6  ;;  %2054 = vmatprep.subr.bf16.mxu0 %v5677_v2  ;;  %v573_v6 = vld [vmem:[%s5791_s11 + $0x2d8] sm:$0xff] }
  0xda   : > { %1537 = vmatmul.mubr.bf16.gmra.mxu0 %v666_v42  ;;  %2343 = vmatprep.subr.bf16.mxu1 %v5677_v2  ;;  %v797_v17 = vunpack.c.h.s8.bf16 %v573_v6 }
  0xdb   : > { %1826 = vmatmul.mubr.bf16.gmra.mxu1 %v668_v43  ;;  %1544 = vmatprep.mubr.bf16.mxu0 %v675_v44  ;;  %v749_v43 = vunpack.c.h.s8.bf16 %v549_v32  ;;  %v555_v44 = vld [vmem:[%s5791_s11 + $0x248] sm:$0xff] }
  0xdc   : > { %1833 = vmatprep.mubr.bf16.mxu1 %v677_v45  ;;  %2055 = vmatpush2.bf16.msra.mxu0 %v5287_v18  ;;  %v557_v45 = vld [vmem:[%s5791_s11 + $0x258] sm:$0xff]  ;;  %v763_v54 = vunpack.c.h.s8.bf16 %v555_v44  ;;  %v2735_v18 = vld [vmem:[%s5809_s30] sm:$0xff] }
  0xdd   : > { %2344 = vmatpush2.bf16.msra.mxu1 %v5288_v20  ;;  %2056 = vmatprep.subr.bf16.mxu0 %v5677_v2  ;;  %v765_v55 = vunpack.c.h.s8.bf16 %v557_v45  ;;  %v579_v20 = vld [vmem:[%s5791_s11 + $0x308] sm:$0xff] }
  0xde   : > { %2345 = vmatprep.subr.bf16.mxu1 %v5677_v2  ;;  %v547_v2 = vld [vmem:[%s5791_s11 + $0x208] sm:$0xff]  ;;  %2865 = vperm.xlu0 %5225, %v2735_v18   ;;  %v803_v25 = vunpack.c.l.s8.bf16 %v579_v20 }
  0xdf   : > { %v739_v36 = vunpack.c.l.s8.bf16 %v547_v2  ;;  %v747_v42 = vunpack.c.h.s8.bf16 %v547_v2  ;;  %v580_v2 = vld [vmem:[%s5791_s11 + $0x310] sm:$0xff] }
  0xe0   : > { %2057 = vmatpush2.bf16.msra.mxu0 %v5289_v31  ;;  %v2741_v31 = vld [vmem:[%s5809_s30 + $0x30] sm:$0xff] }
  0xe1   : > { %2346 = vmatpush2.bf16.msra.mxu1 %v5290_v33  ;;  %v804_v33 = vunpack.c.l.s8.bf16 %v580_v2 }
  0xe2   : > { %1545 = vmatmul.mubr.bf16.gmra.mxu0 %v674_v48  ;;  %v755_v48 = vunpack.c.l.s8.bf16 %v555_v44  ;;  %v2745_v44 = vld [vmem:[%s5809_s30 + $0x50] sm:$0xff] }
  0xe3   : > { %1834 = vmatmul.mubr.bf16.gmra.mxu1 %v676_v49  ;;  %1552 = vmatprep.mubr.bf16.mxu0 %v683_v50  ;;  %v757_v49 = vunpack.c.l.s8.bf16 %v557_v45  ;;  %v554_v50 = vld [vmem:[%s5791_s11 + $0x240] sm:$0xff] }
  0xe4   : > { %1841 = vmatprep.mubr.bf16.mxu1 %v685_v51  ;;  %v556_v51 = vld [vmem:[%s5791_s11 + $0x250] sm:$0xff]  ;;  %v754_v52 = vunpack.c.l.s8.bf16 %v554_v50 }
  0xe5   : > { %v756_v53 = vunpack.c.l.s8.bf16 %v556_v51 }
  0xea   : > { %1553 = vmatmul.mubr.bf16.gmra.mxu0 %v682_v56  ;;  %v563_v56 = vld [vmem:[%s5791_s11 + $0x288] sm:$0xff] }
  0xeb   : > { %1842 = vmatmul.mubr.bf16.gmra.mxu1 %v684_v57  ;;  %1560 = vmatprep.mubr.bf16.mxu0 %v691_v58  ;;  %v565_v57 = vld [vmem:[%s5791_s11 + $0x298] sm:$0xff]  ;;  %v762_v58 = vunpack.c.h.s8.bf16 %v554_v50  ;;  %v771_v60 = vunpack.c.l.s8.bf16 %v563_v56  ;;  %v779_v3 = vunpack.c.h.s8.bf16 %v563_v56  ;;  %v812_v50 = vunpack.c.h.s8.bf16 %v580_v2  ;;  %v2747_v56 = vld [vmem:[%s5809_s30 + $0x60] sm:$0xff] }
  0xec   : > { %1849 = vmatprep.mubr.bf16.mxu1 %v693_v59  ;;  %v764_v59 = vunpack.c.h.s8.bf16 %v556_v51  ;;  %v773_v61 = vunpack.c.l.s8.bf16 %v565_v57  ;;  %v781_v4 = vunpack.c.h.s8.bf16 %v565_v57 }
  0xf2   : > { %1561 = vmatmul.mubr.bf16.gmra.mxu0 %v690_v62  ;;  %v562_v62 = vld [vmem:[%s5791_s11 + $0x280] sm:$0xff] }
  0xf3   : > { %1850 = vmatmul.mubr.bf16.gmra.mxu1 %v692_v63  ;;  %1568 = vmatprep.mubr.bf16.mxu0 %v699_v0  ;;  %v564_v63 = vld [vmem:[%s5791_s11 + $0x290] sm:$0xff]  ;;  %v770_v0 = vunpack.c.l.s8.bf16 %v562_v62 }
  0xf4   : > { %1857 = vmatprep.mubr.bf16.mxu1 %v701_v1  ;;  %v772_v1 = vunpack.c.l.s8.bf16 %v564_v63 }
  0xfa   : > { %1569 = vmatmul.mubr.bf16.gmra.mxu0 %v698_v7  ;;  %v778_v7 = vunpack.c.h.s8.bf16 %v562_v62 }
  0xfb   : > { %1858 = vmatmul.mubr.bf16.gmra.mxu1 %v700_v8  ;;  %1576 = vmatprep.mubr.bf16.mxu0 %v707_v9  ;;  %v780_v8 = vunpack.c.h.s8.bf16 %v564_v63  ;;  %v787_v9 = vunpack.c.l.s8.bf16 %v571_v5 }
  0xfc   : > { %1865 = vmatprep.mubr.bf16.mxu1 %v709_v10  ;;  %v789_v10 = vunpack.c.l.s8.bf16 %v573_v6 }
 0x102   : > { %1577 = vmatmul.mubr.bf16.gmra.mxu0 %v706_v13  ;;  %v786_v13 = vunpack.c.l.s8.bf16 %v570_v11 }
 0x103   : > { %1866 = vmatmul.mubr.bf16.gmra.mxu1 %v708_v14  ;;  %1584 = vmatprep.mubr.bf16.mxu0 %v715_v15  ;;  %v788_v14 = vunpack.c.l.s8.bf16 %v572_v12  ;;  %v795_v15 = vunpack.c.h.s8.bf16 %v571_v5 }
 0x104   : > { %1873 = vmatprep.mubr.bf16.mxu1 %v717_v16  ;;  %v2737_v16 = vld [vmem:[%s5809_s30 + $0x10] sm:$0xff] }
 0x105   : > { %2875 = vperm.xlu1 %5226, %v2737_v16  }
 0x109   : > { %2880 = vperm.xlu1 %5226, %v2738_v19  }
 0x10a   : > { %1585 = vmatmul.mubr.bf16.gmra.mxu0 %v714_v21  ;;  %v2736_v21 = vld [vmem:[%s5809_s30 + $0x8] sm:$0xff] }
 0x10b   : > { %1874 = vmatmul.mubr.bf16.gmra.mxu1 %v716_v22  ;;  %1592 = vmatprep.mubr.bf16.mxu0 %v723_v23  ;;  %v581_v22 = vld [vmem:[%s5791_s11 + $0x318] sm:$0xff]  ;;  %v794_v23 = vunpack.c.h.s8.bf16 %v570_v11 }
 0x10c   : > { %1881 = vmatprep.mubr.bf16.mxu1 %v725_v24  ;;  %2870 = vperm.xlu0 %5225, %v2736_v21   ;;  %v796_v24 = vunpack.c.h.s8.bf16 %v572_v12  ;;  %v2753_v21 = vld [vmem:[%s5809_s30 + $0x90] sm:$0xff] }
 0x10d   : > { %2890 = vperm.xlu1 %5226, %v2740_v26  }
 0x112   : > { %1593 = vmatmul.mubr.bf16.gmra.mxu0 %v722_v27  ;;  %v805_v27 = vunpack.c.l.s8.bf16 %v581_v22 }
 0x113   : > { %1882 = vmatmul.mubr.bf16.gmra.mxu1 %v724_v28  ;;  %1600 = vmatprep.mubr.bf16.mxu0 %v731_v29  ;;  %v2739_v28 = vld [vmem:[%s5809_s30 + $0x20] sm:$0xff] }
 0x114   : > { %1889 = vmatprep.mubr.bf16.mxu1 %v733_v30  ;;  %2885 = vperm.xlu0 %5225, %v2739_v28   ;;  %v578_v29 = vld [vmem:[%s5791_s11 + $0x300] sm:$0xff]  ;;  %v2742_v30 = vld [vmem:[%s5809_s30 + $0x38] sm:$0xff] }
 0x115   : > { %2900 = vperm.xlu1 %5226, %v2742_v30   ;;  %v802_v32 = vunpack.c.l.s8.bf16 %v578_v29 }
 0x118   : > { %2895 = vperm.xlu0 %5225, %v2741_v31  }
 0x11a   : > { %1601 = vmatmul.mubr.bf16.gmra.mxu0 %v730_v34  ;;  %v811_v34 = vunpack.c.h.s8.bf16 %v579_v20  ;;  %v595_v20 = vld [vmem:[%s5791_s11 + $0x388] sm:$0xff] }
 0x11b   : > { %1890 = vmatmul.mubr.bf16.gmra.mxu1 %v732_v35  ;;  %1608 = vmatprep.mubr.bf16.mxu0 %v739_v36  ;;  %v2744_v35 = vld [vmem:[%s5809_s30 + $0x48] sm:$0xff]  ;;  %v813_v36 = vunpack.c.h.s8.bf16 %v581_v22  ;;  %v835_v28 = vunpack.c.l.s8.bf16 %v595_v20 }
 0x11c   : > { %1897 = vmatprep.mubr.bf16.mxu1 %v741_v37  ;;  %2910 = vperm.xlu1 %5226, %v2744_v35   ;;  %v2743_v37 = vld [vmem:[%s5809_s30 + $0x40] sm:$0xff] }
 0x11d   : > { %2905 = vperm.xlu0 %5225, %v2743_v37   ;;  %v2758_v37 = vld [vmem:[%s5809_s30 + $0xb8] sm:$0xff] }
 0x121   : > { %2915 = vperm.xlu0 %5225, %v2745_v44  }
 0x122   : > { %1609 = vmatmul.mubr.bf16.gmra.mxu0 %v738_v40  ;;  %v2746_v40 = vld [vmem:[%s5809_s30 + $0x58] sm:$0xff] }
 0x123   : > { %1898 = vmatmul.mubr.bf16.gmra.mxu1 %v740_v41  ;;  %1616 = vmatprep.mubr.bf16.mxu0 %v747_v42 }
 0x124   : > { %1905 = vmatprep.mubr.bf16.mxu1 %v749_v43  ;;  %v587_v43 = vld [vmem:[%s5791_s11 + $0x348] sm:$0xff]  ;;  %2920 = vperm.xlu1 %5226, %v2746_v40   ;;  %v596_v40 = vld [vmem:[%s5791_s11 + $0x390] sm:$0xff] }
 0x125   : > { %v819_v51 = vunpack.c.l.s8.bf16 %v587_v43  ;;  %2925 = vperm.xlu0 %5225, %v2747_v56  }
 0x12a   : > { %1617 = vmatmul.mubr.bf16.gmra.mxu0 %v746_v46  ;;  %v589_v46 = vld [vmem:[%s5791_s11 + $0x358] sm:$0xff] }
 0x12b   : > { %1906 = vmatmul.mubr.bf16.gmra.mxu1 %v748_v47  ;;  %1624 = vmatprep.mubr.bf16.mxu0 %v755_v48  ;;  %v810_v48 = vunpack.c.h.s8.bf16 %v578_v29  ;;  %v829_v12 = vunpack.c.h.s8.bf16 %v589_v46  ;;  %v2756_v29 = vld [vmem:[%s5809_s30 + $0xa8] sm:$0xff] }
 0x12c   : > { %1913 = vmatprep.mubr.bf16.mxu1 %v757_v49 }
 0x132   : > { %1625 = vmatmul.mubr.bf16.gmra.mxu0 %v754_v52  ;;  %v2748_v52 = vld [vmem:[%s5809_s30 + $0x68] sm:$0xff] }
 0x133   : > { %1914 = vmatmul.mubr.bf16.gmra.mxu1 %v756_v53  ;;  %1632 = vmatprep.mubr.bf16.mxu0 %v763_v54 }
 0x134   : > { %1921 = vmatprep.mubr.bf16.mxu1 %v765_v55  ;;  %v821_v55 = vunpack.c.l.s8.bf16 %v589_v46  ;;  %2930 = vperm.xlu1 %5226, %v2748_v52  }
 0x13a   : > { %1633 = vmatmul.mubr.bf16.gmra.mxu0 %v762_v58 }
 0x13b   : > { %1922 = vmatmul.mubr.bf16.gmra.mxu1 %v764_v59  ;;  %1640 = vmatprep.mubr.bf16.mxu0 %v771_v60  ;;  %v586_v60 = vld [vmem:[%s5791_s11 + $0x340] sm:$0xff] }
 0x13c   : > { %1929 = vmatprep.mubr.bf16.mxu1 %v773_v61  ;;  %v2750_v61 = vld [vmem:[%s5809_s30 + $0x78] sm:$0xff]  ;;  %v818_v5 = vunpack.c.l.s8.bf16 %v586_v60 }
 0x13d   : > { %2940 = vperm.xlu1 %5226, %v2750_v61   ;;  %v603_v61 = vld [vmem:[%s5791_s11 + $0x3c8] sm:$0xff] }
 0x142   : > { %1641 = vmatmul.mubr.bf16.gmra.mxu0 %v770_v0  ;;  %v588_v0 = vld [vmem:[%s5791_s11 + $0x350] sm:$0xff] }
 0x143   : > { %1930 = vmatmul.mubr.bf16.gmra.mxu1 %v772_v1  ;;  %1648 = vmatprep.mubr.bf16.mxu0 %v779_v3  ;;  %v2749_v1 = vld [vmem:[%s5809_s30 + $0x70] sm:$0xff] }
 0x144   : > { %1937 = vmatprep.mubr.bf16.mxu1 %v781_v4  ;;  %2935 = vperm.xlu0 %5225, %v2749_v1   ;;  %v605_v1 = vld [vmem:[%s5791_s11 + $0x3d8] sm:$0xff] }
 0x14a   : > { %1649 = vmatmul.mubr.bf16.gmra.mxu0 %v778_v7  ;;  %v820_v7 = vunpack.c.l.s8.bf16 %v588_v0 }
 0x14b   : > { %1938 = vmatmul.mubr.bf16.gmra.mxu1 %v780_v8  ;;  %1656 = vmatprep.mubr.bf16.mxu0 %v787_v9  ;;  %v827_v8 = vunpack.c.h.s8.bf16 %v587_v43  ;;  %v2752_v9 = vld [vmem:[%s5809_s30 + $0x88] sm:$0xff] }
 0x14c   : > { %1945 = vmatprep.mubr.bf16.mxu1 %v789_v10  ;;  %2950 = vperm.xlu1 %5226, %v2752_v9  }
 0x152   : > { %1657 = vmatmul.mubr.bf16.gmra.mxu0 %v786_v13  ;;  %v2751_v13 = vld [vmem:[%s5809_s30 + $0x80] sm:$0xff] }
 0x153   : > { %1946 = vmatmul.mubr.bf16.gmra.mxu1 %v788_v14  ;;  %1664 = vmatprep.mubr.bf16.mxu0 %v795_v15 }
 0x154   : > { %1953 = vmatprep.mubr.bf16.mxu1 %v797_v17  ;;  %2945 = vperm.xlu0 %5225, %v2751_v13   ;;  %v2754_v17 = vld [vmem:[%s5809_s30 + $0x98] sm:$0xff]  ;;  %v2763_v13 = vld [vmem:[%s5809_s30 + $0xe0] sm:$0xff] }
 0x155   : > { %2960 = vperm.xlu1 %5226, %v2754_v17   ;;  %v602_v17 = vld [vmem:[%s5791_s11 + $0x3c0] sm:$0xff] }
 0x158   : > { %2955 = vperm.xlu0 %5225, %v2753_v21  }
 0x159   : > { %2970 = vperm.xlu1 %5226, %v2756_v29   ;;  %v859_v29 = vunpack.c.h.s8.bf16 %v603_v61 }
 0x15a   : > { %1665 = vmatmul.mubr.bf16.gmra.mxu0 %v794_v23  ;;  %v597_v23 = vld [vmem:[%s5791_s11 + $0x398] sm:$0xff] }
 0x15b   : > { %1954 = vmatmul.mubr.bf16.gmra.mxu1 %v796_v24  ;;  %1672 = vmatprep.mubr.bf16.mxu0 %v803_v25  ;;  %v826_v25 = vunpack.c.h.s8.bf16 %v586_v60  ;;  %v837_v31 = vunpack.c.l.s8.bf16 %v597_v23  ;;  %v845_v52 = vunpack.c.h.s8.bf16 %v597_v23  ;;  %v2765_v23 = vld [vmem:[%s5809_s30 + $0xf0] sm:$0xff] }
 0x15c   : > { %1961 = vmatprep.mubr.bf16.mxu1 %v805_v27  ;;  %v828_v27 = vunpack.c.h.s8.bf16 %v588_v0 }
 0x15d   : > { %2980 = vperm.xlu1 %5226, %v2758_v37  }
 0x162   : > { %v1482_v38 = vpop.f32.mrf.mxu0  ;;  %1673 = vmatmul.mubr.bf16.gmra.mxu0 %v802_v32  ;;  %v2755_v32 = vld [vmem:[%s5809_s30 + $0xa0] sm:$0xff] }
 0x163   : > { %v1771_v39 = vpop.f32.mrf.mxu1  ;;  %1962 = vmatmul.mubr.bf16.gmra.mxu1 %v804_v33  ;;  %1680 = vmatprep.mubr.bf16.mxu0 %v811_v34 }
 0x164   : > { %v6209_v41 = vadd.f32 %v1771_v39, %v1482_v38  ;;  %v1484_v42 = vpop.f32.mrf.mxu0  ;;  %1969 = vmatprep.mubr.bf16.mxu1 %v813_v36  ;;  %2965 = vperm.xlu0 %5225, %v2755_v32   ;;  %v594_v36 = vld [vmem:[%s5791_s11 + $0x380] sm:$0xff] }
 0x165   : > { %v1773_v45 = vpop.f32.mrf.mxu1  ;;  %v2757_v42 = vld [vmem:[%s5809_s30 + $0xb0] sm:$0xff] }
 0x166   : > { %v1485_v47 = vpop.f32.mrf.mxu0  ;;  %v834_v45 = vunpack.c.l.s8.bf16 %v594_v36 }
 0x167   : > { %v1774_v49 = vpop.f32.mrf.mxu1 }
 0x168   : > { %v6215_v53 = vadd.f32 %v1774_v49, %v1485_v47  ;;  %v1487_v54 = vpop.f32.mrf.mxu0  ;;  %2975 = vperm.xlu0 %5225, %v2757_v42   ;;  %v836_v47 = vunpack.c.l.s8.bf16 %v596_v40  ;;  %v2760_v49 = vld [vmem:[%s5809_s30 + $0xc8] sm:$0xff] }
 0x169   : > { %v1776_v57 = vpop.f32.mrf.mxu1  ;;  %2990 = vperm.xlu1 %5226, %v2760_v49   ;;  %v2759_v54 = vld [vmem:[%s5809_s30 + $0xc0] sm:$0xff] }
 0x16a   : > { %v1490_v58 = vpop.f32.mrf.mxu0  ;;  %1681 = vmatmul.mubr.bf16.gmra.mxu0 %v810_v48  ;;  %v843_v48 = vunpack.c.h.s8.bf16 %v595_v20 }
 0x16b   : > { %v1779_v59 = vpop.f32.mrf.mxu1  ;;  %1970 = vmatmul.mubr.bf16.gmra.mxu1 %v812_v50  ;;  %1688 = vmatprep.mubr.bf16.mxu0 %v819_v51 }
 0x16c   : > { %v6220_v62 = vadd.f32 %v1779_v59, %v1490_v58  ;;  %v1492_v63 = vpop.f32.mrf.mxu0  ;;  %1977 = vmatprep.mubr.bf16.mxu1 %v821_v55  ;;  %2985 = vperm.xlu0 %5225, %v2759_v54   ;;  %v2762_v58 = vld [vmem:[%s5809_s30 + $0xd8] sm:$0xff]  ;;  %v2772_v54 = vld [vmem:[%s5809_s30 + $0x128] sm:$0xff] }
 0x16d   : > { %v1781_v3 = vpop.f32.mrf.mxu1  ;;  %3000 = vperm.xlu1 %5226, %v2762_v58   ;;  %v2761_v63 = vld [vmem:[%s5809_s30 + $0xd0] sm:$0xff]  ;;  %v2771_v58 = vld [vmem:[%s5809_s30 + $0x120] sm:$0xff] }
 0x16e   : > { %v1493_v4 = vpop.f32.mrf.mxu0 }
 0x16f   : > { %v1782_v6 = vpop.f32.mrf.mxu1 }
 0x170   : > { %v6225_v10 = vadd.f32 %v1782_v6, %v1493_v4  ;;  %v1495_v11 = vpop.f32.mrf.mxu0  ;;  %2995 = vperm.xlu0 %5225, %v2761_v63   ;;  %v842_v4 = vunpack.c.h.s8.bf16 %v594_v36  ;;  %v844_v6 = vunpack.c.h.s8.bf16 %v596_v40 }
 0x171   : > { %v1784_v14 = vpop.f32.mrf.mxu1 }
 0x172   : > { %v1498_v15 = vpop.f32.mrf.mxu0  ;;  %1689 = vmatmul.mubr.bf16.gmra.mxu0 %v818_v5 }
 0x173   : > { %v1787_v16 = vpop.f32.mrf.mxu1  ;;  %1978 = vmatmul.mubr.bf16.gmra.mxu1 %v820_v7  ;;  %1696 = vmatprep.mubr.bf16.mxu0 %v827_v8  ;;  %v851_v7 = vunpack.c.l.s8.bf16 %v603_v61  ;;  %v2764_v8 = vld [vmem:[%s5809_s30 + $0xe8] sm:$0xff] }
 0x174   : > { %v6229_v18 = vadd.f32 %v1787_v16, %v1498_v15  ;;  %v1500_v19 = vpop.f32.mrf.mxu0  ;;  %1985 = vmatprep.mubr.bf16.mxu1 %v829_v12  ;;  %v853_v12 = vunpack.c.l.s8.bf16 %v605_v1  ;;  %3010 = vperm.xlu1 %5226, %v2764_v8  }
 0x175   : > { %v1789_v22 = vpop.f32.mrf.mxu1  ;;  %3005 = vperm.xlu0 %5225, %v2763_v13   ;;  %v2766_v19 = vld [vmem:[%s5809_s30 + $0xf8] sm:$0xff] }
 0x176   : > { %v1501_v24 = vpop.f32.mrf.mxu0  ;;  %v604_v22 = vld [vmem:[%s5791_s11 + $0x3d0] sm:$0xff] }
 0x177   : > { %v1790_v26 = vpop.f32.mrf.mxu1 }
 0x178   : > { %v6235_v30 = vadd.f32 %v1790_v26, %v1501_v24  ;;  %v1503_v2 = vpop.f32.mrf.mxu0  ;;  %3020 = vperm.xlu1 %5226, %v2766_v19   ;;  %v850_v26 = vunpack.c.l.s8.bf16 %v602_v17 }
 0x179   : > { %v1792_v33 = vpop.f32.mrf.mxu1  ;;  %3015 = vperm.xlu0 %5225, %v2765_v23   ;;  %v2768_v2 = vld [vmem:[%s5809_s30 + $0x108] sm:$0xff] }
 0x17a   : > { %v1506_v34 = vpop.f32.mrf.mxu0  ;;  %1697 = vmatmul.mubr.bf16.gmra.mxu0 %v826_v25  ;;  %v861_v33 = vunpack.c.h.s8.bf16 %v605_v1  ;;  %v2774_v1 = vld [vmem:[%s5809_s30 + $0x138] sm:$0xff] }
 0x17b   : > { %v1795_v35 = vpop.f32.mrf.mxu1  ;;  %1986 = vmatmul.mubr.bf16.gmra.mxu1 %v828_v27  ;;  %1704 = vmatprep.mubr.bf16.mxu0 %v835_v28  ;;  %v852_v28 = vunpack.c.l.s8.bf16 %v604_v22 }
 0x17c   : > { %v6240_v38 = vadd.f32 %v1795_v35, %v1506_v34  ;;  %v1508_v39 = vpop.f32.mrf.mxu0  ;;  %1993 = vmatprep.mubr.bf16.mxu1 %v837_v31  ;;  %3030 = vperm.xlu1 %5226, %v2768_v2   ;;  %v2767_v34 = vld [vmem:[%s5809_s30 + $0x100] sm:$0xff] }
 0x17d   : > { %v1797_v43 = vpop.f32.mrf.mxu1  ;;  %3025 = vperm.xlu0 %5225, %v2767_v34   ;;  %v2770_v39 = vld [vmem:[%s5809_s30 + $0x118] sm:$0xff] }
 0x17e   : > { %v1509_v44 = vpop.f32.mrf.mxu0  ;;  %v487_v43 = vld [vmem:[%s5791_s11 + $0x28] sm:$0xff] }
 0x17f   : > { %v1798_v46 = vpop.f32.mrf.mxu1 }
 0x180   : > { %v6245_v50 = vadd.f32 %v1798_v46, %v1509_v44  ;;  %v1511_v51 = vpop.f32.mrf.mxu0  ;;  %3040 = vperm.xlu1 %5226, %v2770_v39   ;;  %v2769_v44 = vld [vmem:[%s5809_s30 + $0x110] sm:$0xff]  ;;  %v489_v46 = vld [vmem:[%s5791_s11 + $0x38] sm:$0xff]  ;;  %v2780_v39 = vld [vmem:[%s5809_s30 + $0x168] sm:$0xff] }
 0x181   : > { %v1800_v55 = vpop.f32.mrf.mxu1  ;;  %3035 = vperm.xlu0 %5225, %v2769_v44   ;;  %v860_v51 = vunpack.c.h.s8.bf16 %v604_v22  ;;  %v625_v19 = vunpack.c.h.s8.bf16 %v489_v46 }
 0x182   : > { %v1514_v56 = vpop.f32.mrf.mxu0  ;;  %1705 = vmatmul.mubr.bf16.gmra.mxu0 %v834_v45 }
 0x183   : > { %v1803_v57 = vpop.f32.mrf.mxu1  ;;  %1994 = vmatmul.mubr.bf16.gmra.mxu1 %v836_v47  ;;  %1712 = vmatprep.mubr.bf16.mxu0 %v843_v48  ;;  %v858_v48 = vunpack.c.h.s8.bf16 %v602_v17 }
 0x184   : > { %v6249_v59 = vadd.f32 %v1803_v57, %v1514_v56  ;;  %v1516_v60 = vpop.f32.mrf.mxu0  ;;  %2001 = vmatprep.mubr.bf16.mxu1 %v845_v52  ;;  %v615_v52 = vunpack.c.l.s8.bf16 %v487_v43  ;;  %v617_v57 = vunpack.c.l.s8.bf16 %v489_v46  ;;  %3050 = vperm.xlu1 %5226, %v2772_v54  }
 0x185   : > { %v1805_v0 = vpop.f32.mrf.mxu1  ;;  %3045 = vperm.xlu0 %5225, %v2771_v58  }
 0x186   : > { %v1517_v3 = vpop.f32.mrf.mxu0  ;;  %v486_v0 = vld [vmem:[%s5791_s11 + $0x20] sm:$0xff] }
 0x187   : > { %v1806_v5 = vpop.f32.mrf.mxu1  ;;  %v622_v34 = vunpack.c.h.s8.bf16 %v486_v0 }
 0x188   : > { %v6255_v9 = vadd.f32 %v1806_v5, %v1517_v3  ;;  %v1519_v11 = vpop.f32.mrf.mxu0  ;;  %v488_v5 = vld [vmem:[%s5791_s11 + $0x30] sm:$0xff]  ;;  %3060 = vperm.xlu1 %5226, %v2774_v1  }
 0x189   : > { %v1808_v14 = vpop.f32.mrf.mxu1  ;;  %v614_v11 = vunpack.c.l.s8.bf16 %v486_v0  ;;  %v616_v13 = vunpack.c.l.s8.bf16 %v488_v5 }
 0x18a   : > { %v1522_v15 = vpop.f32.mrf.mxu0  ;;  %1713 = vmatmul.mubr.bf16.gmra.mxu0 %v842_v4  ;;  %v623_v14 = vunpack.c.h.s8.bf16 %v487_v43 }
 0x18b   : > { %v1811_v16 = vpop.f32.mrf.mxu1  ;;  %2002 = vmatmul.mubr.bf16.gmra.mxu1 %v844_v6  ;;  %1720 = vmatprep.mubr.bf16.mxu0 %v851_v7  ;;  %v2773_v6 = vld [vmem:[%s5809_s30 + $0x130] sm:$0xff] }
 0x18c   : > { %v6260_v20 = vadd.f32 %v1811_v16, %v1522_v15  ;;  %v1524_v21 = vpop.f32.mrf.mxu0  ;;  %2009 = vmatprep.mubr.bf16.mxu1 %v853_v12  ;;  %3055 = vperm.xlu0 %5225, %v2773_v6   ;;  %v2776_v15 = vld [vmem:[%s5809_s30 + $0x148] sm:$0xff] }
 0x18d   : > { %v1813_v24 = vpop.f32.mrf.mxu1  ;;  %3070 = vperm.xlu1 %5226, %v2776_v15   ;;  %v2775_v21 = vld [vmem:[%s5809_s30 + $0x140] sm:$0xff] }
 0x18e   : > { %v1525_v25 = vpop.f32.mrf.mxu0 }
 0x18f   : > { %v1814_v27 = vpop.f32.mrf.mxu1 }
 0x190   : > { %v6265_v31 = vadd.f32 %v1814_v27, %v1525_v25  ;;  %v1527_v32 = vpop.f32.mrf.mxu0  ;;  %3065 = vperm.xlu0 %5225, %v2775_v21   ;;  %v2778_v25 = vld [vmem:[%s5809_s30 + $0x158] sm:$0xff]  ;;  %v2785_v21 = vld [vmem:[%s5809_s30 + $0x190] sm:$0xff] }
 0x191   : > { %v1816_v35 = vpop.f32.mrf.mxu1  ;;  %3080 = vperm.xlu1 %5226, %v2778_v25   ;;  %v497_v32 = vld [vmem:[%s5791_s11 + $0x78] sm:$0xff] }
 0x192   : > { %v1530_v36 = vpop.f32.mrf.mxu0  ;;  %1721 = vmatmul.mubr.bf16.gmra.mxu0 %v850_v26  ;;  %v633_v44 = vunpack.c.l.s8.bf16 %v497_v32 }
 0x193   : > { %v1819_v37 = vpop.f32.mrf.mxu1  ;;  %2010 = vmatmul.mubr.bf16.gmra.mxu1 %v852_v28  ;;  %1728 = vmatprep.mubr.bf16.mxu0 %v859_v29  ;;  %v495_v28 = vld [vmem:[%s5791_s11 + $0x68] sm:$0xff]  ;;  %v2777_v29 = vld [vmem:[%s5809_s30 + $0x150] sm:$0xff] }
 0x194   : > { %v6269_v40 = vadd.f32 %v1819_v37, %v1530_v36  ;;  %v1532_v42 = vpop.f32.mrf.mxu0  ;;  %2017 = vmatprep.mubr.bf16.mxu1 %v861_v33  ;;  %3075 = vperm.xlu0 %5225, %v2777_v29   ;;  %v624_v36 = vunpack.c.h.s8.bf16 %v488_v5  ;;  %v631_v37 = vunpack.c.l.s8.bf16 %v495_v28  ;;  %v639_v1 = vunpack.c.h.s8.bf16 %v495_v28 }
 0x195   : > { %v1821_v45 = vpop.f32.mrf.mxu1  ;;  %3090 = vperm.xlu1 %5226, %v2780_v39  }
 0x196   : > { %v1533_v47 = vpop.f32.mrf.mxu0  ;;  %v2779_v45 = vld [vmem:[%s5809_s30 + $0x160] sm:$0xff] }
 0x197   : > { %v1822_v49 = vpop.f32.mrf.mxu1 }
 0x198   : > { %v6275_v55 = vadd.f32 %v1822_v49, %v1533_v47  ;;  %v1535_v56 = vpop.f32.mrf.mxu0  ;;  %3085 = vperm.xlu0 %5225, %v2779_v45   ;;  %v494_v49 = vld [vmem:[%s5791_s11 + $0x60] sm:$0xff] }
 0x199   : > { %v1824_v60 = vpop.f32.mrf.mxu1  ;;  %v496_v56 = vld [vmem:[%s5791_s11 + $0x70] sm:$0xff]  ;;  %v638_v25 = vunpack.c.h.s8.bf16 %v494_v49 }
 0x19a   : > { %v1538_v61 = vpop.f32.mrf.mxu0  ;;  %1729 = vmatmul.mubr.bf16.gmra.mxu0 %v858_v48  ;;  %v632_v0 = vunpack.c.l.s8.bf16 %v496_v56  ;;  %v640_v28 = vunpack.c.h.s8.bf16 %v496_v56 }
 0x19b   : > { %v1827_v63 = vpop.f32.mrf.mxu1  ;;  %2018 = vmatmul.mubr.bf16.gmra.mxu1 %v860_v51  ;;  %2058 = vmatprep.mubr.bf16.mxu0 %v615_v52  ;;  %v2782_v51 = vld [vmem:[%s5809_s30 + $0x178] sm:$0xff] }
 0x19c   : > { %v6280_v3 = vadd.f32 %v1827_v63, %v1538_v61  ;;  %v1540_v4 = vpop.f32.mrf.mxu0  ;;  %2347 = vmatprep.mubr.bf16.mxu1 %v617_v57  ;;  %3100 = vperm.xlu1 %5226, %v2782_v51   ;;  %v2781_v57 = vld [vmem:[%s5809_s30 + $0x170] sm:$0xff]  ;;  %v630_v61 = vunpack.c.l.s8.bf16 %v494_v49 }
 0x19d   : > { %v1829_v7 = vpop.f32.mrf.mxu1  ;;  %3095 = vperm.xlu0 %5225, %v2781_v57   ;;  %v2784_v4 = vld [vmem:[%s5809_s30 + $0x188] sm:$0xff] }
 0x19e   : > { %v1541_v8 = vpop.f32.mrf.mxu0  ;;  %v641_v7 = vunpack.c.h.s8.bf16 %v497_v32 }
 0x19f   : > { %v1830_v12 = vpop.f32.mrf.mxu1 }
 0x1a0   : > { %v6285_v16 = vadd.f32 %v1830_v12, %v1541_v8  ;;  %v1543_v17 = vpop.f32.mrf.mxu0  ;;  %3110 = vperm.xlu1 %5226, %v2784_v4   ;;  %v2783_v8 = vld [vmem:[%s5809_s30 + $0x180] sm:$0xff] }
 0x1a1   : > { %v1832_v22 = vpop.f32.mrf.mxu1  ;;  %3105 = vperm.xlu0 %5225, %v2783_v8   ;;  %v2794_v8 = vld [vmem:[%s5809_s30 + $0x1d8] sm:$0xff] }
 0x1a2   : > { %v1546_v23 = vpop.f32.mrf.mxu0  ;;  %2059 = vmatmul.mubr.bf16.vlgmr.msra.gmra.mxu0 %v614_v11 }
 0x1a3   : > { %v1835_v24 = vpop.f32.mrf.mxu1  ;;  %2348 = vmatmul.mubr.bf16.vlgmr.msra.gmra.mxu1 %v616_v13  ;;  %2066 = vmatprep.mubr.bf16.mxu0 %v623_v14  ;;  %v2786_v14 = vld [vmem:[%s5809_s30 + $0x198] sm:$0xff] }
 0x1a4   : > { %v6289_v26 = vadd.f32 %v1835_v24, %v1546_v23  ;;  %v1548_v27 = vpop.f32.mrf.mxu0  ;;  %2355 = vmatprep.mubr.bf16.mxu1 %v625_v19  ;;  %v503_v19 = vld [vmem:[%s5791_s11 + $0xa8] sm:$0xff]  ;;  %3120 = vperm.xlu1 %5226, %v2786_v14   ;;  %v505_v23 = vld [vmem:[%s5791_s11 + $0xb8] sm:$0xff]  ;;  %v2793_v14 = vld [vmem:[%s5809_s30 + $0x1d0] sm:$0xff] }
 0x1a5   : > { %v1837_v2 = vpop.f32.mrf.mxu1  ;;  %3115 = vperm.xlu0 %5225, %v2785_v21   ;;  %v647_v29 = vunpack.c.l.s8.bf16 %v503_v19 }
 0x1a6   : > { %v1549_v33 = vpop.f32.mrf.mxu0  ;;  %v2788_v2 = vld [vmem:[%s5809_s30 + $0x1a8] sm:$0xff] }
 0x1a7   : > { %v1838_v35 = vpop.f32.mrf.mxu1 }
 0x1a8   : > { %v6295_v42 = vadd.f32 %v1838_v35, %v1549_v33  ;;  %v1551_v43 = vpop.f32.mrf.mxu0  ;;  %3130 = vperm.xlu1 %5226, %v2788_v2   ;;  %v2787_v35 = vld [vmem:[%s5809_s30 + $0x1a0] sm:$0xff] }
 0x1a9   : > { %v1840_v46 = vpop.f32.mrf.mxu1  ;;  %3125 = vperm.xlu0 %5225, %v2787_v35   ;;  %v502_v43 = vld [vmem:[%s5791_s11 + $0xa0] sm:$0xff] }
 0x1aa   : > { %v1554_v47 = vpop.f32.mrf.mxu0  ;;  %2067 = vmatmul.mubr.bf16.gmra.mxu0 %v622_v34  ;;  %v649_v34 = vunpack.c.l.s8.bf16 %v505_v23 }
 0x1ab   : > { %v1843_v48 = vpop.f32.mrf.mxu1  ;;  %2356 = vmatmul.mubr.bf16.gmra.mxu1 %v624_v36  ;;  %2074 = vmatprep.mubr.bf16.mxu0 %v631_v37 }
 0x1ac   : > { %v6300_v52 = vadd.f32 %v1843_v48, %v1554_v47  ;;  %v1556_v54 = vpop.f32.mrf.mxu0  ;;  %2363 = vmatprep.mubr.bf16.mxu1 %v633_v44  ;;  %v2790_v44 = vld [vmem:[%s5809_s30 + $0x1b8] sm:$0xff]  ;;  %v504_v47 = vld [vmem:[%s5791_s11 + $0xb0] sm:$0xff] }
 0x1ad   : > { %v1845_v58 = vpop.f32.mrf.mxu1  ;;  %3140 = vperm.xlu1 %5226, %v2790_v44   ;;  %v2789_v48 = vld [vmem:[%s5809_s30 + $0x1b0] sm:$0xff]  ;;  %v646_v54 = vunpack.c.l.s8.bf16 %v502_v43  ;;  %v648_v57 = vunpack.c.l.s8.bf16 %v504_v47 }
 0x1ae   : > { %v1557_v60 = vpop.f32.mrf.mxu0  ;;  %3135 = vperm.xlu0 %5225, %v2789_v48   ;;  %v655_v58 = vunpack.c.h.s8.bf16 %v503_v19  ;;  %v513_v19 = vld [vmem:[%s5791_s11 + $0xf8] sm:$0xff] }
 0x1af   : > { %v1846_v63 = vpop.f32.mrf.mxu1  ;;  %v665_v2 = vunpack.c.l.s8.bf16 %v513_v19 }
 0x1b0   : > { %v6305_v5 = vadd.f32 %v1846_v63, %v1557_v60  ;;  %v1559_v6 = vpop.f32.mrf.mxu0  ;;  %v2792_v60 = vld [vmem:[%s5809_s30 + $0x1c8] sm:$0xff] }
 0x1b1   : > { %v1848_v11 = vpop.f32.mrf.mxu1  ;;  %3150 = vperm.xlu1 %5226, %v2792_v60  }
 0x1b2   : > { %v1562_v12 = vpop.f32.mrf.mxu0  ;;  %2075 = vmatmul.mubr.bf16.gmra.mxu0 %v630_v61 }
 0x1b3   : > { %v1851_v13 = vpop.f32.mrf.mxu1  ;;  %2364 = vmatmul.mubr.bf16.gmra.mxu1 %v632_v0  ;;  %2082 = vmatprep.mubr.bf16.mxu0 %v639_v1  ;;  %v657_v0 = vunpack.c.h.s8.bf16 %v505_v23  ;;  %v2791_v1 = vld [vmem:[%s5809_s30 + $0x1c0] sm:$0xff] }
 0x1b4   : > { %v6309_v15 = vadd.f32 %v1851_v13, %v1562_v12  ;;  %v1564_v17 = vpop.f32.mrf.mxu0  ;;  %2371 = vmatprep.mubr.bf16.mxu1 %v641_v7  ;;  %3145 = vperm.xlu0 %5225, %v2791_v1   ;;  %v511_v13 = vld [vmem:[%s5791_s11 + $0xe8] sm:$0xff] }
 0x1b5   : > { %v1853_v22 = vpop.f32.mrf.mxu1  ;;  %3160 = vperm.xlu1 %5226, %v2794_v8   ;;  %v519_v8 = vld [vmem:[%s5791_s11 + $0x128] sm:$0xff] }
 0x1b6   : > { %v1565_v24 = vpop.f32.mrf.mxu0  ;;  %v654_v22 = vunpack.c.h.s8.bf16 %v502_v43 }
 0x1b7   : > { %v1854_v27 = vpop.f32.mrf.mxu1 }
 0x1b8   : > { %v6315_v32 = vadd.f32 %v1854_v27, %v1565_v24  ;;  %v1567_v33 = vpop.f32.mrf.mxu0  ;;  %3155 = vperm.xlu0 %5225, %v2793_v14   ;;  %v656_v24 = vunpack.c.h.s8.bf16 %v504_v47  ;;  %v2796_v27 = vld [vmem:[%s5809_s30 + $0x1e8] sm:$0xff]  ;;  %v2797_v47 = vld [vmem:[%s5809_s30 + $0x1f0] sm:$0xff]  ;;  %v521_v14 = vld [vmem:[%s5791_s11 + $0x138] sm:$0xff] }
 0x1b9   : > { %v1856_v36 = vpop.f32.mrf.mxu1  ;;  %3170 = vperm.xlu1 %5226, %v2796_v27   ;;  %v2795_v33 = vld [vmem:[%s5809_s30 + $0x1e0] sm:$0xff] }
 0x1ba   : > { %v1570_v37 = vpop.f32.mrf.mxu0  ;;  %2083 = vmatmul.mubr.bf16.gmra.mxu0 %v638_v25  ;;  %v663_v25 = vunpack.c.l.s8.bf16 %v511_v13 }
 0x1bb   : > { %v1859_v39 = vpop.f32.mrf.mxu1  ;;  %2372 = vmatmul.mubr.bf16.gmra.mxu1 %v640_v28  ;;  %2090 = vmatprep.mubr.bf16.mxu0 %v647_v29 }
 0x1bc   : > { %v6320_v45 = vadd.f32 %v1859_v39, %v1570_v37  ;;  %v1572_v46 = vpop.f32.mrf.mxu0  ;;  %2379 = vmatprep.mubr.bf16.mxu1 %v649_v34  ;;  %3165 = vperm.xlu0 %5225, %v2795_v33   ;;  %v510_v37 = vld [vmem:[%s5791_s11 + $0xe0] sm:$0xff]  ;;  %v2798_v39 = vld [vmem:[%s5809_s30 + $0x1f8] sm:$0xff] }
 0x1bd   : > { %v1861_v49 = vpop.f32.mrf.mxu1  ;;  %v512_v46 = vld [vmem:[%s5791_s11 + $0xf0] sm:$0xff]  ;;  %3180 = vperm.xlu1 %5226, %v2798_v39   ;;  %v518_v33 = vld [vmem:[%s5791_s11 + $0x120] sm:$0xff] }
 0x1be   : > { %v1573_v51 = vpop.f32.mrf.mxu0 }
 0x1bf   : > { %v1862_v56 = vpop.f32.mrf.mxu1 }
 0x1c0   : > { %v6325_v61 = vadd.f32 %v1862_v56, %v1573_v51  ;;  %v1575_v63 = vpop.f32.mrf.mxu0  ;;  %3175 = vperm.xlu0 %5225, %v2797_v47   ;;  %v662_v51 = vunpack.c.l.s8.bf16 %v510_v37  ;;  %v664_v56 = vunpack.c.l.s8.bf16 %v512_v46 }
 0x1c1   : > { %v1864_v4 = vpop.f32.mrf.mxu1  ;;  %v673_v63 = vunpack.c.h.s8.bf16 %v513_v19  ;;  %v679_v19 = vunpack.c.l.s8.bf16 %v519_v8 }
 0x1c2   : > { %v1578_v6 = vpop.f32.mrf.mxu0  ;;  %2091 = vmatmul.mubr.bf16.gmra.mxu0 %v646_v54 }
 0x1c3   : > { %v1867_v7 = vpop.f32.mrf.mxu1  ;;  %2380 = vmatmul.mubr.bf16.gmra.mxu1 %v648_v57  ;;  %2098 = vmatprep.mubr.bf16.mxu0 %v655_v58  ;;  %v671_v57 = vunpack.c.h.s8.bf16 %v511_v13  ;;  %v670_v13 = vunpack.c.h.s8.bf16 %v510_v37 }
 0x1c4   : > { %v6329_v11 = vadd.f32 %v1867_v7, %v1578_v6  ;;  %v1580_v12 = vpop.f32.mrf.mxu0  ;;  %2387 = vmatprep.mubr.bf16.mxu1 %v657_v0 }
 0x1c5   : > { %v1869_v17 = vpop.f32.mrf.mxu1 }
 0x1c6   : > { %v1581_v21 = vpop.f32.mrf.mxu0 }
 0x1c7   : > { %v1870_v23 = vpop.f32.mrf.mxu1 }
 0x1c8   : > { %v6335_v28 = vadd.f32 %v1870_v23, %v1581_v21  ;;  %v1583_v29 = vpop.f32.mrf.mxu0 }
 0x1c9   : > { %v1872_v34 = vpop.f32.mrf.mxu1 }
 0x1ca   : > { %v1586_v35 = vpop.f32.mrf.mxu0  ;;  %2099 = vmatmul.mubr.bf16.gmra.mxu0 %v654_v22  ;;  %v672_v22 = vunpack.c.h.s8.bf16 %v512_v46 }
 0x1cb   : > { %v1875_v36 = vpop.f32.mrf.mxu1  ;;  %2388 = vmatmul.mubr.bf16.gmra.mxu1 %v656_v24  ;;  %2106 = vmatprep.mubr.bf16.mxu0 %v663_v25  ;;  %v681_v25 = vunpack.c.l.s8.bf16 %v521_v14 }
 0x1cc   : > { %v6340_v43 = vadd.f32 %v1875_v36, %v1586_v35  ;;  %v1588_v44 = vpop.f32.mrf.mxu0  ;;  %2395 = vmatprep.mubr.bf16.mxu1 %v665_v2  ;;  %v520_v36 = vld [vmem:[%s5791_s11 + $0x130] sm:$0xff] }
 0x1cd   : > { %v1877_v48 = vpop.f32.mrf.mxu1  ;;  %v678_v44 = vunpack.c.l.s8.bf16 %v518_v33  ;;  %v680_v47 = vunpack.c.l.s8.bf16 %v520_v36 }
 0x1ce   : > { %v1589_v49 = vpop.f32.mrf.mxu0  ;;  %v687_v48 = vunpack.c.h.s8.bf16 %v519_v8  ;;  %v686_v8 = vunpack.c.h.s8.bf16 %v518_v33  ;;  %v528_v33 = vld [vmem:[%s5791_s11 + $0x170] sm:$0xff] }
 0x1cf   : > { %v1878_v54 = vpop.f32.mrf.mxu1 }
 0x1d0   : > { %v6344_v58 = vadd.f32 %v1878_v54, %v1589_v49  ;;  %v1591_v60 = vpop.f32.mrf.mxu0  ;;  %v689_v54 = vunpack.c.h.s8.bf16 %v521_v14 }
 0x1d1   : > { %v1880_v0 = vpop.f32.mrf.mxu1 }
 0x1d2   : > { %v1594_v1 = vpop.f32.mrf.mxu0  ;;  %2107 = vmatmul.mubr.bf16.gmra.mxu0 %v662_v51 }
 0x1d3   : > { %v1883_v4 = vpop.f32.mrf.mxu1  ;;  %2396 = vmatmul.mubr.bf16.gmra.mxu1 %v664_v56  ;;  %2114 = vmatprep.mubr.bf16.mxu0 %v671_v57 }
 0x1d4   : > { %v6346_v6 = vadd.f32 %v1883_v4, %v1594_v1  ;;  %v1596_v7 = vpop.f32.mrf.mxu0  ;;  %2403 = vmatprep.mubr.bf16.mxu1 %v673_v63  ;;  %v527_v1 = vld [vmem:[%s5791_s11 + $0x168] sm:$0xff] }
 0x1d5   : > { %v1885_v12 = vpop.f32.mrf.mxu1  ;;  %v529_v7 = vld [vmem:[%s5791_s11 + $0x178] sm:$0xff]  ;;  %v695_v14 = vunpack.c.l.s8.bf16 %v527_v1 }
 0x1d6   : > { %v1597_v17 = vpop.f32.mrf.mxu0 }
 0x1d7   : > { %v1886_v21 = vpop.f32.mrf.mxu1 }
 0x1d8   : > { %v6350_v23 = vadd.f32 %v1886_v21, %v1597_v17  ;;  %v1599_v24 = vpop.f32.mrf.mxu0 }
 0x1d9   : > { %v1888_v27 = vpop.f32.mrf.mxu1 }
 0x1da   : > { %7850 = vst [vmem:[#allocation13_spill] sm:$0xff] %v6350_v23  ;;  %v1602_v29 = vpop.f32.mrf.mxu0  ;;  %2115 = vmatmul.mubr.bf16.gmra.mxu0 %v670_v13  ;;  %v688_v13 = vunpack.c.h.s8.bf16 %v520_v36 }
 0x1db   : > { %v1891_v2 = vpop.f32.mrf.mxu1  ;;  %2404 = vmatmul.mubr.bf16.gmra.mxu1 %v672_v22  ;;  %2122 = vmatprep.mubr.bf16.mxu0 %v679_v19  ;;  %v697_v19 = vunpack.c.l.s8.bf16 %v529_v7 }
 0x1dc   : > { %v6353_v34 = vadd.f32 %v1891_v2, %v1602_v29  ;;  %v1604_v35 = vpop.f32.mrf.mxu0  ;;  %2411 = vmatprep.mubr.bf16.mxu1 %v681_v25  ;;  %v526_v29 = vld [vmem:[%s5791_s11 + $0x160] sm:$0xff] }
 0x1dd   : > { %v1893_v37 = vpop.f32.mrf.mxu1  ;;  %v694_v36 = vunpack.c.l.s8.bf16 %v526_v29 }
 0x1de   : > { %7851 = vst [vmem:[#allocation14_spill] sm:$0xff] %v6353_v34  ;;  %v1605_v39 = vpop.f32.mrf.mxu0 }
 0x1df   : > { %v1894_v46 = vpop.f32.mrf.mxu1 }
 0x1e0   : > { %v6356_v49 = vadd.f32 %v1894_v46, %v1605_v39  ;;  %v1607_v51 = vpop.f32.mrf.mxu0  ;;  %v696_v46 = vunpack.c.l.s8.bf16 %v528_v33 }
 0x1e1   : > { %v1896_v56 = vpop.f32.mrf.mxu1 }
 0x1e2   : > { %7852 = vst [vmem:[#allocation15_spill] sm:$0xff] %v6356_v49  ;;  %v1610_v57 = vpop.f32.mrf.mxu0  ;;  %2123 = vmatmul.mubr.bf16.gmra.mxu0 %v678_v44 }
 0x1e3   : > { %v1899_v60 = vpop.f32.mrf.mxu1  ;;  %2412 = vmatmul.mubr.bf16.gmra.mxu1 %v680_v47  ;;  %2130 = vmatprep.mubr.bf16.mxu0 %v687_v48  ;;  %v703_v47 = vunpack.c.h.s8.bf16 %v527_v1  ;;  %v702_v1 = vunpack.c.h.s8.bf16 %v526_v29  ;;  %v536_v29 = vld [vmem:[%s5791_s11 + $0x1b0] sm:$0xff] }
 0x1e4   : > { %v6358_v63 = vadd.f32 %v1899_v60, %v1610_v57  ;;  %v1612_v0 = vpop.f32.mrf.mxu0  ;;  %2419 = vmatprep.mubr.bf16.mxu1 %v689_v54  ;;  %v705_v54 = vunpack.c.h.s8.bf16 %v529_v7 }
 0x1e5   : > { %v1901_v4 = vpop.f32.mrf.mxu1 }
 0x1e6   : > { %7853 = vst [vmem:[#allocation16_spill] sm:$0xff] %v6358_v63  ;;  %v1613_v12 = vpop.f32.mrf.mxu0 }
 0x1e7   : > { %v1902_v17 = vpop.f32.mrf.mxu1 }
 0x1e8   : > { %v6362_v21 = vadd.f32 %v1902_v17, %v1613_v12  ;;  %v1615_v22 = vpop.f32.mrf.mxu0  ;;  %v535_v12 = vld [vmem:[%s5791_s11 + $0x1a8] sm:$0xff]  ;;  %v537_v17 = vld [vmem:[%s5791_s11 + $0x1b8] sm:$0xff] }
 0x1e9   : > { %v1904_v24 = vpop.f32.mrf.mxu1  ;;  %v704_v22 = vunpack.c.h.s8.bf16 %v528_v33  ;;  %v711_v7 = vunpack.c.l.s8.bf16 %v535_v12 }
 0x1ea   : > { %7854 = vst [vmem:[#allocation17_spill] sm:$0xff] %v6362_v21  ;;  %v1618_v25 = vpop.f32.mrf.mxu0  ;;  %2131 = vmatmul.mubr.bf16.gmra.mxu0 %v686_v8 }
 0x1eb   : > { %v1907_v27 = vpop.f32.mrf.mxu1  ;;  %2420 = vmatmul.mubr.bf16.gmra.mxu1 %v688_v13  ;;  %2138 = vmatprep.mubr.bf16.mxu0 %v695_v14 }
 0x1ec   : > { %v6365_v2 = vadd.f32 %v1907_v27, %v1618_v25  ;;  %v1620_v35 = vpop.f32.mrf.mxu0  ;;  %2427 = vmatprep.mubr.bf16.mxu1 %v697_v19  ;;  %v713_v25 = vunpack.c.l.s8.bf16 %v537_v17 }
 0x1ed   : > { %v1909_v37 = vpop.f32.mrf.mxu1 }
 0x1ee   : > { %7855 = vst [vmem:[#allocation18_spill] sm:$0xff] %v6365_v2  ;;  %v1621_v39 = vpop.f32.mrf.mxu0  ;;  %v584_v2 = vld [vmem:[%s5791_s11 + $0x330] sm:$0xff] }
 0x1ef   : > { %v1910_v44 = vpop.f32.mrf.mxu1 }
 0x1f0   : > { %v6368_v48 = vadd.f32 %v1910_v44, %v1621_v39  ;;  %v1623_v51 = vpop.f32.mrf.mxu0  ;;  %v534_v39 = vld [vmem:[%s5791_s11 + $0x1a0] sm:$0xff] }
 0x1f1   : > { %v1912_v56 = vpop.f32.mrf.mxu1  ;;  %v710_v33 = vunpack.c.l.s8.bf16 %v534_v39 }
 0x1f2   : > { %7856 = vst [vmem:[#allocation19_spill] sm:$0xff] %v6368_v48  ;;  %v1626_v57 = vpop.f32.mrf.mxu0  ;;  %2139 = vmatmul.mubr.bf16.gmra.mxu0 %v694_v36  ;;  %v719_v56 = vunpack.c.h.s8.bf16 %v535_v12  ;;  %v718_v12 = vunpack.c.h.s8.bf16 %v534_v39  ;;  %v544_v39 = vld [vmem:[%s5791_s11 + $0x1f0] sm:$0xff] }
 0x1f3   : > { %v1915_v60 = vpop.f32.mrf.mxu1  ;;  %2428 = vmatmul.mubr.bf16.gmra.mxu1 %v696_v46  ;;  %2146 = vmatprep.mubr.bf16.mxu0 %v703_v47 }
 0x1f4   : > { %v6370_v0 = vadd.f32 %v1915_v60, %v1626_v57  ;;  %v1628_v4 = vpop.f32.mrf.mxu0  ;;  %2435 = vmatprep.mubr.bf16.mxu1 %v705_v54  ;;  %v712_v54 = vunpack.c.l.s8.bf16 %v536_v29 }
 0x1f5   : > { %v1917_v8 = vpop.f32.mrf.mxu1  ;;  %v721_v4 = vunpack.c.h.s8.bf16 %v537_v17 }
 0x1f6   : > { %7857 = vst [vmem:[#allocation20_spill] sm:$0xff] %v6370_v0  ;;  %v1629_v13 = vpop.f32.mrf.mxu0 }
 0x1f7   : > { %v1918_v14 = vpop.f32.mrf.mxu1 }
 0x1f8   : > { %v6374_v19 = vadd.f32 %v1918_v14, %v1629_v13  ;;  %v1631_v24 = vpop.f32.mrf.mxu0 }
 0x1f9   : > { %v1920_v27 = vpop.f32.mrf.mxu1 }
 0x1fa   : > { %7858 = vst [vmem:[#allocation21_spill] sm:$0xff] %v6374_v19  ;;  %v1634_v35 = vpop.f32.mrf.mxu0  ;;  %2147 = vmatmul.mubr.bf16.gmra.mxu0 %v702_v1 }
 0x1fb   : > { %v1923_v37 = vpop.f32.mrf.mxu1  ;;  %2436 = vmatmul.mubr.bf16.gmra.mxu1 %v704_v22  ;;  %2154 = vmatprep.mubr.bf16.mxu0 %v711_v7  ;;  %v543_v7 = vld [vmem:[%s5791_s11 + $0x1e8] sm:$0xff] }
 0x1fc   : > { %v6377_v36 = vadd.f32 %v1923_v37, %v1634_v35  ;;  %v1636_v44 = vpop.f32.mrf.mxu0  ;;  %2443 = vmatprep.mubr.bf16.mxu1 %v713_v25  ;;  %v545_v25 = vld [vmem:[%s5791_s11 + $0x1f8] sm:$0xff]  ;;  %v720_v37 = vunpack.c.h.s8.bf16 %v536_v29  ;;  %v727_v17 = vunpack.c.l.s8.bf16 %v543_v7 }
 0x1fd   : > { %v1925_v46 = vpop.f32.mrf.mxu1 }
 0x1fe   : > { %7859 = vst [vmem:[#allocation22_spill] sm:$0xff] %v6377_v36  ;;  %v1637_v47 = vpop.f32.mrf.mxu0 }
 0x1ff   : > { %v1926_v51 = vpop.f32.mrf.mxu1 }
 0x200   : > { %v6380_v57 = vadd.f32 %v1926_v51, %v1637_v47  ;;  %v1639_v60 = vpop.f32.mrf.mxu0  ;;  %v729_v47 = vunpack.c.l.s8.bf16 %v545_v25 }
 0x201   : > { %v1928_v8 = vpop.f32.mrf.mxu1 }
 0x202   : > { %7860 = vst [vmem:[#allocation23_spill] sm:$0xff] %v6380_v57  ;;  %v1642_v13 = vpop.f32.mrf.mxu0  ;;  %2155 = vmatmul.mubr.bf16.gmra.mxu0 %v710_v33 }
 0x203   : > { %v1931_v1 = vpop.f32.mrf.mxu1  ;;  %2444 = vmatmul.mubr.bf16.gmra.mxu1 %v712_v54  ;;  %2162 = vmatprep.mubr.bf16.mxu0 %v719_v56  ;;  %v542_v56 = vld [vmem:[%s5791_s11 + $0x1e0] sm:$0xff] }
 0x204   : > { %v6382_v14 = vadd.f32 %v1931_v1, %v1642_v13  ;;  %v1644_v22 = vpop.f32.mrf.mxu0  ;;  %2451 = vmatprep.mubr.bf16.mxu1 %v721_v4  ;;  %v726_v29 = vunpack.c.l.s8.bf16 %v542_v56 }
 0x205   : > { %v1933_v24 = vpop.f32.mrf.mxu1  ;;  %v728_v22 = vunpack.c.l.s8.bf16 %v544_v39 }
 0x206   : > { %7861 = vst [vmem:[#allocation24_spill] sm:$0xff] %v6382_v14  ;;  %v1645_v27 = vpop.f32.mrf.mxu0  ;;  %v735_v24 = vunpack.c.h.s8.bf16 %v543_v7  ;;  %v734_v7 = vunpack.c.h.s8.bf16 %v542_v56  ;;  %v552_v56 = vld [vmem:[%s5791_s11 + $0x230] sm:$0xff]  ;;  %v577_v14 = vld [vmem:[%s5791_s11 + $0x2f8] sm:$0xff] }
 0x207   : > { %v1934_v35 = vpop.f32.mrf.mxu1 }
 0x208   : > { %v6386_v44 = vadd.f32 %v1934_v35, %v1645_v27  ;;  %v1647_v46 = vpop.f32.mrf.mxu0  ;;  %v737_v35 = vunpack.c.h.s8.bf16 %v545_v25 }
 0x209   : > { %v1936_v33 = vpop.f32.mrf.mxu1 }
 0x20a   : > { %7862 = vst [vmem:[#allocation25_spill] sm:$0xff] %v6386_v44  ;;  %v1650_v51 = vpop.f32.mrf.mxu0  ;;  %2163 = vmatmul.mubr.bf16.gmra.mxu0 %v718_v12 }
 0x20b   : > { %v1939_v54 = vpop.f32.mrf.mxu1  ;;  %2452 = vmatmul.mubr.bf16.gmra.mxu1 %v720_v37  ;;  %2170 = vmatprep.mubr.bf16.mxu0 %v727_v17 }
 0x20c   : > { %v6389_v60 = vadd.f32 %v1939_v54, %v1650_v51  ;;  %v1652_v4 = vpop.f32.mrf.mxu0  ;;  %2459 = vmatprep.mubr.bf16.mxu1 %v729_v47  ;;  %v551_v51 = vld [vmem:[%s5791_s11 + $0x228] sm:$0xff] }
 0x20d   : > { %v1941_v8 = vpop.f32.mrf.mxu1  ;;  %v553_v4 = vld [vmem:[%s5791_s11 + $0x238] sm:$0xff]  ;;  %v743_v25 = vunpack.c.l.s8.bf16 %v551_v51 }
 0x20e   : > { %7863 = vst [vmem:[#allocation26_spill] sm:$0xff] %v6389_v60  ;;  %v1653_v13 = vpop.f32.mrf.mxu0 }
 0x20f   : > { %v1942_v1 = vpop.f32.mrf.mxu1 }
 0x210   : > { %v6392_v27 = vadd.f32 %v1942_v1, %v1653_v13  ;;  %v1655_v12 = vpop.f32.mrf.mxu0  ;;  %v736_v1 = vunpack.c.h.s8.bf16 %v544_v39 }
 0x211   : > { %v1944_v37 = vpop.f32.mrf.mxu1 }
 0x212   : > { %7864 = vst [vmem:[#allocation27_spill] sm:$0xff] %v6392_v27  ;;  %v1658_v17 = vpop.f32.mrf.mxu0  ;;  %2171 = vmatmul.mubr.bf16.gmra.mxu0 %v726_v29  ;;  %v745_v37 = vunpack.c.l.s8.bf16 %v553_v4 }
 0x213   : > { %v1947_v46 = vpop.f32.mrf.mxu1  ;;  %2460 = vmatmul.mubr.bf16.gmra.mxu1 %v728_v22  ;;  %2178 = vmatprep.mubr.bf16.mxu0 %v735_v24 }
 0x214   : > { %v6394_v47 = vadd.f32 %v1947_v46, %v1658_v17  ;;  %v1660_v33 = vpop.f32.mrf.mxu0  ;;  %2467 = vmatprep.mubr.bf16.mxu1 %v737_v35  ;;  %v550_v35 = vld [vmem:[%s5791_s11 + $0x220] sm:$0xff] }
 0x215   : > { %v1949_v54 = vpop.f32.mrf.mxu1  ;;  %v742_v39 = vunpack.c.l.s8.bf16 %v550_v35 }
 0x216   : > { %7865 = vst [vmem:[#allocation28_spill] sm:$0xff] %v6394_v47  ;;  %v1661_v8 = vpop.f32.mrf.mxu0 }
 0x217   : > { %v1950_v13 = vpop.f32.mrf.mxu1 }
 0x218   : > { %v6398_v12 = vadd.f32 %v1950_v13, %v1661_v8  ;;  %v1663_v29 = vpop.f32.mrf.mxu0  ;;  %v744_v13 = vunpack.c.l.s8.bf16 %v552_v56 }
 0x219   : > { %v1952_v22 = vpop.f32.mrf.mxu1  ;;  %v751_v29 = vunpack.c.h.s8.bf16 %v551_v51  ;;  %v750_v51 = vunpack.c.h.s8.bf16 %v550_v35  ;;  %v560_v35 = vld [vmem:[%s5791_s11 + $0x270] sm:$0xff] }
 0x21a   : > { %7866 = vst [vmem:[#allocation29_spill] sm:$0xff] %v6398_v12  ;;  %v1666_v24 = vpop.f32.mrf.mxu0  ;;  %2179 = vmatmul.mubr.bf16.gmra.mxu0 %v734_v7  ;;  %v753_v12 = vunpack.c.h.s8.bf16 %v553_v4 }
 0x21b   : > { %v1955_v17 = vpop.f32.mrf.mxu1  ;;  %2468 = vmatmul.mubr.bf16.gmra.mxu1 %v736_v1  ;;  %2186 = vmatprep.mubr.bf16.mxu0 %v743_v25 }
 0x21c   : > { %v6401_v46 = vadd.f32 %v1955_v17, %v1666_v24  ;;  %v1668_v33 = vpop.f32.mrf.mxu0  ;;  %2475 = vmatprep.mubr.bf16.mxu1 %v745_v37 }
 0x21d   : > { %v1957_v54 = vpop.f32.mrf.mxu1  ;;  %v559_v33 = vld [vmem:[%s5791_s11 + $0x268] sm:$0xff] }
 0x21e   : > { %7867 = vst [vmem:[#allocation30_spill] sm:$0xff] %v6401_v46  ;;  %v1669_v47 = vpop.f32.mrf.mxu0  ;;  %v561_v46 = vld [vmem:[%s5791_s11 + $0x278] sm:$0xff]  ;;  %v759_v4 = vunpack.c.l.s8.bf16 %v559_v33 }
 0x21f   : > { %v1958_v8 = vpop.f32.mrf.mxu1 }
 0x220   : > { %v6404_v22 = vadd.f32 %v1958_v8, %v1669_v47  ;;  %v1671_v7 = vpop.f32.mrf.mxu0  ;;  %v752_v8 = vunpack.c.h.s8.bf16 %v552_v56 }
 0x221   : > { %v1960_v1 = vpop.f32.mrf.mxu1 }
 0x222   : > { %7868 = vst [vmem:[#allocation31_spill] sm:$0xff] %v6404_v22  ;;  %v1674_v25 = vpop.f32.mrf.mxu0  ;;  %2187 = vmatmul.mubr.bf16.gmra.mxu0 %v742_v39  ;;  %v761_v1 = vunpack.c.l.s8.bf16 %v561_v46 }
 0x223   : > { %v1963_v24 = vpop.f32.mrf.mxu1  ;;  %2476 = vmatmul.mubr.bf16.gmra.mxu1 %v744_v13  ;;  %2194 = vmatprep.mubr.bf16.mxu0 %v751_v29 }
 0x224   : > { %v6406_v37 = vadd.f32 %v1963_v24, %v1674_v25  ;;  %v1676_v17 = vpop.f32.mrf.mxu0  ;;  %2483 = vmatprep.mubr.bf16.mxu1 %v753_v12  ;;  %v558_v12 = vld [vmem:[%s5791_s11 + $0x260] sm:$0xff] }
 0x225   : > { %v1965_v54 = vpop.f32.mrf.mxu1  ;;  %v758_v56 = vunpack.c.l.s8.bf16 %v558_v12 }
 0x226   : > { %7869 = vst [vmem:[#allocation32_spill] sm:$0xff] %v6406_v37  ;;  %v1677_v27 = vpop.f32.mrf.mxu0 }
 0x227   : > { %v1966_v47 = vpop.f32.mrf.mxu1 }
 0x228   : > { %v6410_v7 = vadd.f32 %v1966_v47, %v1677_v27  ;;  %v1679_v39 = vpop.f32.mrf.mxu0  ;;  %v760_v47 = vunpack.c.l.s8.bf16 %v560_v35 }
 0x229   : > { %v1968_v13 = vpop.f32.mrf.mxu1  ;;  %v767_v39 = vunpack.c.h.s8.bf16 %v559_v33  ;;  %v766_v33 = vunpack.c.h.s8.bf16 %v558_v12 }
 0x22a   : > { %7870 = vst [vmem:[#allocation33_spill] sm:$0xff] %v6410_v7  ;;  %v1682_v29 = vpop.f32.mrf.mxu0  ;;  %2195 = vmatmul.mubr.bf16.gmra.mxu0 %v750_v51  ;;  %v769_v7 = vunpack.c.h.s8.bf16 %v561_v46  ;;  %v768_v46 = vunpack.c.h.s8.bf16 %v560_v35  ;;  %v568_v35 = vld [vmem:[%s5791_s11 + $0x2b0] sm:$0xff] }
 0x22b   : > { %v1971_v25 = vpop.f32.mrf.mxu1  ;;  %2484 = vmatmul.mubr.bf16.gmra.mxu1 %v752_v8  ;;  %2202 = vmatprep.mubr.bf16.mxu0 %v759_v4 }
 0x22c   : > { %v6413_v24 = vadd.f32 %v1971_v25, %v1682_v29  ;;  %v1684_v17 = vpop.f32.mrf.mxu0  ;;  %2491 = vmatprep.mubr.bf16.mxu1 %v761_v1 }
 0x22d   : > { %v1973_v54 = vpop.f32.mrf.mxu1  ;;  %v567_v17 = vld [vmem:[%s5791_s11 + $0x2a8] sm:$0xff] }
 0x22e   : > { %7871 = vst [vmem:[#allocation34_spill] sm:$0xff] %v6413_v24  ;;  %v1685_v37 = vpop.f32.mrf.mxu0  ;;  %v569_v24 = vld [vmem:[%s5791_s11 + $0x2b8] sm:$0xff] }
 0x22f   : > { %v1974_v27 = vpop.f32.mrf.mxu1 }
 0x230   : > { %v6416_v13 = vadd.f32 %v1974_v27, %v1685_v37  ;;  %v1687_v51 = vpop.f32.mrf.mxu0  ;;  %v6422_v37 = vpop.permute.xlu0 %2865 }
 0x231   : > { %v1976_v8 = vpop.f32.mrf.mxu1  ;;  %7874 = vst [vmem:[#allocation37_spill] sm:$0xff] %v6422_v37  ;;  %v775_v51 = vunpack.c.l.s8.bf16 %v567_v17 }
 0x232   : > { %7872 = vst [vmem:[#allocation35_spill] sm:$0xff] %v6416_v13  ;;  %v1690_v4 = vpop.f32.mrf.mxu0  ;;  %2203 = vmatmul.mubr.bf16.gmra.mxu0 %v758_v56  ;;  %v783_v13 = vunpack.c.h.s8.bf16 %v567_v17  ;;  %v575_v17 = vld [vmem:[%s5791_s11 + $0x2e8] sm:$0xff] }
 0x233   : > { %v1979_v29 = vpop.f32.mrf.mxu1  ;;  %2492 = vmatmul.mubr.bf16.gmra.mxu1 %v760_v47  ;;  %2210 = vmatprep.mubr.bf16.mxu0 %v767_v39  ;;  %v777_v39 = vunpack.c.l.s8.bf16 %v569_v24 }
 0x234   : > { %v6418_v1 = vadd.f32 %v1979_v29, %v1690_v4  ;;  %v1692_v25 = vpop.f32.mrf.mxu0  ;;  %2499 = vmatprep.mubr.bf16.mxu1 %v769_v7  ;;  %v6426_v4 = vpop.permute.xlu1 %2875 }
 0x235   : > { %v1981_v54 = vpop.f32.mrf.mxu1  ;;  %7876 = vst [vmem:[#allocation39_spill] sm:$0xff] %v6426_v4  ;;  %v566_v25 = vld [vmem:[%s5791_s11 + $0x2a0] sm:$0xff] }
 0x236   : > { %7873 = vst [vmem:[#allocation36_spill] sm:$0xff] %v6418_v1  ;;  %v1693_v22 = vpop.f32.mrf.mxu0  ;;  %v6432_v1 = vpop.permute.xlu0 %2870 }
 0x237   : > { %v1982_v27 = vpop.f32.mrf.mxu1  ;;  %7878 = vst [vmem:[#allocation41_spill] sm:$0xff] %v6432_v1 }
 0x238   : > { %v6424_v56 = vadd.f32 %v1982_v27, %v1693_v22  ;;  %v1695_v47 = vpop.f32.mrf.mxu0  ;;  %v6434_v60 = vpop.permute.xlu1 %2880 }
 0x239   : > { %v1984_v8 = vpop.f32.mrf.mxu1  ;;  %v774_v47 = vunpack.c.l.s8.bf16 %v566_v25  ;;  %7879 = vst [vmem:[#allocation42_spill] sm:$0xff] %v6434_v60 }
 0x23a   : > { %7875 = vst [vmem:[#allocation38_spill] sm:$0xff] %v6424_v56  ;;  %v1698_v7 = vpop.f32.mrf.mxu0  ;;  %2211 = vmatmul.mubr.bf16.gmra.mxu0 %v766_v33  ;;  %v776_v8 = vunpack.c.l.s8.bf16 %v568_v35 }
 0x23b   : > { %v1987_v29 = vpop.f32.mrf.mxu1  ;;  %2500 = vmatmul.mubr.bf16.gmra.mxu1 %v768_v46  ;;  %2218 = vmatprep.mubr.bf16.mxu0 %v775_v51  ;;  %v785_v51 = vunpack.c.h.s8.bf16 %v569_v24  ;;  %v782_v24 = vunpack.c.h.s8.bf16 %v566_v25 }
 0x23c   : > { %v6429_v12 = vadd.f32 %v1987_v29, %v1698_v7  ;;  %v1700_v54 = vpop.f32.mrf.mxu0  ;;  %2507 = vmatprep.mubr.bf16.mxu1 %v777_v39  ;;  %v6438_v39 = vpop.permute.xlu0 %2885 }
 0x23d   : > { %v1989_v22 = vpop.f32.mrf.mxu1  ;;  %7881 = vst [vmem:[#allocation44_spill] sm:$0xff] %v6438_v39  ;;  %v6444_v57 = vpop.permute.xlu1 %2890 }
 0x23e   : > { %7877 = vst [vmem:[#allocation40_spill] sm:$0xff] %v6429_v12  ;;  %v1701_v27 = vpop.f32.mrf.mxu0  ;;  %7883 = vst [vmem:[#allocation46_spill] sm:$0xff] %v6444_v57 }
 0x23f   : > { %v1990_v56 = vpop.f32.mrf.mxu1 }
 0x240   : > { %v6436_v33 = vadd.f32 %v1990_v56, %v1701_v27  ;;  %v1703_v46 = vpop.f32.mrf.mxu0 }
 0x241   : > { %v1992_v7 = vpop.f32.mrf.mxu1  ;;  %v784_v46 = vunpack.c.h.s8.bf16 %v568_v35 }
 0x242   : > { %7880 = vst [vmem:[#allocation43_spill] sm:$0xff] %v6436_v33  ;;  %v1706_v29 = vpop.f32.mrf.mxu0  ;;  %2219 = vmatmul.mubr.bf16.gmra.mxu0 %v774_v47  ;;  %v791_v47 = vunpack.c.l.s8.bf16 %v575_v17  ;;  %v576_v33 = vld [vmem:[%s5791_s11 + $0x2f0] sm:$0xff] }
 0x243   : > { %v1995_v54 = vpop.f32.mrf.mxu1  ;;  %2508 = vmatmul.mubr.bf16.gmra.mxu1 %v776_v8  ;;  %2226 = vmatprep.mubr.bf16.mxu0 %v783_v13  ;;  %v793_v13 = vunpack.c.l.s8.bf16 %v577_v14 }
 0x244   : > { %v6440_v22 = vadd.f32 %v1995_v54, %v1706_v29  ;;  %v1708_v12 = vpop.f32.mrf.mxu0  ;;  %2515 = vmatprep.mubr.bf16.mxu1 %v785_v51  ;;  %v6448_v29 = vpop.permute.xlu0 %2895  ;;  %v574_v54 = vld [vmem:[%s5791_s11 + $0x2e0] sm:$0xff] }
 0x245   : > { %v1997_v44 = vpop.f32.mrf.mxu1  ;;  %7885 = vst [vmem:[#allocation48_spill] sm:$0xff] %v6448_v29 }
 0x246   : > { %7882 = vst [vmem:[#allocation45_spill] sm:$0xff] %v6440_v22  ;;  %v1709_v56 = vpop.f32.mrf.mxu0  ;;  %v6451_v22 = vpop.permute.xlu1 %2900 }
 0x247   : > { %v1998_v27 = vpop.f32.mrf.mxu1  ;;  %7886 = vst [vmem:[#allocation49_spill] sm:$0xff] %v6451_v22 }
 0x248   : > { %v6446_v7 = vadd.f32 %v1998_v27, %v1709_v56  ;;  %v1711_v8 = vpop.f32.mrf.mxu0 }
 0x249   : > { %v2000_v12 = vpop.f32.mrf.mxu1  ;;  %v790_v8 = vunpack.c.l.s8.bf16 %v574_v54 }
 0x24a   : > { %7884 = vst [vmem:[#allocation47_spill] sm:$0xff] %v6446_v7  ;;  %v1714_v51 = vpop.f32.mrf.mxu0  ;;  %2227 = vmatmul.mubr.bf16.gmra.mxu0 %v782_v24  ;;  %v6456_v7 = vpop.permute.xlu0 %2905  ;;  %v792_v12 = vunpack.c.l.s8.bf16 %v576_v33  ;;  %v799_v24 = vunpack.c.h.s8.bf16 %v575_v17  ;;  %v583_v17 = vld [vmem:[%s5791_s11 + $0x328] sm:$0xff] }
 0x24b   : > { %v2003_v44 = vpop.f32.mrf.mxu1  ;;  %2516 = vmatmul.mubr.bf16.gmra.mxu1 %v784_v46  ;;  %2234 = vmatprep.mubr.bf16.mxu0 %v791_v47  ;;  %7888 = vst [vmem:[#allocation51_spill] sm:$0xff] %v6456_v7  ;;  %v801_v47 = vunpack.c.h.s8.bf16 %v577_v14  ;;  %v798_v14 = vunpack.c.h.s8.bf16 %v574_v54  ;;  %v807_v48 = vunpack.c.l.s8.bf16 %v583_v17 }
 0x24c   : > { %v6453_v25 = vadd.f32 %v2003_v44, %v1714_v51  ;;  %v1716_v35 = vpop.f32.mrf.mxu0  ;;  %2523 = vmatprep.mubr.bf16.mxu1 %v793_v13  ;;  %v6460_v51 = vpop.permute.xlu1 %2910 }
 0x24d   : > { %v2005_v56 = vpop.f32.mrf.mxu1  ;;  %7890 = vst [vmem:[#allocation53_spill] sm:$0xff] %v6460_v51 }
 0x24e   : > { %7887 = vst [vmem:[#allocation50_spill] sm:$0xff] %v6453_v25  ;;  %v1717_v27 = vpop.f32.mrf.mxu0  ;;  %v6464_v25 = vpop.permute.xlu0 %2915 }
 0x24f   : > { %v2006_v36 = vpop.f32.mrf.mxu1  ;;  %7892 = vst [vmem:[#allocation55_spill] sm:$0xff] %v6464_v25 }
 0x250   : > { %v6458_v19 = vadd.f32 %v2006_v36, %v1717_v27  ;;  %v1719_v46 = vpop.f32.mrf.mxu0  ;;  %v585_v27 = vld [vmem:[%s5791_s11 + $0x338] sm:$0xff] }
 0x251   : > { %v2008_v0 = vpop.f32.mrf.mxu1  ;;  %v800_v46 = vunpack.c.h.s8.bf16 %v576_v33 }
 0x252   : > { %7889 = vst [vmem:[#allocation52_spill] sm:$0xff] %v6458_v19  ;;  %v1722_v44 = vpop.f32.mrf.mxu0  ;;  %2235 = vmatmul.mubr.bf16.gmra.mxu0 %v790_v8  ;;  %v6468_v8 = vpop.permute.xlu1 %2920 }
 0x253   : > { %v2011_v13 = vpop.f32.mrf.mxu1  ;;  %2524 = vmatmul.mubr.bf16.gmra.mxu1 %v792_v12  ;;  %2242 = vmatprep.mubr.bf16.mxu0 %v799_v24  ;;  %7893 = vst [vmem:[#allocation56_spill] sm:$0xff] %v6468_v8 }
 0x254   : > { %v6462_v35 = vadd.f32 %v2011_v13, %v1722_v44  ;;  %v1724_v56 = vpop.f32.mrf.mxu0  ;;  %2531 = vmatprep.mubr.bf16.mxu1 %v801_v47  ;;  %v809_v44 = vunpack.c.l.s8.bf16 %v585_v27 }
 0x255   : > { %v2013_v36 = vpop.f32.mrf.mxu1  ;;  %v6472_v56 = vpop.permute.xlu0 %2925 }
 0x256   : > { %7891 = vst [vmem:[#allocation54_spill] sm:$0xff] %v6462_v35  ;;  %v1725_v19 = vpop.f32.mrf.mxu0  ;;  %7895 = vst [vmem:[#allocation58_spill] sm:$0xff] %v6472_v56  ;;  %v582_v35 = vld [vmem:[%s5791_s11 + $0x320] sm:$0xff]  ;;  %v6478_v63 = vpop.permute.xlu1 %2930 }
 0x257   : > { %v2014_v0 = vpop.f32.mrf.mxu1  ;;  %7897 = vst [vmem:[#allocation60_spill] sm:$0xff] %v6478_v63  ;;  %v814_v34 = vunpack.c.h.s8.bf16 %v582_v35 }
 0x258   : > { %v6470_v12 = vadd.f32 %v2014_v0, %v1725_v19  ;;  %v1727_v24 = vpop.f32.mrf.mxu0  ;;  %v806_v0 = vunpack.c.l.s8.bf16 %v582_v35 }
 0x259   : > { %v2016_v13 = vpop.f32.mrf.mxu1 }
 0x25a   : > { %7894 = vst [vmem:[#allocation57_spill] sm:$0xff] %v6470_v12  ;;  %v1730_v47 = vpop.f32.mrf.mxu0  ;;  %2243 = vmatmul.mubr.bf16.gmra.mxu0 %v798_v14  ;;  %v808_v13 = vunpack.c.l.s8.bf16 %v584_v2  ;;  %v815_v12 = vunpack.c.h.s8.bf16 %v583_v17 }
 0x25b   : > { %v2019_v36 = vpop.f32.mrf.mxu1  ;;  %2532 = vmatmul.mubr.bf16.gmra.mxu1 %v800_v46  ;;  %2250 = vmatprep.mubr.bf16.mxu0 %v807_v48  ;;  %v6482_v48 = vpop.permute.xlu0 %2935  ;;  %v817_v46 = vunpack.c.h.s8.bf16 %v585_v27  ;;  %v6492_v27 = vld [vmem:[%s7716_s3] ss:$0 sm:$0xff] }
 0x25c   : > { %v6475_v54 = vadd.f32 %v2019_v36, %v1730_v47  ;;  %v1732_v33 = vpop.f32.mrf.mxu0  ;;  %2539 = vmatprep.mubr.bf16.mxu1 %v809_v44  ;;  %7899 = vst [vmem:[#allocation62_spill] sm:$0xff] %v6482_v48 }
 0x25d   : > { %v2021_v21 = vpop.f32.mrf.mxu1  ;;  %v6485_v33 = vpop.permute.xlu1 %2940 }
 0x25e   : > { %7896 = vst [vmem:[#allocation59_spill] sm:$0xff] %v6475_v54  ;;  %v1733_v19 = vpop.f32.mrf.mxu0  ;;  %7900 = vst [vmem:[#allocation63_spill] sm:$0xff] %v6485_v33 }
 0x25f   : > { %v2022_v24 = vpop.f32.mrf.mxu1 }
 0x260   : > { %v6480_v14 = vadd.f32 %v2022_v24, %v1733_v19  ;;  %v1735_v49 = vpop.f32.mrf.mxu0  ;;  %v591_v24 = vld [vmem:[%s5791_s11 + $0x368] sm:$0xff] }
 0x261   : > { %v2024_v47 = vpop.f32.mrf.mxu1  ;;  %v593_v49 = vld [vmem:[%s5791_s11 + $0x378] sm:$0xff] }
 0x262   : > { %7898 = vst [vmem:[#allocation61_spill] sm:$0xff] %v6480_v14  ;;  %v2060_v36 = vpop.f32.mrf.mxu0  ;;  %2251 = vmatmul.mubr.bf16.gmra.mxu0 %v806_v0  ;;  %v6494_v0 = vpop.permute.xlu0 %2945  ;;  %v823_v47 = vunpack.c.l.s8.bf16 %v591_v24 }
 0x263   : > { %v2061_v21 = vadd.f32 %v2060_v36, %v6209_v41  ;;  %v2349_v44 = vpop.f32.mrf.mxu1  ;;  %2540 = vmatmul.mubr.bf16.gmra.mxu1 %v808_v13  ;;  %2258 = vmatprep.mubr.bf16.mxu0 %v815_v12  ;;  %7901 = vst [vmem:[#allocation64_spill] sm:$0xff] %v6494_v0  ;;  %v816_v13 = vunpack.c.h.s8.bf16 %v584_v2  ;;  %v825_v36 = vunpack.c.l.s8.bf16 %v593_v49  ;;  %v590_v2 = vld [vmem:[%s5791_s11 + $0x360] sm:$0xff] }
 0x264   : > { %v2062_v54 = vpop.f32.mrf.mxu0  ;;  %2547 = vmatprep.mubr.bf16.mxu1 %v817_v46 }
 0x265   : > { %v2350_v17 = vadd.f32 %v2349_v44, %v2061_v21  ;;  %v2351_v19 = vpop.f32.mrf.mxu1 }
 0x266   : > { %v2063_v14 = vpop.f32.mrf.mxu0  ;;  %v6502_v19 = vpop.permute.xlu1 %2950 }
 0x267   : > { %v6497_v41 = vmul.f32 %v6422_v37, %v2350_v17  ;;  %v2064_v12 = vadd.f32 %v2063_v14, %v6215_v53  ;;  %v2352_v54 = vpop.f32.mrf.mxu1  ;;  %7903 = vst [vmem:[#allocation66_spill] sm:$0xff] %v6502_v19 }
 0x268   : > { %v2065_v46 = vpop.f32.mrf.mxu0 }
 0x269   : > { %7902 = vst [vmem:[#allocation65_spill] sm:$0xff] %v6497_v41  ;;  %v2353_v21 = vadd.f32 %v2352_v54, %v2064_v12  ;;  %v2354_v35 = vpop.f32.mrf.mxu1  ;;  %v3254_v44 = vmul.f32 %v6492_v27, %v6497_v41  ;;  %v6509_v12 = vpop.permute.xlu0 %2955  ;;  %v592_v54 = vld [vmem:[%s5791_s11 + $0x370] sm:$0xff] }
 0x26a   : > { %v2068_v23 = vpop.f32.mrf.mxu0  ;;  %2259 = vmatmul.mubr.bf16.gmra.mxu0 %v814_v34  ;;  %7905 = vst [vmem:[#allocation68_spill] sm:$0xff] %v6509_v12 }
 0x26b   : > { %v6505_v17 = vmul.f32 %v6432_v1, %v2353_v21  ;;  %v2069_v53 = vadd.f32 %v2068_v23, %v6220_v62  ;;  %v2357_v14 = vpop.f32.mrf.mxu1  ;;  %2548 = vmatmul.mubr.bf16.gmra.mxu1 %v816_v13  ;;  %3318 = vadd.xlane.f32.xlu0 %v3254_v44  ;;  %v822_v21 = vunpack.c.l.s8.bf16 %v590_v2  ;;  %v824_v13 = vunpack.c.l.s8.bf16 %v592_v54  ;;  %v6518_v44 = vpop.permute.xlu1 %2960 }
 0x26c   : > { %v2070_v46 = vpop.f32.mrf.mxu0  ;;  %2266 = vmatprep.mubr.bf16.mxu0 %v823_v47  ;;  %2555 = vmatprep.mubr.bf16.mxu1 %v825_v36  ;;  %7907 = vst [vmem:[#allocation70_spill] sm:$0xff] %v6518_v44  ;;  %v831_v36 = vunpack.c.h.s8.bf16 %v591_v24 }
 0x26d   : > { %7904 = vst [vmem:[#allocation67_spill] sm:$0xff] %v6505_v17  ;;  %v2358_v35 = vadd.f32 %v2357_v14, %v2069_v53  ;;  %v2359_v37 = vpop.f32.mrf.mxu1  ;;  %v3255_v34 = vmul.f32 %v6492_v27, %v6505_v17  ;;  %v833_v46 = vunpack.c.h.s8.bf16 %v593_v49 }
 0x26e   : > { %v2071_v41 = vpop.f32.mrf.mxu0 }
 0x26f   : > { %v6515_v1 = vmul.f32 %v6426_v4, %v2358_v35  ;;  %v2072_v62 = vadd.f32 %v2071_v41, %v6225_v10  ;;  %v2360_v23 = vpop.f32.mrf.mxu1  ;;  %3320 = vadd.xlane.f32.xlu1 %v3255_v34  ;;  %v6522_v35 = vpop.permute.xlu0 %2965 }
 0x270   : > { %v2073_v47 = vpop.f32.mrf.mxu0  ;;  %7908 = vst [vmem:[#allocation71_spill] sm:$0xff] %v6522_v35 }
 0x271   : > { %7906 = vst [vmem:[#allocation69_spill] sm:$0xff] %v6515_v1  ;;  %v2361_v53 = vadd.f32 %v2360_v23, %v2072_v62  ;;  %v2362_v37 = vpop.f32.mrf.mxu1  ;;  %v3256_v14 = vmul.f32 %v6492_v27, %v6515_v1  ;;  %v6528_v23 = vpop.permute.xlu1 %2970  ;;  %v599_v47 = vld [vmem:[%s5791_s11 + $0x3a8] sm:$0xff] }
 0x272   : > { %v2076_v17 = vpop.f32.mrf.mxu0  ;;  %2267 = vmatmul.mubr.bf16.gmra.mxu0 %v822_v21  ;;  %7910 = vst [vmem:[#allocation73_spill] sm:$0xff] %v6528_v23  ;;  %v601_v37 = vld [vmem:[%s5791_s11 + $0x3b8] sm:$0xff] }
 0x273   : > { %v6525_v10 = vmul.f32 %v6434_v60, %v2361_v53  ;;  %v2077_v41 = vadd.f32 %v2076_v17, %v6229_v18  ;;  %v2365_v34 = vpop.f32.mrf.mxu1  ;;  %2556 = vmatmul.mubr.bf16.gmra.mxu1 %v824_v13  ;;  %3322 = vadd.xlane.f32.xlu0 %v3256_v14  ;;  %v830_v53 = vunpack.c.h.s8.bf16 %v590_v2  ;;  %v832_v13 = vunpack.c.h.s8.bf16 %v592_v54 }
 0x274   : > { %v2078_v24 = vpop.f32.mrf.mxu0  ;;  %2274 = vmatprep.mubr.bf16.mxu0 %v831_v36  ;;  %2563 = vmatprep.mubr.bf16.mxu1 %v833_v46  ;;  %v6538_v36 = vpop.permute.xlu0 %2975  ;;  %v839_v14 = vunpack.c.l.s8.bf16 %v599_v47 }
 0x275   : > { %7909 = vst [vmem:[#allocation72_spill] sm:$0xff] %v6525_v10  ;;  %v2366_v49 = vadd.f32 %v2365_v34, %v2077_v41  ;;  %v2367_v62 = vpop.f32.mrf.mxu1  ;;  %v3257_v21 = vmul.f32 %v6492_v27, %v6525_v10  ;;  %7912 = vst [vmem:[#allocation75_spill] sm:$0xff] %v6538_v36  ;;  %v841_v41 = vunpack.c.l.s8.bf16 %v601_v37  ;;  %v6546_v54 = vpop.permute.xlu1 %2980 }
 0x276   : > { %v2079_v4 = vpop.f32.mrf.mxu0  ;;  %7914 = vst [vmem:[#allocation77_spill] sm:$0xff] %v6546_v54 }
 0x277   : > { %v6535_v60 = vmul.f32 %v6438_v39, %v2366_v49  ;;  %v2080_v18 = vadd.f32 %v2079_v4, %v6235_v30  ;;  %v2368_v17 = vpop.f32.mrf.mxu1  ;;  %3324 = vadd.xlane.f32.xlu0 %v3257_v21  ;;  %v598_v21 = vld [vmem:[%s5791_s11 + $0x3a0] sm:$0xff] }
 0x278   : > { %v2081_v46 = vpop.f32.mrf.mxu0  ;;  %v6552_v39 = vpop.permute.xlu0 %2985 }
 0x279   : > { %7911 = vst [vmem:[#allocation74_spill] sm:$0xff] %v6535_v60  ;;  %v2369_v34 = vadd.f32 %v2368_v17, %v2080_v18  ;;  %v2370_v24 = vpop.f32.mrf.mxu1  ;;  %v3258_v2 = vmul.f32 %v6492_v27, %v6535_v60  ;;  %v600_v18 = vld [vmem:[%s5791_s11 + $0x3b0] sm:$0xff]  ;;  %7915 = vst [vmem:[#allocation78_spill] sm:$0xff] %v6552_v39 }
 0x27a   : > { %v2084_v62 = vpop.f32.mrf.mxu0  ;;  %2275 = vmatmul.mubr.bf16.gmra.mxu0 %v830_v53 }
 0x27b   : > { %v6543_v49 = vmul.f32 %v6444_v57, %v2369_v34  ;;  %v2085_v30 = vadd.f32 %v2084_v62, %v6240_v38  ;;  %v2373_v4 = vpop.f32.mrf.mxu1  ;;  %2564 = vmatmul.mubr.bf16.gmra.mxu1 %v832_v13  ;;  %3326 = vadd.xlane.f32.xlu1 %v3258_v2  ;;  %v838_v57 = vunpack.c.l.s8.bf16 %v598_v21  ;;  %v840_v62 = vunpack.c.l.s8.bf16 %v600_v18 }
 0x27c   : > { %v2086_v46 = vpop.f32.mrf.mxu0  ;;  %2282 = vmatprep.mubr.bf16.mxu0 %v839_v14  ;;  %2571 = vmatprep.mubr.bf16.mxu1 %v841_v41  ;;  %v847_v41 = vunpack.c.h.s8.bf16 %v599_v47  ;;  %v6566_v47 = vpop.permute.xlu0 %2995 }
 0x27d   : > { %7913 = vst [vmem:[#allocation76_spill] sm:$0xff] %v6543_v49  ;;  %v2374_v17 = vadd.f32 %v2373_v4, %v2085_v30  ;;  %v2375_v24 = vpop.f32.mrf.mxu1  ;;  %v3259_v53 = vmul.f32 %v6492_v27, %v6543_v49  ;;  %v849_v46 = vunpack.c.h.s8.bf16 %v601_v37  ;;  %v6558_v4 = vpop.permute.xlu1 %2990  ;;  %7919 = vst [vmem:[#allocation82_spill] sm:$0xff] %v6566_v47 }
 0x27e   : > { %v2087_v34 = vpop.f32.mrf.mxu0  ;;  %7917 = vst [vmem:[#allocation80_spill] sm:$0xff] %v6558_v4 }
 0x27f   : > { %v6555_v38 = vmul.f32 %v6448_v29, %v2374_v17  ;;  %v2088_v13 = vadd.f32 %v2087_v34, %v6245_v50  ;;  %v2376_v2 = vpop.f32.mrf.mxu1  ;;  %3328 = vadd.xlane.f32.xlu0 %v3259_v53 }
 0x280   : > { %v2089_v14 = vpop.f32.mrf.mxu0 }
 0x281   : > { %7916 = vst [vmem:[#allocation79_spill] sm:$0xff] %v6555_v38  ;;  %v2377_v30 = vadd.f32 %v2376_v2, %v2088_v13  ;;  %v2378_v24 = vpop.f32.mrf.mxu1  ;;  %v3260_v49 = vmul.f32 %v6492_v27, %v6555_v38  ;;  %v607_v14 = vld [vmem:[%s5791_s11 + $0x3e8] sm:$0xff] }
 0x282   : > { %v2092_v60 = vpop.f32.mrf.mxu0  ;;  %2283 = vmatmul.mubr.bf16.gmra.mxu0 %v838_v57  ;;  %v609_v57 = vld [vmem:[%s5791_s11 + $0x3f8] sm:$0xff] }
 0x283   : > { %v6563_v17 = vmul.f32 %v6451_v22, %v2377_v30  ;;  %v2093_v50 = vadd.f32 %v2092_v60, %v6249_v59  ;;  %v2381_v53 = vpop.f32.mrf.mxu1  ;;  %2572 = vmatmul.mubr.bf16.gmra.mxu1 %v840_v62  ;;  %3330 = vadd.xlane.f32.xlu1 %v3260_v49  ;;  %v846_v30 = vunpack.c.h.s8.bf16 %v598_v21  ;;  %v6575_v59 = vpop.permute.xlu1 %3000  ;;  %v848_v62 = vunpack.c.h.s8.bf16 %v600_v18  ;;  %v606_v18 = vld [vmem:[%s5791_s11 + $0x3e0] sm:$0xff] }
 0x284   : > { %v2094_v37 = vpop.f32.mrf.mxu0  ;;  %2290 = vmatprep.mubr.bf16.mxu0 %v847_v41  ;;  %2579 = vmatprep.mubr.bf16.mxu1 %v849_v46  ;;  %7921 = vst [vmem:[#allocation84_spill] sm:$0xff] %v6575_v59  ;;  %v855_v46 = vunpack.c.l.s8.bf16 %v607_v14 }
 0x285   : > { %7918 = vst [vmem:[#allocation81_spill] sm:$0xff] %v6563_v17  ;;  %v2382_v34 = vadd.f32 %v2381_v53, %v2093_v50  ;;  %v2383_v13 = vpop.f32.mrf.mxu1  ;;  %v3261_v2 = vmul.f32 %v6492_v27, %v6563_v17  ;;  %v857_v50 = vunpack.c.l.s8.bf16 %v609_v57 }
 0x286   : > { %v2095_v24 = vpop.f32.mrf.mxu0  ;;  %v6580_v13 = vpop.permute.xlu0 %3005 }
 0x287   : > { %v6573_v22 = vmul.f32 %v6456_v7, %v2382_v34  ;;  %v2096_v60 = vadd.f32 %v2095_v24, %v6255_v9  ;;  %v2384_v49 = vpop.f32.mrf.mxu1  ;;  %3332 = vadd.xlane.f32.xlu0 %v3261_v2  ;;  %7922 = vst [vmem:[#allocation85_spill] sm:$0xff] %v6580_v13 }
 0x288   : > { %v2097_v41 = vpop.f32.mrf.mxu0 }
 0x289   : > { %7920 = vst [vmem:[#allocation83_spill] sm:$0xff] %v6573_v22  ;;  %v2385_v53 = vadd.f32 %v2384_v49, %v2096_v60  ;;  %v2386_v37 = vpop.f32.mrf.mxu1  ;;  %v3262_v21 = vmul.f32 %v6492_v27, %v6573_v22  ;;  %v608_v60 = vld [vmem:[%s5791_s11 + $0x3f0] sm:$0xff]  ;;  %v6588_v49 = vpop.permute.xlu1 %3010 }
 0x28a   : > { %v2100_v34 = vpop.f32.mrf.mxu0  ;;  %2291 = vmatmul.mubr.bf16.gmra.mxu0 %v846_v30  ;;  %7924 = vst [vmem:[#allocation87_spill] sm:$0xff] %v6588_v49 }
 0x28b   : > { %v6583_v7 = vmul.f32 %v6460_v51, %v2385_v53  ;;  %v2101_v9 = vadd.f32 %v2100_v34, %v6260_v20  ;;  %v2389_v2 = vpop.f32.mrf.mxu1  ;;  %2580 = vmatmul.mubr.bf16.gmra.mxu1 %v848_v62  ;;  %3334 = vadd.xlane.f32.xlu1 %v3262_v21  ;;  %v854_v53 = vunpack.c.l.s8.bf16 %v606_v18  ;;  %v856_v21 = vunpack.c.l.s8.bf16 %v608_v60 }
 0x28c   : > { %v2102_v24 = vpop.f32.mrf.mxu0  ;;  %2298 = vmatprep.mubr.bf16.mxu0 %v855_v46  ;;  %2587 = vmatprep.mubr.bf16.mxu1 %v857_v50  ;;  %v6596_v46 = vpop.permute.xlu0 %3015  ;;  %v863_v34 = vunpack.c.h.s8.bf16 %v607_v14 }
 0x28d   : > { %7923 = vst [vmem:[#allocation86_spill] sm:$0xff] %v6583_v7  ;;  %v2390_v41 = vadd.f32 %v2389_v2, %v2101_v9  ;;  %v2391_v37 = vpop.f32.mrf.mxu1  ;;  %v3263_v30 = vmul.f32 %v6492_v27, %v6583_v7  ;;  %7926 = vst [vmem:[#allocation89_spill] sm:$0xff] %v6596_v46  ;;  %v865_v24 = vunpack.c.h.s8.bf16 %v609_v57  ;;  %v6600_v22 = vpop.permute.xlu1 %3020 }
 0x28e   : > { %v2103_v29 = vpop.f32.mrf.mxu0  ;;  %7927 = vst [vmem:[#allocation90_spill] sm:$0xff] %v6600_v22 }
 0x28f   : > { %v6593_v51 = vmul.f32 %v6464_v25, %v2390_v41  ;;  %v2104_v20 = vadd.f32 %v2103_v29, %v6265_v31  ;;  %v2392_v62 = vpop.f32.mrf.mxu1  ;;  %3336 = vadd.xlane.f32.xlu0 %v3263_v30 }
 0x290   : > { %v2105_v50 = vpop.f32.mrf.mxu0 }
 0x291   : > { %7925 = vst [vmem:[#allocation88_spill] sm:$0xff] %v6593_v51  ;;  %v2393_v9 = vadd.f32 %v2392_v62, %v2104_v20  ;;  %v2394_v2 = vpop.f32.mrf.mxu1  ;;  %v3264_v37 = vmul.f32 %v6492_v27, %v6593_v51  ;;  %v6608_v62 = vpop.permute.xlu0 %3025  ;;  %v862_v50 = vunpack.c.h.s8.bf16 %v606_v18 }
 0x292   : > { %v2108_v7 = vpop.f32.mrf.mxu0  ;;  %2299 = vmatmul.mubr.bf16.gmra.mxu0 %v854_v53  ;;  %7929 = vst [vmem:[#allocation92_spill] sm:$0xff] %v6608_v62 }
 0x293   : > { %v6603_v41 = vmul.f32 %v6468_v8, %v2393_v9  ;;  %v2109_v31 = vadd.f32 %v2108_v7, %v6269_v40  ;;  %v2397_v29 = vpop.f32.mrf.mxu1  ;;  %2588 = vmatmul.mubr.bf16.gmra.mxu1 %v856_v21  ;;  %3338 = vadd.xlane.f32.xlu1 %v3264_v37  ;;  %v864_v21 = vunpack.c.h.s8.bf16 %v608_v60 }
 0x294   : > { %v2110_v30 = vpop.f32.mrf.mxu0  ;;  %2306 = vmatprep.mubr.bf16.mxu0 %v863_v34  ;;  %2595 = vmatprep.mubr.bf16.mxu1 %v865_v24  ;;  %v6614_v34 = vpop.permute.xlu1 %3030 }
 0x295   : > { %7928 = vst [vmem:[#allocation91_spill] sm:$0xff] %v6603_v41  ;;  %v2398_v14 = vadd.f32 %v2397_v29, %v2109_v31  ;;  %v2399_v57 = vpop.f32.mrf.mxu1  ;;  %v3265_v20 = vmul.f32 %v6492_v27, %v6603_v41  ;;  %7931 = vst [vmem:[#allocation94_spill] sm:$0xff] %v6614_v34 }
 0x296   : > { %v2111_v53 = vpop.f32.mrf.mxu0 }
 0x297   : > { %v6611_v9 = vmul.f32 %v6472_v56, %v2398_v14  ;;  %v2112_v40 = vadd.f32 %v2111_v53, %v6275_v55  ;;  %v2400_v7 = vpop.f32.mrf.mxu1  ;;  %3340 = vadd.xlane.f32.xlu0 %v3265_v20  ;;  %v6622_v55 = vpop.permute.xlu0 %3035 }
 0x298   : > { %v2113_v2 = vpop.f32.mrf.mxu0  ;;  %7933 = vst [vmem:[#allocation96_spill] sm:$0xff] %v6622_v55 }
 0x299   : > { %7930 = vst [vmem:[#allocation93_spill] sm:$0xff] %v6611_v9  ;;  %v2401_v24 = vadd.f32 %v2400_v7, %v2112_v40  ;;  %v2402_v37 = vpop.f32.mrf.mxu1  ;;  %v3266_v31 = vmul.f32 %v6492_v27, %v6611_v9  ;;  %v6626_v7 = vpop.permute.xlu1 %3040 }
 0x29a   : > { %v2116_v29 = vpop.f32.mrf.mxu0  ;;  %2307 = vmatmul.mubr.bf16.gmra.mxu0 %v862_v50  ;;  %7934 = vst [vmem:[#allocation97_spill] sm:$0xff] %v6626_v7 }
 0x29b   : > { %v6619_v18 = vmul.f32 %v6478_v63, %v2401_v24  ;;  %v2117_v30 = vadd.f32 %v2116_v29, %v6280_v3  ;;  %v2405_v14 = vpop.f32.mrf.mxu1  ;;  %2596 = vmatmul.mubr.bf16.gmra.mxu1 %v864_v21  ;;  %3342 = vadd.xlane.f32.xlu1 %v3266_v31  ;;  %v6634_v29 = vpop.permute.xlu0 %3045 }
 0x29c   : > { %v2118_v60 = vpop.f32.mrf.mxu0  ;;  %7936 = vst [vmem:[#allocation99_spill] sm:$0xff] %v6634_v29 }
 0x29d   : > { %7932 = vst [vmem:[#allocation95_spill] sm:$0xff] %v6619_v18  ;;  %v2406_v57 = vadd.f32 %v2405_v14, %v2117_v30  ;;  %v2407_v20 = vpop.f32.mrf.mxu1  ;;  %v3267_v53 = vmul.f32 %v6492_v27, %v6619_v18 }
 0x29e   : > { %v2119_v40 = vpop.f32.mrf.mxu0 }
 0x29f   : > { %v6629_v50 = vmul.f32 %v6482_v48, %v2406_v57  ;;  %v2120_v2 = vadd.f32 %v2119_v40, %v6285_v16  ;;  %v2408_v3 = vpop.f32.mrf.mxu1  ;;  %3344 = vadd.xlane.f32.xlu0 %v3267_v53  ;;  %v6640_v16 = vpop.permute.xlu1 %3050 }
 0x2a0   : > { %v2121_v21 = vpop.f32.mrf.mxu0  ;;  %7938 = vst [vmem:[#allocation101_spill] sm:$0xff] %v6640_v16 }
 0x2a1   : > { %7935 = vst [vmem:[#allocation98_spill] sm:$0xff] %v6629_v50  ;;  %v2409_v24 = vadd.f32 %v2408_v3, %v2120_v2  ;;  %v2410_v37 = vpop.f32.mrf.mxu1  ;;  %v3268_v31 = vmul.f32 %v6492_v27, %v6629_v50 }
 0x2a2   : > { %v2124_v30 = vpop.f32.mrf.mxu0 }
 0x2a3   : > { %v6637_v14 = vmul.f32 %v6485_v33, %v2409_v24  ;;  %v2125_v60 = vadd.f32 %v2124_v30, %v6289_v26  ;;  %v2413_v57 = vpop.f32.mrf.mxu1  ;;  %3346 = vadd.xlane.f32.xlu1 %v3268_v31  ;;  %v6648_v33 = vpop.permute.xlu0 %3055 }
 0x2a4   : > { %v2126_v20 = vpop.f32.mrf.mxu0  ;;  %7940 = vst [vmem:[#allocation103_spill] sm:$0xff] %v6648_v33 }
 0x2a5   : > { %7937 = vst [vmem:[#allocation100_spill] sm:$0xff] %v6637_v14  ;;  %v2414_v53 = vadd.f32 %v2413_v57, %v2125_v60  ;;  %v2415_v40 = vpop.f32.mrf.mxu1  ;;  %v3269_v2 = vmul.f32 %v6492_v27, %v6637_v14  ;;  %v6652_v20 = vpop.permute.xlu1 %3060 }
 0x2a6   : > { %v2127_v3 = vpop.f32.mrf.mxu0  ;;  %7941 = vst [vmem:[#allocation104_spill] sm:$0xff] %v6652_v20 }
 0x2a7   : > { %v6645_v21 = vmul.f32 %v6494_v0, %v2414_v53  ;;  %v2128_v37 = vadd.f32 %v2127_v3, %v6295_v42  ;;  %v2416_v24 = vpop.f32.mrf.mxu1  ;;  %3348 = vadd.xlane.f32.xlu0 %v3269_v2 }
 0x2a8   : > { %v2129_v26 = vpop.f32.mrf.mxu0 }
 0x2a9   : > { %7939 = vst [vmem:[#allocation102_spill] sm:$0xff] %v6645_v21  ;;  %v2417_v31 = vadd.f32 %v2416_v24, %v2128_v37  ;;  %v2418_v30 = vpop.f32.mrf.mxu1  ;;  %v3270_v60 = vmul.f32 %v6492_v27, %v6645_v21  ;;  %v6660_v24 = vpop.permute.xlu0 %3065 }
 0x2aa   : > { %v2132_v57 = vpop.f32.mrf.mxu0  ;;  %7943 = vst [vmem:[#allocation106_spill] sm:$0xff] %v6660_v24 }
 0x2ab   : > { %v6655_v40 = vmul.f32 %v6502_v19, %v2417_v31  ;;  %v2133_v53 = vadd.f32 %v2132_v57, %v6300_v52  ;;  %v2421_v0 = vpop.f32.mrf.mxu1  ;;  %3350 = vadd.xlane.f32.xlu1 %v3270_v60  ;;  %v6666_v52 = vpop.permute.xlu1 %3070 }
 0x2ac   : > { %v2134_v42 = vpop.f32.mrf.mxu0  ;;  %7945 = vst [vmem:[#allocation108_spill] sm:$0xff] %v6666_v52 }
 0x2ad   : > { %7942 = vst [vmem:[#allocation105_spill] sm:$0xff] %v6655_v40  ;;  %v2422_v2 = vadd.f32 %v2421_v0, %v2133_v53  ;;  %v2423_v3 = vpop.f32.mrf.mxu1  ;;  %v3271_v37 = vmul.f32 %v6492_v27, %v6655_v40 }
 0x2ae   : > { %v2135_v26 = vpop.f32.mrf.mxu0 }
 0x2af   : > { %v6663_v30 = vmul.f32 %v6509_v12, %v2422_v2  ;;  %v2136_v48 = vadd.f32 %v2135_v26, %v6305_v5  ;;  %v2424_v31 = vpop.f32.mrf.mxu1  ;;  %3352 = vadd.xlane.f32.xlu0 %v3271_v37  ;;  %v6674_v12 = vpop.permute.xlu0 %3075 }
 0x2b0   : > { %v2137_v19 = vpop.f32.mrf.mxu0  ;;  %7947 = vst [vmem:[#allocation110_spill] sm:$0xff] %v6674_v12 }
 0x2b1   : > { %7944 = vst [vmem:[#allocation107_spill] sm:$0xff] %v6663_v30  ;;  %v2425_v60 = vadd.f32 %v2424_v31, %v2136_v48  ;;  %v2426_v57 = vpop.f32.mrf.mxu1  ;;  %v3272_v0 = vmul.f32 %v6492_v27, %v6663_v30  ;;  %v6678_v31 = vpop.permute.xlu1 %3080 }
 0x2b2   : > { %v2140_v53 = vpop.f32.mrf.mxu0  ;;  %7948 = vst [vmem:[#allocation111_spill] sm:$0xff] %v6678_v31 }
 0x2b3   : > { %v6671_v42 = vmul.f32 %v6518_v44, %v2425_v60  ;;  %v2141_v3 = vadd.f32 %v2140_v53, %v6309_v15  ;;  %v2429_v2 = vpop.f32.mrf.mxu1  ;;  %3354 = vadd.xlane.f32.xlu1 %v3272_v0 }
 0x2b4   : > { %v2142_v5 = vpop.f32.mrf.mxu0 }
 0x2b5   : > { %7946 = vst [vmem:[#allocation109_spill] sm:$0xff] %v6671_v42  ;;  %v2430_v37 = vadd.f32 %v2429_v2, %v2141_v3  ;;  %v2431_v19 = vpop.f32.mrf.mxu1  ;;  %v3273_v48 = vmul.f32 %v6492_v27, %v6671_v42  ;;  %v6686_v2 = vpop.permute.xlu0 %3085 }
 0x2b6   : > { %v2143_v26 = vpop.f32.mrf.mxu0  ;;  %7950 = vst [vmem:[#allocation113_spill] sm:$0xff] %v6686_v2 }
 0x2b7   : > { %v6681_v57 = vmul.f32 %v6522_v35, %v2430_v37  ;;  %v2144_v60 = vadd.f32 %v2143_v26, %v6315_v32  ;;  %v2432_v44 = vpop.f32.mrf.mxu1  ;;  %3356 = vadd.xlane.f32.xlu0 %v3273_v48  ;;  %v6692_v32 = vpop.permute.xlu1 %3090 }
 0x2b8   : > { %v2145_v15 = vpop.f32.mrf.mxu0  ;;  %7952 = vst [vmem:[#allocation115_spill] sm:$0xff] %v6692_v32 }
 0x2b9   : > { %7949 = vst [vmem:[#allocation112_spill] sm:$0xff] %v6681_v57  ;;  %v2433_v0 = vadd.f32 %v2432_v44, %v2144_v60  ;;  %v2434_v53 = vpop.f32.mrf.mxu1  ;;  %v3274_v3 = vmul.f32 %v6492_v27, %v6681_v57 }
 0x2ba   : > { %v2148_v5 = vpop.f32.mrf.mxu0 }
 0x2bb   : > { %v6689_v19 = vmul.f32 %v6528_v23, %v2433_v0  ;;  %v2149_v63 = vadd.f32 %v2148_v5, %v6320_v45  ;;  %v2437_v37 = vpop.f32.mrf.mxu1  ;;  %3358 = vadd.xlane.f32.xlu1 %v3274_v3  ;;  %v6700_v23 = vpop.permute.xlu0 %3095 }
 0x2bc   : > { %v2150_v35 = vpop.f32.mrf.mxu0  ;;  %7954 = vst [vmem:[#allocation117_spill] sm:$0xff] %v6700_v23 }
 0x2bd   : > { %7951 = vst [vmem:[#allocation114_spill] sm:$0xff] %v6689_v19  ;;  %v2438_v48 = vadd.f32 %v2437_v37, %v2149_v63  ;;  %v2439_v26 = vpop.f32.mrf.mxu1  ;;  %v3275_v44 = vmul.f32 %v6492_v27, %v6689_v19  ;;  %v6704_v37 = vpop.permute.xlu1 %3100 }
 0x2be   : > { %v2151_v60 = vpop.f32.mrf.mxu0  ;;  %7955 = vst [vmem:[#allocation118_spill] sm:$0xff] %v6704_v37 }
 0x2bf   : > { %v6697_v15 = vmul.f32 %v6538_v36, %v2438_v48  ;;  %v2152_v53 = vadd.f32 %v2151_v60, %v6325_v61  ;;  %v2440_v0 = vpop.f32.mrf.mxu1  ;;  %3360 = vadd.xlane.f32.xlu0 %v3275_v44 }
 0x2c0   : > { %v2153_v45 = vpop.f32.mrf.mxu0 }
 0x2c1   : > { %7953 = vst [vmem:[#allocation116_spill] sm:$0xff] %v6697_v15  ;;  %v2441_v3 = vadd.f32 %v2440_v0, %v2152_v53  ;;  %v2442_v35 = vpop.f32.mrf.mxu1  ;;  %v3276_v63 = vmul.f32 %v6492_v27, %v6697_v15  ;;  %v6712_v0 = vpop.permute.xlu0 %3105 }
 0x2c2   : > { %v2156_v5 = vpop.f32.mrf.mxu0  ;;  %7957 = vst [vmem:[#allocation120_spill] sm:$0xff] %v6712_v0 }
 0x2c3   : > { %v6707_v26 = vmul.f32 %v6546_v54, %v2441_v3  ;;  %v2157_v48 = vadd.f32 %v2156_v5, %v6329_v11  ;;  %v2445_v36 = vpop.f32.mrf.mxu1  ;;  %3362 = vadd.xlane.f32.xlu1 %v3276_v63  ;;  %v6718_v11 = vpop.permute.xlu1 %3110 }
 0x2c4   : > { %v2158_v61 = vpop.f32.mrf.mxu0  ;;  %7959 = vst [vmem:[#allocation122_spill] sm:$0xff] %v6718_v11 }
 0x2c5   : > { %7956 = vst [vmem:[#allocation119_spill] sm:$0xff] %v6707_v26  ;;  %v2446_v44 = vadd.f32 %v2445_v36, %v2157_v48  ;;  %v2447_v60 = vpop.f32.mrf.mxu1  ;;  %v3277_v53 = vmul.f32 %v6492_v27, %v6707_v26 }
 0x2c6   : > { %v2159_v45 = vpop.f32.mrf.mxu0 }
 0x2c7   : > { %v6715_v35 = vmul.f32 %v6552_v39, %v2446_v44  ;;  %v2160_v56 = vadd.f32 %v2159_v45, %v6335_v28  ;;  %v2448_v3 = vpop.f32.mrf.mxu1  ;;  %3364 = vadd.xlane.f32.xlu0 %v3277_v53  ;;  %v6726_v39 = vpop.permute.xlu0 %3115 }
 0x2c8   : > { %v2161_v54 = vpop.f32.mrf.mxu0  ;;  %7961 = vst [vmem:[#allocation124_spill] sm:$0xff] %v6726_v39 }
 0x2c9   : > { %7958 = vst [vmem:[#allocation121_spill] sm:$0xff] %v6715_v35  ;;  %v2449_v63 = vadd.f32 %v2448_v3, %v2160_v56  ;;  %v2450_v5 = vpop.f32.mrf.mxu1  ;;  %v3278_v36 = vmul.f32 %v6492_v27, %v6715_v35  ;;  %v6730_v3 = vpop.permute.xlu1 %3120 }
 0x2ca   : > { %v2164_v48 = vpop.f32.mrf.mxu0  ;;  %7962 = vst [vmem:[#allocation125_spill] sm:$0xff] %v6730_v3 }
 0x2cb   : > { %v6723_v61 = vmul.f32 %v6558_v4, %v2449_v63  ;;  %v2165_v60 = vadd.f32 %v2164_v48, %v6340_v43  ;;  %v2453_v44 = vpop.f32.mrf.mxu1  ;;  %3366 = vadd.xlane.f32.xlu1 %v3278_v36 }
 0x2cc   : > { %v2166_v28 = vpop.f32.mrf.mxu0 }
 0x2cd   : > { %7960 = vst [vmem:[#allocation123_spill] sm:$0xff] %v6723_v61  ;;  %v2454_v53 = vadd.f32 %v2453_v44, %v2165_v60  ;;  %v2455_v54 = vpop.f32.mrf.mxu1  ;;  %v3279_v56 = vmul.f32 %v6492_v27, %v6723_v61  ;;  %v6738_v44 = vpop.permute.xlu0 %3125 }
 0x2ce   : > { %v2167_v45 = vpop.f32.mrf.mxu0  ;;  %7964 = vst [vmem:[#allocation127_spill] sm:$0xff] %v6738_v44 }
 0x2cf   : > { %v6733_v5 = vmul.f32 %v6566_v47, %v2454_v53  ;;  %v2168_v63 = vadd.f32 %v2167_v45, %v6344_v58  ;;  %v2456_v4 = vpop.f32.mrf.mxu1  ;;  %3368 = vadd.xlane.f32.xlu0 %v3279_v56  ;;  %v6744_v58 = vpop.permute.xlu1 %3130 }
 0x2d0   : > { %v2169_v43 = vpop.f32.mrf.mxu0  ;;  %7966 = vst [vmem:[#allocation129_spill] sm:$0xff] %v6744_v58 }
 0x2d1   : > { %7963 = vst [vmem:[#allocation126_spill] sm:$0xff] %v6733_v5  ;;  %v2457_v36 = vadd.f32 %v2456_v4, %v2168_v63  ;;  %v2458_v48 = vpop.f32.mrf.mxu1  ;;  %v3280_v60 = vmul.f32 %v6492_v27, %v6733_v5 }
 0x2d2   : > { %v2172_v28 = vpop.f32.mrf.mxu0  ;;  %v7968_v48 = vld [vmem:[#allocation13_spill] sm:$0xff] }
 0x2d3   : > { %v6741_v54 = vmul.f32 %v6575_v59, %v2457_v36  ;;  %v2173_v8 = vadd.f32 %v2172_v28, %v6346_v6  ;;  %v2461_v53 = vpop.f32.mrf.mxu1  ;;  %3370 = vadd.xlane.f32.xlu1 %v3280_v60  ;;  %v6752_v59 = vpop.permute.xlu0 %3135 }
 0x2d4   : > { %v2174_v47 = vpop.f32.mrf.mxu0  ;;  %7969 = vst [vmem:[#allocation13_spill] sm:$0xff] %v6752_v59 }
 0x2d5   : > { %7965 = vst [vmem:[#allocation128_spill] sm:$0xff] %v6741_v54  ;;  %v2462_v56 = vadd.f32 %v2461_v53, %v2173_v8  ;;  %v2463_v45 = vpop.f32.mrf.mxu1  ;;  %v3281_v4 = vmul.f32 %v6492_v27, %v6741_v54  ;;  %v6756_v53 = vpop.permute.xlu1 %3140 }
 0x2d6   : > { %v2175_v63 = vpop.f32.mrf.mxu0  ;;  %7970 = vst [vmem:[#allocation131_spill] sm:$0xff] %v6756_v53 }
 0x2d7   : > { %v6749_v43 = vmul.f32 %v6580_v13, %v2462_v56  ;;  %v2176_v25 = vadd.f32 %v2175_v63, %v7968_v48  ;;  %v2464_v36 = vpop.f32.mrf.mxu1  ;;  %3372 = vadd.xlane.f32.xlu0 %v3281_v4  ;;  %v7972_v56 = vld [vmem:[#allocation14_spill] sm:$0xff] }
 0x2d8   : > { %v2177_v6 = vpop.f32.mrf.mxu0 }
 0x2d9   : > { %7967 = vst [vmem:[#allocation130_spill] sm:$0xff] %v6749_v43  ;;  %v2465_v60 = vadd.f32 %v2464_v36, %v2176_v25  ;;  %v2466_v47 = vpop.f32.mrf.mxu1  ;;  %v3282_v8 = vmul.f32 %v6492_v27, %v6749_v43  ;;  %v6764_v36 = vpop.permute.xlu0 %3145  ;;  %v7975_v43 = vld [vmem:[#allocation15_spill] sm:$0xff] }
 0x2da   : > { %v2180_v28 = vpop.f32.mrf.mxu0  ;;  %7973 = vst [vmem:[#allocation14_spill] sm:$0xff] %v6764_v36 }
 0x2db   : > { %v6759_v45 = vmul.f32 %v6588_v49, %v2465_v60  ;;  %v2181_v13 = vadd.f32 %v2180_v28, %v7972_v56  ;;  %v2469_v54 = vpop.f32.mrf.mxu1  ;;  %3374 = vadd.xlane.f32.xlu1 %v3282_v8  ;;  %v6770_v28 = vpop.permute.xlu1 %3150 }
 0x2dc   : > { %v2182_v63 = vpop.f32.mrf.mxu0  ;;  %7976 = vst [vmem:[#allocation15_spill] sm:$0xff] %v6770_v28 }
 0x2dd   : > { %7971 = vst [vmem:[#allocation132_spill] sm:$0xff] %v6759_v45  ;;  %v2470_v4 = vadd.f32 %v2469_v54, %v2181_v13  ;;  %v2471_v48 = vpop.f32.mrf.mxu1  ;;  %v3283_v25 = vmul.f32 %v6492_v27, %v6759_v45 }
 0x2de   : > { %v2183_v6 = vpop.f32.mrf.mxu0  ;;  %v7978_v48 = vld [vmem:[#allocation16_spill] sm:$0xff] }
 0x2df   : > { %v6767_v47 = vmul.f32 %v6596_v46, %v2470_v4  ;;  %v2184_v5 = vadd.f32 %v2183_v6, %v7975_v43  ;;  %v2472_v60 = vpop.f32.mrf.mxu1  ;;  %3376 = vadd.xlane.f32.xlu0 %v3283_v25  ;;  %v6778_v46 = vpop.permute.xlu0 %3155 }
 0x2e0   : > { %v2185_v49 = vpop.f32.mrf.mxu0  ;;  %7979 = vst [vmem:[#allocation16_spill] sm:$0xff] %v6778_v46 }
 0x2e1   : > { %7974 = vst [vmem:[#allocation133_spill] sm:$0xff] %v6767_v47  ;;  %v2473_v8 = vadd.f32 %v2472_v60, %v2184_v5  ;;  %v2474_v56 = vpop.f32.mrf.mxu1  ;;  %v3284_v13 = vmul.f32 %v6492_v27, %v6767_v47  ;;  %v6782_v60 = vpop.permute.xlu1 %3160 }
 0x2e2   : > { %v2188_v54 = vpop.f32.mrf.mxu0  ;;  %7980 = vst [vmem:[#allocation135_spill] sm:$0xff] %v6782_v60 }
 0x2e3   : > { %v6775_v63 = vmul.f32 %v6600_v22, %v2473_v8  ;;  %v2189_v45 = vadd.f32 %v2188_v54, %v7978_v48  ;;  %v2477_v4 = vpop.f32.mrf.mxu1  ;;  %3378 = vadd.xlane.f32.xlu1 %v3284_v13  ;;  %v7982_v8 = vld [vmem:[#allocation17_spill] sm:$0xff] }
 0x2e4   : > { %v2190_v43 = vpop.f32.mrf.mxu0 }
 0x2e5   : > { %7977 = vst [vmem:[#allocation134_spill] sm:$0xff] %v6775_v63  ;;  %v2478_v25 = vadd.f32 %v2477_v4, %v2189_v45  ;;  %v2479_v49 = vpop.f32.mrf.mxu1  ;;  %v3285_v5 = vmul.f32 %v6492_v27, %v6775_v63  ;;  %v6790_v4 = vpop.permute.xlu0 %3165  ;;  %v7985_v63 = vld [vmem:[#allocation18_spill] sm:$0xff] }
 0x2e6   : > { %v2191_v6 = vpop.f32.mrf.mxu0  ;;  %7983 = vst [vmem:[#allocation17_spill] sm:$0xff] %v6790_v4 }
 0x2e7   : > { %v6785_v56 = vmul.f32 %v6608_v62, %v2478_v25  ;;  %v2192_v22 = vadd.f32 %v2191_v6, %v7982_v8  ;;  %v2480_v47 = vpop.f32.mrf.mxu1  ;;  %3380 = vadd.xlane.f32.xlu0 %v3285_v5  ;;  %v6796_v6 = vpop.permute.xlu1 %3170 }
 0x2e8   : > { %v2193_v54 = vpop.f32.mrf.mxu0  ;;  %7986 = vst [vmem:[#allocation18_spill] sm:$0xff] %v6796_v6 }
 0x2e9   : > { %7981 = vst [vmem:[#allocation136_spill] sm:$0xff] %v6785_v56  ;;  %v2481_v13 = vadd.f32 %v2480_v47, %v2192_v22  ;;  %v2482_v48 = vpop.f32.mrf.mxu1  ;;  %v3286_v45 = vmul.f32 %v6492_v27, %v6785_v56 }
 0x2ea   : > { %v2196_v43 = vpop.f32.mrf.mxu0  ;;  %v7988_v48 = vld [vmem:[#allocation19_spill] sm:$0xff] }
 0x2eb   : > { %v6793_v49 = vmul.f32 %v6614_v34, %v2481_v13  ;;  %v2197_v61 = vadd.f32 %v2196_v43, %v7985_v63  ;;  %v2485_v25 = vpop.f32.mrf.mxu1  ;;  %3382 = vadd.xlane.f32.xlu1 %v3286_v45  ;;  %v6804_v34 = vpop.permute.xlu0 %3175 }
 0x2ec   : > { %v2198_v62 = vpop.f32.mrf.mxu0  ;;  %7989 = vst [vmem:[#allocation19_spill] sm:$0xff] %v6804_v34 }
 0x2ed   : > { %7984 = vst [vmem:[#allocation137_spill] sm:$0xff] %v6793_v49  ;;  %v2486_v5 = vadd.f32 %v2485_v25, %v2197_v61  ;;  %v2487_v8 = vpop.f32.mrf.mxu1  ;;  %v3287_v22 = vmul.f32 %v6492_v27, %v6793_v49  ;;  %v6808_v25 = vpop.permute.xlu1 %3180 }
 0x2ee   : > { %v2199_v47 = vpop.f32.mrf.mxu0  ;;  %7990 = vst [vmem:[#allocation139_spill] sm:$0xff] %v6808_v25 }
 0x2ef   : > { %v6801_v54 = vmul.f32 %v6622_v55, %v2486_v5  ;;  %v2200_v56 = vadd.f32 %v2199_v47, %v7988_v48  ;;  %v2488_v13 = vpop.f32.mrf.mxu1  ;;  %3384 = vadd.xlane.f32.xlu0 %v3287_v22  ;;  %v7992_v5 = vld [vmem:[#allocation20_spill] sm:$0xff] }
 0x2f0   : > { %v2201_v63 = vpop.f32.mrf.mxu0 }
 0x2f1   : > { %7987 = vst [vmem:[#allocation138_spill] sm:$0xff] %v6801_v54  ;;  %v2489_v45 = vadd.f32 %v2488_v13, %v2200_v56  ;;  %v2490_v62 = vpop.f32.mrf.mxu1  ;;  %v3288_v61 = vmul.f32 %v6492_v27, %v6801_v54  ;;  %v7994_v54 = vld [vmem:[#allocation21_spill] sm:$0xff] }
 0x2f2   : > { %v2204_v43 = vpop.f32.mrf.mxu0 }
 0x2f3   : > { %v6811_v8 = vmul.f32 %v6626_v7, %v2489_v45  ;;  %v2205_v55 = vadd.f32 %v2204_v43, %v7992_v5  ;;  %v2493_v49 = vpop.f32.mrf.mxu1  ;;  %3386 = vadd.xlane.f32.xlu1 %v3288_v61 }
 0x2f4   : > { %v2206_v47 = vpop.f32.mrf.mxu0  ;;  %v3319_v22 = vpop.xlane.xlu0 %3318 }
 0x2f5   : > { %7991 = vst [vmem:[#allocation140_spill] sm:$0xff] %v6811_v8  ;;  %v2494_v48 = vadd.f32 %v2493_v49, %v2205_v55  ;;  %v2495_v35 = vpop.f32.mrf.mxu1  ;;  %v4747_v63 = vmul.f32 -1.442695, %v3319_v22  ;;  %v3289_v56 = vmul.f32 %v6492_v27, %v6811_v8  ;;  %v7996_v22 = vld [vmem:[#allocation22_spill] sm:$0xff] }
 0x2f6   : > { %v2207_v13 = vpop.f32.mrf.mxu0 }
 0x2f7   : > { %v6817_v62 = vmul.f32 %v6634_v29, %v2494_v48  ;;  %5291 = vpow2.f32 %v4747_v63  ;;  %v2208_v45 = vadd.f32 %v2207_v13, %v7994_v54  ;;  %v2496_v7 = vpop.f32.mrf.mxu1  ;;  %3388 = vadd.xlane.f32.xlu0 %v3289_v56 }
 0x2f8   : > { %v2209_v43 = vpop.f32.mrf.mxu0  ;;  %v3321_v5 = vpop.xlane.xlu1 %3320 }
 0x2f9   : > { %7993 = vst [vmem:[#allocation20_spill] sm:$0xff] %v6817_v62  ;;  %v2497_v61 = vadd.f32 %v2496_v7, %v2208_v45  ;;  %v2498_v47 = vpop.f32.mrf.mxu1  ;;  %v4748_v26 = vmul.f32 -1.442695, %v3321_v5  ;;  %v3290_v55 = vmul.f32 %v6492_v27, %v6817_v62 }
 0x2fa   : > { %v2212_v35 = vpop.f32.mrf.mxu0 }
 0x2fb   : > { %v6823_v49 = vmul.f32 %v6640_v16, %v2497_v61  ;;  %5293 = vpow2.f32 %v4748_v26  ;;  %v2213_v48 = vadd.f32 %v2212_v35, %v7996_v22  ;;  %v2501_v63 = vpop.f32.mrf.mxu1  ;;  %3390 = vadd.xlane.f32.xlu1 %v3290_v55  ;;  %v7998_v61 = vld [vmem:[#allocation23_spill] sm:$0xff] }
 0x2fc   : > { %v2214_v54 = vpop.f32.mrf.mxu0  ;;  %v3323_v13 = vpop.xlane.xlu0 %3322 }
 0x2fd   : > { %7995 = vst [vmem:[#allocation21_spill] sm:$0xff] %v6823_v49  ;;  %v2502_v56 = vadd.f32 %v2501_v63, %v2213_v48  ;;  %v2503_v43 = vpop.f32.mrf.mxu1  ;;  %v4749_v29 = vmul.f32 -1.442695, %v3323_v13  ;;  %v3291_v7 = vmul.f32 %v6492_v27, %v6823_v49 }
 0x2fe   : > { %v2215_v45 = vpop.f32.mrf.mxu0 }
 0x2ff   : > { %v6829_v5 = vmul.f32 %v6648_v33, %v2502_v56  ;;  %5295 = vpow2.f32 %v4749_v29  ;;  %v2216_v47 = vadd.f32 %v2215_v45, %v7998_v61  ;;  %v2504_v26 = vpop.f32.mrf.mxu1  ;;  %3392 = vadd.xlane.f32.xlu0 %v3291_v7  ;;  %v8000_v56 = vld [vmem:[#allocation24_spill] sm:$0xff] }
 0x300   : > { %v2217_v35 = vpop.f32.mrf.mxu0  ;;  %v3325_v22 = vpop.xlane.xlu0 %3324 }
 0x301   : > { %7997 = vst [vmem:[#allocation22_spill] sm:$0xff] %v6829_v5  ;;  %v2505_v55 = vadd.f32 %v2504_v26, %v2216_v47  ;;  %v2506_v54 = vpop.f32.mrf.mxu1  ;;  %v4750_v16 = vmul.f32 -1.442695, %v3325_v22  ;;  %v3292_v48 = vmul.f32 %v6492_v27, %v6829_v5 }
 0x302   : > { %v2220_v63 = vpop.f32.mrf.mxu0 }
 0x303   : > { %v6835_v13 = vmul.f32 %v6652_v20, %v2505_v55  ;;  %5297 = vpow2.f32 %v4750_v16  ;;  %v2221_v43 = vadd.f32 %v2220_v63, %v8000_v56  ;;  %v2509_v29 = vpop.f32.mrf.mxu1  ;;  %3394 = vadd.xlane.f32.xlu1 %v3292_v48  ;;  %v8002_v16 = vld [vmem:[#allocation25_spill] sm:$0xff] }
 0x304   : > { %v5292_v45 = vpop.eup %5291  ;;  %v2222_v61 = vpop.f32.mrf.mxu0 }
 0x305   : > { %7999 = vst [vmem:[#allocation23_spill] sm:$0xff] %v6835_v13  ;;  %v3327_v7 = vpop.xlane.xlu1 %3326  ;;  %v3638_v35 = vadd.f32 1.0, %v5292_v45  ;;  %v2510_v33 = vadd.f32 %v2509_v29, %v2221_v43  ;;  %v2511_v47 = vpop.f32.mrf.mxu1  ;;  %v3293_v22 = vmul.f32 %v6492_v27, %v6835_v13 }
 0x306   : > { %v4751_v26 = vmul.f32 -1.442695, %v3327_v7  ;;  %v2223_v54 = vpop.f32.mrf.mxu0 }
 0x307   : > { %5299 = vrcp.f32 %v3638_v35  ;;  %v6841_v55 = vmul.f32 %v6660_v24, %v2510_v33  ;;  %v2224_v20 = vadd.f32 %v2223_v54, %v8002_v16  ;;  %v2512_v63 = vpop.f32.mrf.mxu1  ;;  %3396 = vadd.xlane.f32.xlu0 %v3293_v22  ;;  %v8004_v35 = vld [vmem:[#allocation26_spill] sm:$0xff] }
 0x308   : > { %v5294_v48 = vpop.eup %5293  ;;  %5301 = vpow2.f32 %v4751_v26  ;;  %v2225_v56 = vpop.f32.mrf.mxu0 }
 0x309   : > { %8001 = vst [vmem:[#allocation24_spill] sm:$0xff] %v6841_v55  ;;  %v3329_v61 = vpop.xlane.xlu0 %3328  ;;  %v3639_v45 = vadd.f32 1.0, %v5294_v48  ;;  %v2513_v43 = vadd.f32 %v2512_v63, %v2224_v20  ;;  %v2514_v29 = vpop.f32.mrf.mxu1  ;;  %v3294_v47 = vmul.f32 %v6492_v27, %v6841_v55  ;;  %v6853_v27 = vld [vmem:[%s7716_s3] ss:$0 sm:$0xff] }
 0x30a   : > { %v4752_v7 = vmul.f32 -1.442695, %v3329_v61  ;;  %v2228_v13 = vpop.f32.mrf.mxu0  ;;  %v8006_v29 = vld [vmem:[#allocation27_spill] sm:$0xff] }
 0x30b   : > { %5303 = vrcp.f32 %v3639_v45  ;;  %v6847_v33 = vmul.f32 %v6666_v52, %v2513_v43  ;;  %v2229_v54 = vadd.f32 %v2228_v13, %v8004_v35  ;;  %v2517_v16 = vpop.f32.mrf.mxu1  ;;  %3398 = vadd.xlane.f32.xlu1 %v3294_v47 }
 0x30c   : > { %v5296_v22 = vpop.eup %5295  ;;  %5305 = vpow2.f32 %v4752_v7  ;;  %v2230_v26 = vpop.f32.mrf.mxu0 }
 0x30d   : > { %8003 = vst [vmem:[#allocation25_spill] sm:$0xff] %v6847_v33  ;;  %v3331_v56 = vpop.xlane.xlu1 %3330  ;;  %v3640_v48 = vadd.f32 1.0, %v5296_v22  ;;  %v2518_v20 = vadd.f32 %v2517_v16, %v2229_v54  ;;  %v2519_v63 = vpop.f32.mrf.mxu1  ;;  %v3295_v45 = vmul.f32 %v6853_v27, %v6847_v33 }
 0x30e   : > { %v4753_v61 = vmul.f32 -1.442695, %v3331_v56  ;;  %v2231_v43 = vpop.f32.mrf.mxu0 }
 0x30f   : > { %5307 = vrcp.f32 %v3640_v48  ;;  %v6858_v13 = vmul.f32 %v6674_v12, %v2518_v20  ;;  %v2232_v7 = vadd.f32 %v2231_v43, %v8006_v29  ;;  %v2520_v47 = vpop.f32.mrf.mxu1  ;;  %3400 = vadd.xlane.f32.xlu0 %v3295_v45  ;;  %v8008_v20 = vld [vmem:[#allocation28_spill] sm:$0xff] }
 0x310   : > { %v5298_v35 = vpop.eup %5297  ;;  %5309 = vpow2.f32 %v4753_v61  ;;  %v2233_v54 = vpop.f32.mrf.mxu0 }
 0x311   : > { %8005 = vst [vmem:[#allocation26_spill] sm:$0xff] %v6858_v13  ;;  %v3333_v16 = vpop.xlane.xlu0 %3332  ;;  %v3641_v22 = vadd.f32 1.0, %v5298_v35  ;;  %v2521_v26 = vadd.f32 %v2520_v47, %v2232_v7  ;;  %v2522_v56 = vpop.f32.mrf.mxu1  ;;  %v3296_v52 = vmul.f32 %v6853_v27, %v6858_v13  ;;  %v8009_v7 = vld [vmem:[#allocation65_spill] sm:$0xff] }
 0x312   : > { %v4754_v63 = vmul.f32 -1.442695, %v3333_v16  ;;  %v2236_v24 = vpop.f32.mrf.mxu0 }
 0x313   : > { %5311 = vrcp.f32 %v3641_v22  ;;  %v6864_v48 = vmul.f32 %v6678_v31, %v2521_v26  ;;  %v2237_v43 = vadd.f32 %v2236_v24, %v8008_v20  ;;  %v2525_v29 = vpop.f32.mrf.mxu1  ;;  %3402 = vadd.xlane.f32.xlu1 %v3296_v52  ;;  %v8012_v52 = vld [vmem:[#allocation29_spill] sm:$0xff] }
 0x314   : > { %v5300_v45 = vpop.eup %5299  ;;  %5313 = vpow2.f32 %v4754_v63  ;;  %v2238_v61 = vpop.f32.mrf.mxu0 }
 0x315   : > { %8007 = vst [vmem:[#allocation27_spill] sm:$0xff] %v6864_v48  ;;  %v3335_v54 = vpop.xlane.xlu1 %3334  ;;  %v5302_v35 = vpop.eup %5301  ;;  %v6868_v47 = vmul.f32 %v5300_v45, %v8009_v7  ;;  %v2526_v16 = vadd.f32 %v2525_v29, %v2237_v43  ;;  %v3297_v22 = vmul.f32 %v6853_v27, %v6864_v48  ;;  %v8013_v29 = vld [vmem:[#allocation67_spill] sm:$0xff] }
 0x316   : > { %v2527_v56 = vpop.f32.mrf.mxu1  ;;  %v4755_v12 = vmul.f32 -1.442695, %v3335_v54  ;;  %v3642_v26 = vadd.f32 1.0, %v5302_v35  ;;  %v2239_v31 = vpop.f32.mrf.mxu0 }
 0x317   : > { %8010 = vst [vmem:[#allocation28_spill] sm:$0xff] %v6868_v47  ;;  %v6873_v24 = vmul.f32 %v6686_v2, %v2526_v16  ;;  %v2240_v63 = vadd.f32 %v2239_v31, %v8012_v52  ;;  %3404 = vadd.xlane.f32.xlu0 %v3297_v22  ;;  %v8016_v22 = vld [vmem:[#allocation30_spill] sm:$0xff] }
 0x318   : > { %5315 = vpow2.f32 %v4755_v12  ;;  %v2528_v20 = vpop.f32.mrf.mxu1  ;;  %v5304_v61 = vpop.eup %5303 }
 0x319   : > { %8011 = vst [vmem:[#allocation141_spill] sm:$0xff] %v6873_v24  ;;  %5317 = vrcp.f32 %v3642_v26  ;;  %v2241_v45 = vpop.f32.mrf.mxu0  ;;  %v3337_v7 = vpop.xlane.xlu0 %3336  ;;  %v6877_v54 = vmul.f32 %v5304_v61, %v8013_v29  ;;  %v2529_v56 = vadd.f32 %v2528_v20, %v2240_v63  ;;  %v3298_v16 = vmul.f32 %v6853_v27, %v6873_v24 }
 0x31a   : > { %v5306_v43 = vpop.eup %5305  ;;  %v2530_v47 = vpop.f32.mrf.mxu1  ;;  %v4756_v35 = vmul.f32 -1.442695, %v3337_v7 }
 0x31b   : > { %8014 = vst [vmem:[#allocation29_spill] sm:$0xff] %v6877_v54  ;;  %v3643_v2 = vadd.f32 1.0, %v5306_v43  ;;  %v2244_v12 = vpop.f32.mrf.mxu0  ;;  %v6882_v31 = vmul.f32 %v6692_v32, %v2529_v56  ;;  %3406 = vadd.xlane.f32.xlu1 %v3298_v16  ;;  %v8019_v16 = vld [vmem:[#allocation31_spill] sm:$0xff] }
 0x31c   : > { %5319 = vpow2.f32 %v4756_v35  ;;  %v2245_v26 = vadd.f32 %v2244_v12, %v8016_v22  ;;  %v2533_v52 = vpop.f32.mrf.mxu1  ;;  %v5308_v45 = vpop.eup %5307 }
 0x31d   : > { %8015 = vst [vmem:[#allocation142_spill] sm:$0xff] %v6882_v31  ;;  %5321 = vrcp.f32 %v3643_v2  ;;  %v2246_v61 = vpop.f32.mrf.mxu0  ;;  %v3339_v29 = vpop.xlane.xlu1 %3338  ;;  %v6886_v47 = vmul.f32 %v5308_v45, %v6515_v1  ;;  %v3299_v56 = vmul.f32 %v6853_v27, %v6882_v31 }
 0x31e   : > { %v5310_v63 = vpop.eup %5309  ;;  %v2534_v20 = vadd.f32 %v2533_v52, %v2245_v26  ;;  %v2535_v7 = vpop.f32.mrf.mxu1  ;;  %v4757_v43 = vmul.f32 -1.442695, %v3339_v29 }
 0x31f   : > { %8017 = vst [vmem:[#allocation30_spill] sm:$0xff] %v6886_v47  ;;  %v3644_v32 = vadd.f32 1.0, %v5310_v63  ;;  %v2247_v35 = vpop.f32.mrf.mxu0  ;;  %3408 = vadd.xlane.f32.xlu0 %v3299_v56  ;;  %v8022_v56 = vld [vmem:[#allocation32_spill] sm:$0xff]  ;;  %v8023_v47 = vld [vmem:[#allocation74_spill] sm:$0xff] }
 0x320   : > { %v6891_v12 = vmul.f32 %v6700_v23, %v2534_v20  ;;  %5323 = vpow2.f32 %v4757_v43  ;;  %v2248_v2 = vadd.f32 %v2247_v35, %v8019_v16  ;;  %v2536_v22 = vpop.f32.mrf.mxu1  ;;  %v5312_v61 = vpop.eup %5311 }
 0x321   : > { %5325 = vrcp.f32 %v3644_v32  ;;  %v2249_v45 = vpop.f32.mrf.mxu0  ;;  %v3341_v1 = vpop.xlane.xlu0 %3340  ;;  %v6895_v52 = vmul.f32 %v5312_v61, %v6525_v10 }
 0x322   : > { %8018 = vst [vmem:[#allocation143_spill] sm:$0xff] %v6891_v12  ;;  %v5314_v26 = vpop.eup %5313  ;;  %v2537_v29 = vadd.f32 %v2536_v22, %v2248_v2  ;;  %v2538_v7 = vpop.f32.mrf.mxu1  ;;  %v4758_v63 = vmul.f32 -1.442695, %v3341_v1  ;;  %v3300_v20 = vmul.f32 %v6853_v27, %v6891_v12 }
 0x323   : > { %8020 = vst [vmem:[#allocation31_spill] sm:$0xff] %v6895_v52  ;;  %v3645_v23 = vadd.f32 1.0, %v5314_v26  ;;  %v2252_v43 = vpop.f32.mrf.mxu0 }
 0x324   : > { %v6900_v35 = vmul.f32 %v6704_v37, %v2537_v29  ;;  %5327 = vpow2.f32 %v4758_v63  ;;  %v2253_v32 = vadd.f32 %v2252_v43, %v8022_v56  ;;  %v2541_v16 = vpop.f32.mrf.mxu1  ;;  %3410 = vadd.xlane.f32.xlu1 %v3300_v20  ;;  %v3343_v10 = vpop.xlane.xlu1 %3342  ;;  %v8026_v20 = vld [vmem:[#allocation33_spill] sm:$0xff] }
 0x325   : > { %v5316_v45 = vpop.eup %5315  ;;  %5329 = vrcp.f32 %v3645_v23  ;;  %v2254_v61 = vpop.f32.mrf.mxu0  ;;  %v4759_v52 = vmul.f32 -1.442695, %v3343_v10 }
 0x326   : > { %8021 = vst [vmem:[#allocation144_spill] sm:$0xff] %v6900_v35  ;;  %v5318_v2 = vpop.eup %5317  ;;  %v3646_v22 = vadd.f32 1.0, %v5316_v45  ;;  %v2542_v1 = vadd.f32 %v2541_v16, %v2253_v32  ;;  %v2543_v7 = vpop.f32.mrf.mxu1  ;;  %v3301_v26 = vmul.f32 %v6853_v27, %v6900_v35 }
 0x327   : > { %v6906_v29 = vmul.f32 %v5318_v2, %v8023_v47  ;;  %v2255_v63 = vpop.f32.mrf.mxu0  ;;  %v8027_v2 = vld [vmem:[#allocation76_spill] sm:$0xff] }
 0x328   : > { %5331 = vrcp.f32 %v3646_v22  ;;  %v6909_v43 = vmul.f32 %v6712_v0, %v2542_v1  ;;  %v2256_v23 = vadd.f32 %v2255_v63, %v8026_v20  ;;  %v2544_v56 = vpop.f32.mrf.mxu1  ;;  %3412 = vadd.xlane.f32.xlu0 %v3301_v26  ;;  %v3345_v16 = vpop.xlane.xlu0 %3344  ;;  %v8029_v26 = vld [vmem:[#allocation34_spill] sm:$0xff] }
 0x329   : > { %8024 = vst [vmem:[#allocation32_spill] sm:$0xff] %v6906_v29  ;;  %v5320_v61 = vpop.eup %5319  ;;  %5333 = vpow2.f32 %v4759_v52  ;;  %v2257_v32 = vpop.f32.mrf.mxu0  ;;  %v4760_v54 = vmul.f32 -1.442695, %v3345_v16 }
 0x32a   : > { %8025 = vst [vmem:[#allocation145_spill] sm:$0xff] %v6909_v43  ;;  %v5322_v10 = vpop.eup %5321  ;;  %v3647_v45 = vadd.f32 1.0, %v5320_v61  ;;  %v2545_v7 = vadd.f32 %v2544_v56, %v2256_v23  ;;  %v2546_v37 = vpop.f32.mrf.mxu1  ;;  %v3302_v47 = vmul.f32 %v6853_v27, %v6909_v43 }
 0x32b   : > { %v6915_v22 = vmul.f32 %v5322_v10, %v8027_v2  ;;  %v2260_v1 = vpop.f32.mrf.mxu0 }
 0x32c   : > { %5335 = vrcp.f32 %v3647_v45  ;;  %v6918_v63 = vmul.f32 %v6718_v11, %v2545_v7  ;;  %v2261_v52 = vadd.f32 %v2260_v1, %v8029_v26  ;;  %v2549_v20 = vpop.f32.mrf.mxu1  ;;  %3414 = vadd.xlane.f32.xlu1 %v3302_v47  ;;  %v3347_v37 = vpop.xlane.xlu1 %3346  ;;  %v8031_v47 = vld [vmem:[#allocation35_spill] sm:$0xff] }
 0x32d   : > { %v5324_v32 = vpop.eup %5323  ;;  %5337 = vpow2.f32 %v4760_v54  ;;  %v2262_v23 = vpop.f32.mrf.mxu0  ;;  %v4761_v29 = vmul.f32 -1.442695, %v3347_v37 }
 0x32e   : > { %8028 = vst [vmem:[#allocation33_spill] sm:$0xff] %v6918_v63  ;;  %v5326_v56 = vpop.eup %5325  ;;  %v3648_v61 = vadd.f32 1.0, %v5324_v32  ;;  %v2550_v16 = vadd.f32 %v2549_v20, %v2261_v52  ;;  %v2551_v0 = vpop.f32.mrf.mxu1  ;;  %v3303_v10 = vmul.f32 %v6853_v27, %v6918_v63 }
 0x32f   : > { %v6924_v45 = vmul.f32 %v5326_v56, %v6555_v38  ;;  %v2263_v7 = vpop.f32.mrf.mxu0 }
 0x330   : > { %5339 = vrcp.f32 %v3648_v61  ;;  %v6927_v2 = vmul.f32 %v6726_v39, %v2550_v16  ;;  %v2264_v54 = vadd.f32 %v2263_v7, %v8031_v47  ;;  %v2552_v1 = vpop.f32.mrf.mxu1  ;;  %3416 = vadd.xlane.f32.xlu0 %v3303_v10  ;;  %v3349_v0 = vpop.xlane.xlu0 %3348  ;;  %v8033_v10 = vld [vmem:[#allocation36_spill] sm:$0xff] }
 0x331   : > { %v5328_v26 = vpop.eup %5327  ;;  %5341 = vpow2.f32 %v4761_v29  ;;  %v2265_v52 = vpop.f32.mrf.mxu0  ;;  %v4762_v11 = vmul.f32 -1.442695, %v3349_v0  ;;  %v8034_v0 = vld [vmem:[#allocation83_spill] sm:$0xff] }
 0x332   : > { %8030 = vst [vmem:[#allocation34_spill] sm:$0xff] %v6927_v2  ;;  %v5330_v20 = vpop.eup %5329  ;;  %v3649_v32 = vadd.f32 1.0, %v5328_v26  ;;  %v2553_v23 = vadd.f32 %v2552_v1, %v2264_v54  ;;  %v2554_v37 = vpop.f32.mrf.mxu1  ;;  %v3304_v56 = vmul.f32 %v6853_v27, %v6927_v2 }
 0x333   : > { %v6933_v61 = vmul.f32 %v5330_v20, %v6563_v17  ;;  %v2268_v16 = vpop.f32.mrf.mxu0 }
 0x334   : > { %5343 = vrcp.f32 %v3649_v32  ;;  %v6936_v7 = vmul.f32 %v6730_v3, %v2553_v23  ;;  %v2269_v29 = vadd.f32 %v2268_v16, %v8033_v10  ;;  %v2557_v47 = vpop.f32.mrf.mxu1  ;;  %3418 = vadd.xlane.f32.xlu1 %v3304_v56  ;;  %v3351_v1 = vpop.xlane.xlu1 %3350  ;;  %v8036_v56 = vld [vmem:[#allocation38_spill] sm:$0xff] }
 0x335   : > { %v5332_v52 = vpop.eup %5331  ;;  %5345 = vpow2.f32 %v4762_v11  ;;  %v2270_v54 = vpop.f32.mrf.mxu0  ;;  %v4763_v17 = vmul.f32 -1.442695, %v3351_v1 }
 0x336   : > { %8032 = vst [vmem:[#allocation35_spill] sm:$0xff] %v6936_v7  ;;  %v5334_v26 = vpop.eup %5333  ;;  %v6940_v37 = vmul.f32 %v5332_v52, %v8034_v0  ;;  %v2558_v39 = vadd.f32 %v2557_v47, %v2269_v29  ;;  %v2559_v20 = vpop.f32.mrf.mxu1  ;;  %v3305_v32 = vmul.f32 %v6853_v27, %v6936_v7  ;;  %v8037_v47 = vld [vmem:[#allocation86_spill] sm:$0xff] }
 0x337   : > { %v3650_v23 = vadd.f32 1.0, %v5334_v26  ;;  %v2271_v3 = vpop.f32.mrf.mxu0  ;;  %5347 = vpow2.f32 %v4763_v17 }
 0x338   : > { %v6945_v16 = vmul.f32 %v6738_v44, %v2558_v39  ;;  %v2272_v11 = vadd.f32 %v2271_v3, %v8036_v56  ;;  %v2560_v10 = vpop.f32.mrf.mxu1  ;;  %3420 = vadd.xlane.f32.xlu0 %v3305_v32  ;;  %v3353_v0 = vpop.xlane.xlu0 %3352  ;;  %v8039_v32 = vld [vmem:[#allocation40_spill] sm:$0xff] }
 0x339   : > { %v5336_v54 = vpop.eup %5335  ;;  %5349 = vrcp.f32 %v3650_v23  ;;  %v2273_v52 = vpop.f32.mrf.mxu0  ;;  %v4764_v26 = vmul.f32 -1.442695, %v3353_v0 }
 0x33a   : > { %8035 = vst [vmem:[#allocation36_spill] sm:$0xff] %v6945_v16  ;;  %v5338_v29 = vpop.eup %5337  ;;  %v6949_v1 = vmul.f32 %v5336_v54, %v8037_v47  ;;  %v2561_v20 = vadd.f32 %v2560_v10, %v2272_v11  ;;  %v2562_v38 = vpop.f32.mrf.mxu1  ;;  %v3306_v39 = vmul.f32 %v6853_v27, %v6945_v16 }
 0x33b   : > { %v3651_v44 = vadd.f32 1.0, %v5338_v29  ;;  %v2276_v17 = vpop.f32.mrf.mxu0  ;;  %5351 = vpow2.f32 %v4764_v26 }
 0x33c   : > { %v6954_v3 = vmul.f32 %v6744_v58, %v2561_v20  ;;  %v2277_v23 = vadd.f32 %v2276_v17, %v8039_v32  ;;  %v2565_v56 = vpop.f32.mrf.mxu1  ;;  %3422 = vadd.xlane.f32.xlu1 %v3306_v39  ;;  %v3355_v47 = vpop.xlane.xlu1 %3354  ;;  %v8042_v39 = vld [vmem:[#allocation43_spill] sm:$0xff] }
 0x33d   : > { %v5340_v52 = vpop.eup %5339  ;;  %5353 = vrcp.f32 %v3651_v44  ;;  %v2278_v54 = vpop.f32.mrf.mxu0  ;;  %v4765_v29 = vmul.f32 -1.442695, %v3355_v47 }
 0x33e   : > { %8038 = vst [vmem:[#allocation38_spill] sm:$0xff] %v6954_v3  ;;  %v5342_v11 = vpop.eup %5341  ;;  %v6958_v38 = vmul.f32 %v5340_v52, %v6593_v51  ;;  %v2566_v10 = vadd.f32 %v2565_v56, %v2277_v23  ;;  %v2567_v0 = vpop.f32.mrf.mxu1  ;;  %v3307_v20 = vmul.f32 %v6853_v27, %v6954_v3 }
 0x33f   : > { %v3652_v58 = vadd.f32 1.0, %v5342_v11  ;;  %v2279_v26 = vpop.f32.mrf.mxu0  ;;  %5355 = vpow2.f32 %v4765_v29 }
 0x340   : > { %8040 = vst [vmem:[#allocation40_spill] sm:$0xff] %v6958_v38  ;;  %v6963_v17 = vmul.f32 %v6752_v59, %v2566_v10  ;;  %v2280_v44 = vadd.f32 %v2279_v26, %v8042_v39  ;;  %v2568_v32 = vpop.f32.mrf.mxu1  ;;  %3424 = vadd.xlane.f32.xlu0 %v3307_v20  ;;  %v3357_v51 = vpop.xlane.xlu0 %3356  ;;  %v8045_v20 = vld [vmem:[#allocation45_spill] sm:$0xff] }
 0x341   : > { %v5344_v54 = vpop.eup %5343  ;;  %5357 = vrcp.f32 %v3652_v58  ;;  %v2281_v52 = vpop.f32.mrf.mxu0  ;;  %v4766_v11 = vmul.f32 -1.442695, %v3357_v51 }
 0x342   : > { %8041 = vst [vmem:[#allocation146_spill] sm:$0xff] %v6963_v17  ;;  %v5346_v23 = vpop.eup %5345  ;;  %v6967_v56 = vmul.f32 %v5344_v54, %v6603_v41  ;;  %v2569_v47 = vadd.f32 %v2568_v32, %v2280_v44  ;;  %v2570_v0 = vpop.f32.mrf.mxu1  ;;  %v3308_v10 = vmul.f32 %v6853_v27, %v6963_v17 }
 0x343   : > { %v3653_v59 = vadd.f32 1.0, %v5346_v23  ;;  %v2284_v29 = vpop.f32.mrf.mxu0  ;;  %5359 = vpow2.f32 %v4766_v11 }
 0x344   : > { %8043 = vst [vmem:[#allocation43_spill] sm:$0xff] %v6967_v56  ;;  %v6972_v26 = vmul.f32 %v6756_v53, %v2569_v47  ;;  %v2285_v58 = vadd.f32 %v2284_v29, %v8045_v20  ;;  %v2573_v39 = vpop.f32.mrf.mxu1  ;;  %3426 = vadd.xlane.f32.xlu1 %v3308_v10  ;;  %v5348_v52 = vpop.eup %5347  ;;  %v8047_v10 = vld [vmem:[#allocation47_spill] sm:$0xff] }
 0x345   : > { %5361 = vrcp.f32 %v3653_v59  ;;  %v2286_v54 = vpop.f32.mrf.mxu0  ;;  %v3359_v41 = vpop.xlane.xlu1 %3358  ;;  %v3654_v32 = vadd.f32 1.0, %v5348_v52 }
 0x346   : > { %8044 = vst [vmem:[#allocation147_spill] sm:$0xff] %v6972_v26  ;;  %v5350_v44 = vpop.eup %5349  ;;  %v2574_v51 = vadd.f32 %v2573_v39, %v2285_v58  ;;  %v2575_v0 = vpop.f32.mrf.mxu1  ;;  %v4767_v56 = vmul.f32 -1.442695, %v3359_v41  ;;  %v3309_v23 = vmul.f32 %v6853_v27, %v6972_v26 }
 0x347   : > { %v6978_v47 = vmul.f32 %v5350_v44, %v6611_v9  ;;  %v2287_v11 = vpop.f32.mrf.mxu0  ;;  %5363 = vrcp.f32 %v3654_v32 }
 0x348   : > { %v6981_v29 = vmul.f32 %v6764_v36, %v2574_v51  ;;  %v2288_v59 = vadd.f32 %v2287_v11, %v8047_v10  ;;  %v2576_v20 = vpop.f32.mrf.mxu1  ;;  %3428 = vadd.xlane.f32.xlu0 %v3309_v23  ;;  %v5352_v54 = vpop.eup %5351  ;;  %5365 = vpow2.f32 %v4767_v56  ;;  %v8049_v23 = vld [vmem:[#allocation50_spill] sm:$0xff] }
 0x349   : > { %v2289_v58 = vpop.f32.mrf.mxu0  ;;  %v3361_v39 = vpop.xlane.xlu0 %3360  ;;  %v3655_v52 = vadd.f32 1.0, %v5352_v54 }
 0x34a   : > { %8046 = vst [vmem:[#allocation45_spill] sm:$0xff] %v6981_v29  ;;  %v5354_v41 = vpop.eup %5353  ;;  %v2577_v0 = vadd.f32 %v2576_v20, %v2288_v59  ;;  %v2578_v53 = vpop.f32.mrf.mxu1  ;;  %v4768_v38 = vmul.f32 -1.442695, %v3361_v39  ;;  %v3310_v44 = vmul.f32 %v6853_v27, %v6981_v29 }
 0x34b   : > { %v6987_v32 = vmul.f32 %v5354_v41, %v6619_v18  ;;  %v2292_v51 = vpop.f32.mrf.mxu0  ;;  %5367 = vrcp.f32 %v3655_v52 }
 0x34c   : > { %v6990_v11 = vmul.f32 %v6770_v28, %v2577_v0  ;;  %v2293_v56 = vadd.f32 %v2292_v51, %v8049_v23  ;;  %v2581_v10 = vpop.f32.mrf.mxu1  ;;  %3430 = vadd.xlane.f32.xlu1 %v3310_v44  ;;  %v5356_v58 = vpop.eup %5355  ;;  %5369 = vpow2.f32 %v4768_v38  ;;  %v8051_v44 = vld [vmem:[#allocation52_spill] sm:$0xff] }
 0x34d   : > { %v2294_v59 = vpop.f32.mrf.mxu0  ;;  %v3363_v53 = vpop.xlane.xlu1 %3362  ;;  %v3656_v54 = vadd.f32 1.0, %v5356_v58 }
 0x34e   : > { %8048 = vst [vmem:[#allocation47_spill] sm:$0xff] %v6990_v11  ;;  %v5358_v20 = vpop.eup %5357  ;;  %v2582_v39 = vadd.f32 %v2581_v10, %v2293_v56  ;;  %v2583_v36 = vpop.f32.mrf.mxu1  ;;  %v4769_v9 = vmul.f32 -1.442695, %v3363_v53  ;;  %v3311_v41 = vmul.f32 %v6853_v27, %v6990_v11 }
 0x34f   : > { %v6996_v52 = vmul.f32 %v5358_v20, %v6629_v50  ;;  %v2295_v0 = vpop.f32.mrf.mxu0  ;;  %5371 = vrcp.f32 %v3656_v54  ;;  %v8067_v50 = vld [vmem:[#allocation128_spill] sm:$0xff] }
 0x350   : > { %v6999_v51 = vmul.f32 %v6778_v46, %v2582_v39  ;;  %v2296_v38 = vadd.f32 %v2295_v0, %v8051_v44  ;;  %v2584_v23 = vpop.f32.mrf.mxu1  ;;  %3432 = vadd.xlane.f32.xlu0 %v3311_v41  ;;  %v5360_v59 = vpop.eup %5359  ;;  %5373 = vpow2.f32 %v4769_v9  ;;  %v8053_v41 = vld [vmem:[#allocation54_spill] sm:$0xff] }
 0x351   : > { %v2297_v56 = vpop.f32.mrf.mxu0  ;;  %v3365_v36 = vpop.xlane.xlu0 %3364  ;;  %v3657_v58 = vadd.f32 1.0, %v5360_v59 }
 0x352   : > { %8050 = vst [vmem:[#allocation50_spill] sm:$0xff] %v6999_v51  ;;  %v5362_v10 = vpop.eup %5361  ;;  %v2585_v53 = vadd.f32 %v2584_v23, %v2296_v38  ;;  %v2586_v28 = vpop.f32.mrf.mxu1  ;;  %v4770_v18 = vmul.f32 -1.442695, %v3365_v36  ;;  %v3312_v20 = vmul.f32 %v6853_v27, %v6999_v51 }
 0x353   : > { %v7005_v54 = vmul.f32 %v5362_v10, %v6637_v14  ;;  %v2300_v39 = vpop.f32.mrf.mxu0  ;;  %5375 = vrcp.f32 %v3657_v58  ;;  %v8065_v14 = vld [vmem:[#allocation126_spill] sm:$0xff] }
 0x354   : > { %v7008_v0 = vmul.f32 %v6782_v60, %v2585_v53  ;;  %v2301_v9 = vadd.f32 %v2300_v39, %v8053_v41  ;;  %v2589_v44 = vpop.f32.mrf.mxu1  ;;  %3434 = vadd.xlane.f32.xlu1 %v3312_v20  ;;  %v5364_v56 = vpop.eup %5363  ;;  %5377 = vpow2.f32 %v4770_v18  ;;  %v8055_v20 = vld [vmem:[#allocation57_spill] sm:$0xff] }
 0x355   : > { %v2302_v38 = vpop.f32.mrf.mxu0  ;;  %v3367_v28 = vpop.xlane.xlu1 %3366  ;;  %v7012_v59 = vmul.f32 %v5364_v56, %v6645_v21 }
 0x356   : > { %8052 = vst [vmem:[#allocation52_spill] sm:$0xff] %v7008_v0  ;;  %v5366_v23 = vpop.eup %5365  ;;  %v2590_v36 = vadd.f32 %v2589_v44, %v2301_v9  ;;  %v2591_v10 = vpop.f32.mrf.mxu1  ;;  %v4771_v46 = vmul.f32 -1.442695, %v3367_v28  ;;  %v3313_v58 = vmul.f32 %v6853_v27, %v7008_v0 }
 0x357   : > { %v3658_v53 = vadd.f32 1.0, %v5366_v23  ;;  %v2303_v60 = vpop.f32.mrf.mxu0 }
 0x358   : > { %v7017_v39 = vmul.f32 %v6790_v4, %v2590_v36  ;;  %5379 = vpow2.f32 %v4771_v46  ;;  %v2304_v18 = vadd.f32 %v2303_v60, %v8055_v20  ;;  %v2592_v41 = vpop.f32.mrf.mxu1  ;;  %3436 = vadd.xlane.f32.xlu0 %v3313_v58  ;;  %v5368_v38 = vpop.eup %5367  ;;  %v8057_v58 = vld [vmem:[#allocation59_spill] sm:$0xff] }
 0x359   : > { %5381 = vrcp.f32 %v3658_v53  ;;  %v2305_v56 = vpop.f32.mrf.mxu0  ;;  %v3369_v21 = vpop.xlane.xlu0 %3368  ;;  %v7021_v44 = vmul.f32 %v5368_v38, %v6655_v40 }
 0x35a   : > { %8054 = vst [vmem:[#allocation54_spill] sm:$0xff] %v7017_v39  ;;  %v5370_v9 = vpop.eup %5369  ;;  %v2593_v28 = vadd.f32 %v2592_v41, %v2304_v18  ;;  %v2594_v10 = vpop.f32.mrf.mxu1  ;;  %v4772_v23 = vmul.f32 -1.442695, %v3369_v21  ;;  %v3314_v36 = vmul.f32 %v6853_v27, %v7017_v39 }
 0x35b   : > { %v3659_v4 = vadd.f32 1.0, %v5370_v9  ;;  %v2308_v46 = vpop.f32.mrf.mxu0 }
 0x35c   : > { %v7026_v60 = vmul.f32 %v6796_v6, %v2593_v28  ;;  %5383 = vpow2.f32 %v4772_v23  ;;  %v2309_v53 = vadd.f32 %v2308_v46, %v8057_v58  ;;  %v2597_v20 = vpop.f32.mrf.mxu1  ;;  %3438 = vadd.xlane.f32.xlu1 %v3314_v36  ;;  %v5372_v56 = vpop.eup %5371  ;;  %v8059_v36 = vld [vmem:[#allocation61_spill] sm:$0xff] }
 0x35d   : > { %5385 = vrcp.f32 %v3659_v4  ;;  %v2310_v38 = vpop.f32.mrf.mxu0  ;;  %v3371_v40 = vpop.xlane.xlu1 %3370  ;;  %v7030_v21 = vmul.f32 %v5372_v56, %v6663_v30 }
 0x35e   : > { %8056 = vst [vmem:[#allocation57_spill] sm:$0xff] %v7026_v60  ;;  %v5374_v18 = vpop.eup %5373  ;;  %v2598_v41 = vadd.f32 %v2597_v20, %v2309_v53  ;;  %v2599_v10 = vpop.f32.mrf.mxu1  ;;  %v4773_v9 = vmul.f32 -1.442695, %v3371_v40  ;;  %v3315_v28 = vmul.f32 %v6853_v27, %v7026_v60 }
 0x35f   : > { %v3660_v6 = vadd.f32 1.0, %v5374_v18  ;;  %v2311_v23 = vpop.f32.mrf.mxu0 }
 0x360   : > { %v7035_v46 = vmul.f32 %v6804_v34, %v2598_v41  ;;  %5387 = vpow2.f32 %v4773_v9  ;;  %v2312_v4 = vadd.f32 %v2311_v23, %v8059_v36  ;;  %v2600_v58 = vpop.f32.mrf.mxu1  ;;  %3440 = vadd.xlane.f32.xlu0 %v3315_v28  ;;  %v5376_v38 = vpop.eup %5375 }
 0x361   : > { %5389 = vrcp.f32 %v3660_v6  ;;  %v2313_v56 = vpop.f32.mrf.mxu0  ;;  %v3373_v30 = vpop.xlane.xlu0 %3372  ;;  %v7039_v40 = vmul.f32 %v5376_v38, %v6671_v42 }
 0x362   : > { %8058 = vst [vmem:[#allocation59_spill] sm:$0xff] %v7035_v46  ;;  %v5378_v53 = vpop.eup %5377  ;;  %v2601_v20 = vadd.f32 %v2600_v58, %v2312_v4  ;;  %v2602_v10 = vpop.f32.mrf.mxu1  ;;  %v4774_v18 = vmul.f32 -1.442695, %v3373_v30  ;;  %v3316_v41 = vmul.f32 %v6853_v27, %v7035_v46 }
 0x363   : > { %v3661_v34 = vadd.f32 1.0, %v5378_v53 }
 0x364   : > { %v7044_v9 = vmul.f32 %v6808_v25, %v2601_v20  ;;  %5391 = vpow2.f32 %v4774_v18  ;;  %3442 = vadd.xlane.f32.xlu1 %v3316_v41  ;;  %v3375_v6 = vpop.xlane.xlu1 %3374  ;;  %v8061_v25 = vld [vmem:[#allocation119_spill] sm:$0xff] }
 0x365   : > { %v5380_v28 = vpop.eup %5379  ;;  %5393 = vrcp.f32 %v3661_v34  ;;  %v4775_v56 = vmul.f32 -1.442695, %v3375_v6 }
 0x366   : > { %8060 = vst [vmem:[#allocation61_spill] sm:$0xff] %v7044_v9  ;;  %v5382_v23 = vpop.eup %5381  ;;  %v3662_v36 = vadd.f32 1.0, %v5380_v28  ;;  %v3317_v4 = vmul.f32 %v6853_v27, %v7044_v9 }
 0x367   : > { %v7049_v30 = vmul.f32 %v5382_v23, %v6681_v57 }
 0x368   : > { %5395 = vrcp.f32 %v3662_v36  ;;  %3444 = vadd.xlane.f32.xlu0 %v3317_v4  ;;  %v3377_v38 = vpop.xlane.xlu0 %3376 }
 0x369   : > { %v5384_v58 = vpop.eup %5383  ;;  %5397 = vpow2.f32 %v4775_v56  ;;  %v4776_v10 = vmul.f32 -1.442695, %v3377_v38 }
 0x36a   : > { %v5386_v53 = vpop.eup %5385  ;;  %v3663_v20 = vadd.f32 1.0, %v5384_v58 }
 0x36b   : > { %v7052_v34 = vmul.f32 %v5386_v53, %v6689_v19 }
 0x36c   : > { %5399 = vrcp.f32 %v3663_v20  ;;  %v3379_v41 = vpop.xlane.xlu1 %3378 }
 0x36d   : > { %v5388_v18 = vpop.eup %5387  ;;  %5401 = vpow2.f32 %v4776_v10  ;;  %v4777_v6 = vmul.f32 -1.442695, %v3379_v41 }
 0x36e   : > { %v5390_v28 = vpop.eup %5389  ;;  %v3664_v27 = vadd.f32 1.0, %v5388_v18  ;;  %v8062_v18 = vld [vmem:[#allocation121_spill] sm:$0xff] }
 0x36f   : > { %v7055_v23 = vmul.f32 %v5390_v28, %v6697_v15 }
 0x370   : > { %5403 = vrcp.f32 %v3664_v27  ;;  %v3381_v56 = vpop.xlane.xlu0 %3380 }
 0x371   : > { %v5392_v36 = vpop.eup %5391  ;;  %5405 = vpow2.f32 %v4777_v6  ;;  %v4778_v38 = vmul.f32 -1.442695, %v3381_v56 }
 0x372   : > { %v5394_v4 = vpop.eup %5393  ;;  %v3665_v58 = vadd.f32 1.0, %v5392_v36  ;;  %v8063_v36 = vld [vmem:[#allocation123_spill] sm:$0xff] }
 0x373   : > { %v7058_v53 = vmul.f32 %v5394_v4, %v8061_v25 }
 0x374   : > { %5407 = vrcp.f32 %v3665_v58  ;;  %v3383_v10 = vpop.xlane.xlu1 %3382 }
 0x375   : > { %v5396_v20 = vpop.eup %5395  ;;  %5409 = vpow2.f32 %v4778_v38  ;;  %v4779_v28 = vmul.f32 -1.442695, %v3383_v10 }
 0x376   : > { %v5398_v19 = vpop.eup %5397  ;;  %v7061_v41 = vmul.f32 %v5396_v20, %v8062_v18 }
 0x377   : > { %v3666_v15 = vadd.f32 1.0, %v5398_v19  ;;  %5411 = vpow2.f32 %v4779_v28 }
 0x378   : > { %v3385_v6 = vpop.xlane.xlu0 %3384 }
 0x379   : > { %v5400_v27 = vpop.eup %5399  ;;  %5413 = vrcp.f32 %v3666_v15  ;;  %v4780_v25 = vmul.f32 -1.442695, %v3385_v6 }
 0x37a   : > { %v5402_v57 = vpop.eup %5401  ;;  %v7064_v56 = vmul.f32 %v5400_v27, %v8063_v36 }
 0x37b   : > { %v3667_v4 = vadd.f32 1.0, %v5402_v57  ;;  %5415 = vpow2.f32 %v4780_v25 }
 0x37c   : > { %8064 = vst [vmem:[#allocation148_spill] sm:$0xff] %v7064_v56  ;;  %v3387_v38 = vpop.xlane.xlu1 %3386 }
 0x37d   : > { %v5404_v58 = vpop.eup %5403  ;;  %5417 = vrcp.f32 %v3667_v4  ;;  %v4781_v10 = vmul.f32 -1.442695, %v3387_v38 }
 0x37e   : > { %v5406_v42 = vpop.eup %5405  ;;  %v7067_v20 = vmul.f32 %v5404_v58, %v8065_v14  ;;  %v8069_v58 = vld [vmem:[#allocation130_spill] sm:$0xff] }
 0x37f   : > { %v3668_v19 = vadd.f32 1.0, %v5406_v42  ;;  %5419 = vpow2.f32 %v4781_v10 }
 0x380   : > { %8066 = vst [vmem:[#allocation149_spill] sm:$0xff] %v7067_v20  ;;  %v3389_v15 = vpop.xlane.xlu0 %3388 }
 0x381   : > { %v5408_v18 = vpop.eup %5407  ;;  %5421 = vrcp.f32 %v3668_v19  ;;  %v4782_v6 = vmul.f32 -1.442695, %v3389_v15 }
 0x382   : > { %v5410_v28 = vpop.eup %5409  ;;  %v7070_v27 = vmul.f32 %v5408_v18, %v8067_v50  ;;  %v8071_v18 = vld [vmem:[#allocation132_spill] sm:$0xff] }
 0x383   : > { %v3669_v57 = vadd.f32 1.0, %v5410_v28  ;;  %5423 = vpow2.f32 %v4782_v6 }
 0x384   : > { %8068 = vst [vmem:[#allocation150_spill] sm:$0xff] %v7070_v27  ;;  %v5412_v36 = vpop.eup %5411  ;;  %v3391_v25 = vpop.xlane.xlu1 %3390  ;;  %v8073_v27 = vld [vmem:[#allocation133_spill] sm:$0xff] }
 0x385   : > { %5425 = vrcp.f32 %v3669_v57  ;;  %v3670_v56 = vadd.f32 1.0, %v5412_v36  ;;  %v4783_v14 = vmul.f32 -1.442695, %v3391_v25 }
 0x386   : > { %v5414_v4 = vpop.eup %5413 }
 0x387   : > { %v7073_v38 = vmul.f32 %v5414_v4, %v8069_v58  ;;  %5427 = vrcp.f32 %v3670_v56 }
 0x388   : > { %v5416_v42 = vpop.eup %5415  ;;  %5429 = vpow2.f32 %v4783_v14  ;;  %v3393_v10 = vpop.xlane.xlu0 %3392 }
 0x389   : > { %8070 = vst [vmem:[#allocation151_spill] sm:$0xff] %v7073_v38  ;;  %v3671_v20 = vadd.f32 1.0, %v5416_v42  ;;  %v4784_v50 = vmul.f32 -1.442695, %v3393_v10  ;;  %v8075_v38 = vld [vmem:[#allocation134_spill] sm:$0xff] }
 0x38a   : > { %v5418_v19 = vpop.eup %5417 }
 0x38b   : > { %v7076_v15 = vmul.f32 %v5418_v19, %v8071_v18  ;;  %5431 = vrcp.f32 %v3671_v20 }
 0x38c   : > { %v5420_v28 = vpop.eup %5419  ;;  %5433 = vpow2.f32 %v4784_v50  ;;  %v3395_v6 = vpop.xlane.xlu1 %3394 }
 0x38d   : > { %8072 = vst [vmem:[#allocation152_spill] sm:$0xff] %v7076_v15  ;;  %v3672_v36 = vadd.f32 1.0, %v5420_v28  ;;  %v4785_v25 = vmul.f32 -1.442695, %v3395_v6  ;;  %v8077_v28 = vld [vmem:[#allocation136_spill] sm:$0xff]  ;;  %v8080_v15 = vld [vmem:[#allocation138_spill] sm:$0xff] }
 0x38e   : > { %v5422_v57 = vpop.eup %5421 }
 0x38f   : > { %v7079_v4 = vmul.f32 %v5422_v57, %v8073_v27  ;;  %5435 = vrcp.f32 %v3672_v36 }
 0x390   : > { %v5424_v56 = vpop.eup %5423  ;;  %5437 = vpow2.f32 %v4785_v25  ;;  %v3397_v14 = vpop.xlane.xlu0 %3396 }
 0x391   : > { %8074 = vst [vmem:[#allocation153_spill] sm:$0xff] %v7079_v4  ;;  %v3673_v42 = vadd.f32 1.0, %v5424_v56  ;;  %v4786_v10 = vmul.f32 -1.442695, %v3397_v14  ;;  %v8078_v56 = vld [vmem:[#allocation137_spill] sm:$0xff] }
 0x392   : > { %v5426_v58 = vpop.eup %5425 }
 0x393   : > { %v7082_v19 = vmul.f32 %v5426_v58, %v8075_v38  ;;  %5439 = vrcp.f32 %v3673_v42 }
 0x394   : > { %v5428_v20 = vpop.eup %5427  ;;  %5441 = vpow2.f32 %v4786_v10  ;;  %v3399_v50 = vpop.xlane.xlu1 %3398 }
 0x395   : > { %8076 = vst [vmem:[#allocation154_spill] sm:$0xff] %v7082_v19  ;;  %v5430_v18 = vpop.eup %5429  ;;  %v7085_v6 = vmul.f32 %v5428_v20, %v8077_v28  ;;  %v4787_v27 = vmul.f32 -1.442695, %v3399_v50 }
 0x396   : > { %v3674_v57 = vadd.f32 1.0, %v5430_v18 }
 0x397   : > { %5443 = vpow2.f32 %v4787_v27 }
 0x398   : > { %v5432_v36 = vpop.eup %5431  ;;  %5445 = vrcp.f32 %v3674_v57  ;;  %v3401_v25 = vpop.xlane.xlu0 %3400 }
 0x399   : > { %v5434_v4 = vpop.eup %5433  ;;  %v7088_v14 = vmul.f32 %v5432_v36, %v8078_v56  ;;  %v4788_v38 = vmul.f32 -1.442695, %v3401_v25 }
 0x39a   : > { %v3675_v58 = vadd.f32 1.0, %v5434_v4 }
 0x39b   : > { %8079 = vst [vmem:[#allocation155_spill] sm:$0xff] %v7088_v14  ;;  %5447 = vpow2.f32 %v4788_v38 }
 0x39c   : > { %v5436_v42 = vpop.eup %5435  ;;  %5449 = vrcp.f32 %v3675_v58  ;;  %v3403_v10 = vpop.xlane.xlu1 %3402 }
 0x39d   : > { %v5438_v19 = vpop.eup %5437  ;;  %v7091_v20 = vmul.f32 %v5436_v42, %v8080_v15  ;;  %v4789_v50 = vmul.f32 -1.442695, %v3403_v10 }
 0x39e   : > { %v3676_v18 = vadd.f32 1.0, %v5438_v19 }
 0x39f   : > { %5451 = vpow2.f32 %v4789_v50 }
 0x3a0   : > { %v5440_v28 = vpop.eup %5439  ;;  %5453 = vrcp.f32 %v3676_v18  ;;  %v3405_v27 = vpop.xlane.xlu0 %3404 }
 0x3a1   : > { %v5442_v57 = vpop.eup %5441  ;;  %v7094_v36 = vmul.f32 %v5440_v28, %v6811_v8  ;;  %v4790_v25 = vmul.f32 -1.442695, %v3405_v27  ;;  %v8081_v8 = vld [vmem:[#allocation23_spill] sm:$0xff] }
 0x3a2   : > { %v3677_v4 = vadd.f32 1.0, %v5442_v57 }
 0x3a3   : > { %5455 = vpow2.f32 %v4790_v25 }
 0x3a4   : > { %v5444_v56 = vpop.eup %5443  ;;  %5457 = vrcp.f32 %v3677_v4  ;;  %v3407_v38 = vpop.xlane.xlu1 %3406 }
 0x3a5   : > { %v5446_v58 = vpop.eup %5445  ;;  %v3678_v14 = vadd.f32 1.0, %v5444_v56  ;;  %v4791_v15 = vmul.f32 -1.442695, %v3407_v38 }
 0x3a6   : > { %v7097_v42 = vmul.f32 %v5446_v58, %v6817_v62 }
 0x3a7   : > { %5459 = vrcp.f32 %v3678_v14 }
 0x3a8   : > { %v5448_v19 = vpop.eup %5447  ;;  %5461 = vpow2.f32 %v4791_v15  ;;  %v3409_v10 = vpop.xlane.xlu0 %3408 }
 0x3a9   : > { %v5450_v50 = vpop.eup %5449  ;;  %v3679_v18 = vadd.f32 1.0, %v5448_v19  ;;  %v4792_v28 = vmul.f32 -1.442695, %v3409_v10 }
 0x3aa   : > { %v7100_v27 = vmul.f32 %v5450_v50, %v6823_v49 }
 0x3ab   : > { %5463 = vrcp.f32 %v3679_v18 }
 0x3ac   : > { %v5452_v57 = vpop.eup %5451  ;;  %5465 = vpow2.f32 %v4792_v28 }
 0x3ad   : > { %v3411_v25 = vpop.xlane.xlu1 %3410  ;;  %v5454_v4 = vpop.eup %5453  ;;  %v3680_v56 = vadd.f32 1.0, %v5452_v57 }
 0x3ae   : > { %v4793_v38 = vmul.f32 -1.442695, %v3411_v25  ;;  %v7103_v58 = vmul.f32 %v5454_v4, %v6829_v5 }
 0x3af   : > { %5467 = vrcp.f32 %v3680_v56 }
 0x3b0   : > { %v5456_v14 = vpop.eup %5455  ;;  %5469 = vpow2.f32 %v4793_v38 }
 0x3b1   : > { %v3413_v15 = vpop.xlane.xlu0 %3412  ;;  %v5458_v62 = vpop.eup %5457  ;;  %v3681_v19 = vadd.f32 1.0, %v5456_v14 }
 0x3b2   : > { %v4794_v10 = vmul.f32 -1.442695, %v3413_v15  ;;  %v7106_v50 = vmul.f32 %v5458_v62, %v8081_v8 }
 0x3b3   : > { %5471 = vrcp.f32 %v3681_v19 }
 0x3b4   : > { %v5460_v18 = vpop.eup %5459  ;;  %5473 = vpow2.f32 %v4794_v10 }
 0x3b5   : > { %v3415_v28 = vpop.xlane.xlu1 %3414  ;;  %v5462_v49 = vpop.eup %5461  ;;  %v7109_v57 = vmul.f32 %v5460_v18, %v6841_v55 }
 0x3b6   : > { %v4795_v25 = vmul.f32 -1.442695, %v3415_v28  ;;  %v3682_v4 = vadd.f32 1.0, %v5462_v49 }
 0x3b8   : > { %5475 = vpow2.f32 %v4795_v25  ;;  %v5464_v56 = vpop.eup %5463 }
 0x3b9   : > { %5477 = vrcp.f32 %v3682_v4  ;;  %v3417_v38 = vpop.xlane.xlu0 %3416  ;;  %v5466_v5 = vpop.eup %5465  ;;  %v7112_v14 = vmul.f32 %v5464_v56, %v6847_v33 }
 0x3ba   : > { %v4796_v8 = vmul.f32 -1.442695, %v3417_v38  ;;  %v3683_v62 = vadd.f32 1.0, %v5466_v5 }
 0x3bb   : > { %8082 = vst [vmem:[#allocation156_spill] sm:$0xff] %v7112_v14 }
 0x3bc   : > { %5479 = vpow2.f32 %v4796_v8  ;;  %v5468_v15 = vpop.eup %5467 }
 0x3bd   : > { %5481 = vrcp.f32 %v3683_v62  ;;  %v3419_v19 = vpop.xlane.xlu1 %3418  ;;  %v5470_v10 = vpop.eup %5469  ;;  %v7115_v18 = vmul.f32 %v5468_v15, %v6858_v13 }
 0x3be   : > { %v4797_v28 = vmul.f32 -1.442695, %v3419_v19  ;;  %v3684_v49 = vadd.f32 1.0, %v5470_v10 }
 0x3c0   : > { %5483 = vpow2.f32 %v4797_v28  ;;  %v5472_v25 = vpop.eup %5471 }
 0x3c1   : > { %5485 = vrcp.f32 %v3684_v49  ;;  %v3421_v4 = vpop.xlane.xlu0 %3420  ;;  %v5474_v55 = vpop.eup %5473  ;;  %v7118_v56 = vmul.f32 %v5472_v25, %v6864_v48 }
 0x3c2   : > { %v4798_v38 = vmul.f32 -1.442695, %v3421_v4  ;;  %v3685_v5 = vadd.f32 1.0, %v5474_v55 }
 0x3c4   : > { %5487 = vpow2.f32 %v4798_v38 }
 0x3c5   : > { %v5476_v8 = vpop.eup %5475  ;;  %5489 = vrcp.f32 %v3685_v5  ;;  %v3423_v62 = vpop.xlane.xlu1 %3422 }
 0x3c6   : > { %v5478_v33 = vpop.eup %5477  ;;  %v3686_v14 = vadd.f32 1.0, %v5476_v8  ;;  %v4799_v15 = vmul.f32 -1.442695, %v3423_v62 }
 0x3c7   : > { %v7121_v19 = vmul.f32 %v5478_v33, %v6873_v24 }
 0x3c8   : > { %5491 = vrcp.f32 %v3686_v14 }
 0x3c9   : > { %v5480_v10 = vpop.eup %5479  ;;  %5493 = vpow2.f32 %v4799_v15  ;;  %v3425_v28 = vpop.xlane.xlu0 %3424 }
 0x3ca   : > { %v5482_v49 = vpop.eup %5481  ;;  %v3687_v13 = vadd.f32 1.0, %v5480_v10  ;;  %v4800_v25 = vmul.f32 -1.442695, %v3425_v28 }
 0x3cb   : > { %v7124_v4 = vmul.f32 %v5482_v49, %v6882_v31 }
 0x3cc   : > { %5495 = vrcp.f32 %v3687_v13 }
 0x3cd   : > { %v5484_v55 = vpop.eup %5483  ;;  %5497 = vpow2.f32 %v4800_v25  ;;  %v3427_v38 = vpop.xlane.xlu1 %3426 }
 0x3ce   : > { %v5486_v5 = vpop.eup %5485  ;;  %v3688_v8 = vadd.f32 1.0, %v5484_v55  ;;  %v4801_v62 = vmul.f32 -1.442695, %v3427_v38 }
 0x3cf   : > { %v7127_v33 = vmul.f32 %v5486_v5, %v6891_v12 }
 0x3d0   : > { %5499 = vrcp.f32 %v3688_v8 }
 0x3d1   : > { %v5488_v14 = vpop.eup %5487  ;;  %5501 = vpow2.f32 %v4801_v62  ;;  %v3429_v15 = vpop.xlane.xlu0 %3428 }
 0x3d2   : > { %v5490_v24 = vpop.eup %5489  ;;  %v3689_v10 = vadd.f32 1.0, %v5488_v14  ;;  %v4802_v28 = vmul.f32 -1.442695, %v3429_v15 }
 0x3d3   : > { %v7130_v49 = vmul.f32 %v5490_v24, %v6900_v35 }
 0x3d4   : > { %5503 = vrcp.f32 %v3689_v10 }
 0x3d5   : > { %v5492_v13 = vpop.eup %5491  ;;  %5505 = vpow2.f32 %v4802_v28  ;;  %v3431_v25 = vpop.xlane.xlu1 %3430 }
 0x3d6   : > { %v5494_v31 = vpop.eup %5493  ;;  %v7133_v55 = vmul.f32 %v5492_v13, %v6909_v43  ;;  %v4803_v38 = vmul.f32 -1.442695, %v3431_v25 }
 0x3d7   : > { %v3690_v5 = vadd.f32 1.0, %v5494_v31 }
 0x3d8   : > { %5507 = vpow2.f32 %v4803_v38 }
 0x3d9   : > { %v5496_v8 = vpop.eup %5495  ;;  %5509 = vrcp.f32 %v3690_v5  ;;  %v3433_v62 = vpop.xlane.xlu0 %3432 }
 0x3da   : > { %v5498_v12 = vpop.eup %5497  ;;  %v7136_v14 = vmul.f32 %v5496_v8, %v6918_v63  ;;  %v4804_v24 = vmul.f32 -1.442695, %v3433_v62 }
 0x3db   : > { %v3691_v15 = vadd.f32 1.0, %v5498_v12 }
 0x3dc   : > { %5511 = vpow2.f32 %v4804_v24 }
 0x3dd   : > { %v5500_v10 = vpop.eup %5499  ;;  %5513 = vrcp.f32 %v3691_v15  ;;  %v3435_v28 = vpop.xlane.xlu1 %3434 }
 0x3de   : > { %v5502_v35 = vpop.eup %5501  ;;  %v7139_v13 = vmul.f32 %v5500_v10, %v6927_v2  ;;  %v4805_v25 = vmul.f32 -1.442695, %v3435_v28 }
 0x3df   : > { %v3692_v31 = vadd.f32 1.0, %v5502_v35 }
 0x3e0   : > { %5515 = vpow2.f32 %v4805_v25 }
 0x3e1   : > { %v5504_v38 = vpop.eup %5503  ;;  %5517 = vrcp.f32 %v3692_v31  ;;  %v3437_v5 = vpop.xlane.xlu0 %3436 }
 0x3e2   : > { %v5506_v43 = vpop.eup %5505  ;;  %v7142_v8 = vmul.f32 %v5504_v38, %v6936_v7  ;;  %v4806_v62 = vmul.f32 -1.442695, %v3437_v5 }
 0x3e3   : > { %v3693_v12 = vadd.f32 1.0, %v5506_v43 }
 0x3e4   : > { %5519 = vpow2.f32 %v4806_v62 }
 0x3e5   : > { %v5508_v24 = vpop.eup %5507  ;;  %5521 = vrcp.f32 %v3693_v12  ;;  %v3439_v15 = vpop.xlane.xlu1 %3438 }
 0x3e6   : > { %v5510_v63 = vpop.eup %5509  ;;  %v3694_v48 = vadd.f32 1.0, %v5508_v24  ;;  %v4807_v10 = vmul.f32 -1.442695, %v3439_v15 }
 0x3e7   : > { %v7145_v28 = vmul.f32 %v5510_v63, %v6945_v16 }
 0x3e8   : > { %5523 = vrcp.f32 %v3694_v48 }
 0x3e9   : > { %v5512_v35 = vpop.eup %5511  ;;  %5525 = vpow2.f32 %v4807_v10  ;;  %v3441_v25 = vpop.xlane.xlu0 %3440 }
 0x3ea   : > { %v5514_v31 = vpop.eup %5513  ;;  %v3695_v2 = vadd.f32 1.0, %v5512_v35  ;;  %v4808_v38 = vmul.f32 -1.442695, %v3441_v25 }
 0x3eb   : > { %v7148_v5 = vmul.f32 %v5514_v31, %v6954_v3 }
 0x3ec   : > { %5527 = vrcp.f32 %v3695_v2 }
 0x3ed   : > { %v5516_v43 = vpop.eup %5515  ;;  %5529 = vpow2.f32 %v4808_v38  ;;  %v3443_v62 = vpop.xlane.xlu1 %3442 }
 0x3ee   : > { %v5518_v12 = vpop.eup %5517  ;;  %v3696_v24 = vadd.f32 1.0, %v5516_v43  ;;  %v4809_v15 = vmul.f32 -1.442695, %v3443_v62 }
 0x3ef   : > { %v7151_v63 = vmul.f32 %v5518_v12, %v6963_v17 }
 0x3f0   : > { %5531 = vrcp.f32 %v3696_v24 }
 0x3f1   : > { %v5520_v48 = vpop.eup %5519  ;;  %5533 = vpow2.f32 %v4809_v15  ;;  %v3445_v10 = vpop.xlane.xlu0 %3444 }
 0x3f2   : > { %v5522_v16 = vpop.eup %5521  ;;  %v3697_v35 = vadd.f32 1.0, %v5520_v48  ;;  %v4810_v25 = vmul.f32 -1.442695, %v3445_v10 }
 0x3f3   : > { %v7154_v31 = vmul.f32 %v5522_v16, %v6972_v26 }
 0x3f4   : > { %5535 = vrcp.f32 %v3697_v35 }
 0x3f5   : > { %v5524_v2 = vpop.eup %5523  ;;  %5537 = vpow2.f32 %v4810_v25 }
 0x3f6   : > { %v5526_v38 = vpop.eup %5525  ;;  %v7157_v43 = vmul.f32 %v5524_v2, %v6981_v29 }
 0x3f7   : > { %v3698_v62 = vadd.f32 1.0, %v5526_v38 }
 0x3f9   : > { %v5528_v12 = vpop.eup %5527  ;;  %5539 = vrcp.f32 %v3698_v62 }
 0x3fa   : > { %v5530_v24 = vpop.eup %5529  ;;  %v7160_v15 = vmul.f32 %v5528_v12, %v6990_v11 }
 0x3fb   : > { %v3699_v17 = vadd.f32 1.0, %v5530_v24 }
 0x3fd   : > { %v5532_v48 = vpop.eup %5531  ;;  %5541 = vrcp.f32 %v3699_v17 }
 0x3fe   : > { %v5534_v10 = vpop.eup %5533  ;;  %v7163_v16 = vmul.f32 %v5532_v48, %v6999_v51 }
 0x3ff   : > { %v3700_v35 = vadd.f32 1.0, %v5534_v10 }
 0x401   : > { %v5536_v25 = vpop.eup %5535  ;;  %5543 = vrcp.f32 %v3700_v35 }
 0x402   : > { %v5538_v26 = vpop.eup %5537  ;;  %v7166_v2 = vmul.f32 %v5536_v25, %v7008_v0 }
 0x403   : > { %v3701_v38 = vadd.f32 1.0, %v5538_v26 }
 0x405   : > { %5545 = vrcp.f32 %v3701_v38 }
 0x406   : > { %v5540_v62 = vpop.eup %5539 }
 0x407   : > { %v7169_v12 = vmul.f32 %v5540_v62, %v7017_v39 }
 0x40a   : > { %v5542_v24 = vpop.eup %5541 }
 0x40b   : > { %v7172_v17 = vmul.f32 %v5542_v24, %v7026_v60 }
 0x40e   : > { %v5544_v11 = vpop.eup %5543 }
 0x40f   : > { %v7175_v48 = vmul.f32 %v5544_v11, %v7035_v46 }
 0x411   : > { %3897 = sbr.rel (%p4811_p11) target bundleno = 1079 (0x437), region = 86 }
 0x412   : > { %v5546_v10 = vpop.eup %5545 }
 0x413   : > { %v7178_v35 = vmul.f32 %v5546_v10, %v7044_v9 }
 0x415   : > { %8083 = vst [vmem:[#allocation157_spill] sm:$0xff] %v7178_v35 }
 0x416   : > { %v8084_v26 = vld [vmem:[#allocation28_spill] sm:$0xff]  ;;  %v8085_v11 = vld [vmem:[#allocation29_spill] sm:$0xff]  ;;  %v8086_v25 = vld [vmem:[#allocation30_spill] sm:$0xff]  ;;  %3904 = vst [vmem:[%s7182_s6 + $0x28] sm:$0xff] %v6915_v22 }
 0x417   : > { %3899 = vst [vmem:[%s7182_s6] sm:$0xff] %v8084_v26  ;;  %3900 = vst [vmem:[%s7182_s6 + $0x8] sm:$0xff] %v8085_v11  ;;  %v8087_v38 = vld [vmem:[#allocation31_spill] sm:$0xff]  ;;  %v8088_v62 = vld [vmem:[#allocation32_spill] sm:$0xff] }
 0x418   : > { %3901 = vst [vmem:[%s7182_s6 + $0x10] sm:$0xff] %v8086_v25  ;;  %3902 = vst [vmem:[%s7182_s6 + $0x18] sm:$0xff] %v8087_v38  ;;  %v8089_v24 = vld [vmem:[#allocation40_spill] sm:$0xff]  ;;  %v8090_v10 = vld [vmem:[#allocation43_spill] sm:$0xff] }
 0x419   : > { %3903 = vst [vmem:[%s7182_s6 + $0x20] sm:$0xff] %v8088_v62  ;;  %3905 = vst [vmem:[%s7182_s6 + $0x30] sm:$0xff] %v6924_v45  ;;  %v8091_v26 = vld [vmem:[#allocation148_spill] sm:$0xff]  ;;  %v8092_v11 = vld [vmem:[#allocation149_spill] sm:$0xff] }
 0x41a   : > { %3906 = vst [vmem:[%s7182_s6 + $0x38] sm:$0xff] %v6933_v61  ;;  %3907 = vst [vmem:[%s7182_s6 + $0x40] sm:$0xff] %v6940_v37  ;;  %v8093_v25 = vld [vmem:[#allocation150_spill] sm:$0xff]  ;;  %v8094_v38 = vld [vmem:[#allocation151_spill] sm:$0xff] }
 0x41b   : > { %3908 = vst [vmem:[%s7182_s6 + $0x48] sm:$0xff] %v6949_v1  ;;  %3909 = vst [vmem:[%s7182_s6 + $0x50] sm:$0xff] %v8089_v24  ;;  %v8095_v62 = vld [vmem:[#allocation152_spill] sm:$0xff]  ;;  %v8096_v24 = vld [vmem:[#allocation153_spill] sm:$0xff] }
 0x41c   : > { %3910 = vst [vmem:[%s7182_s6 + $0x58] sm:$0xff] %v8090_v10  ;;  %3911 = vst [vmem:[%s7182_s6 + $0x60] sm:$0xff] %v6978_v47  ;;  %v8097_v10 = vld [vmem:[#allocation154_spill] sm:$0xff] }
 0x41d   : > { %3912 = vst [vmem:[%s7182_s6 + $0x68] sm:$0xff] %v6987_v32  ;;  %3913 = vst [vmem:[%s7182_s6 + $0x70] sm:$0xff] %v6996_v52 }
 0x41e   : > { %3914 = vst [vmem:[%s7182_s6 + $0x78] sm:$0xff] %v7005_v54  ;;  %3915 = vst [vmem:[%s7182_s6 + $0x80] sm:$0xff] %v7012_v59 }
 0x41f   : > { %3916 = vst [vmem:[%s7182_s6 + $0x88] sm:$0xff] %v7021_v44  ;;  %3917 = vst [vmem:[%s7182_s6 + $0x90] sm:$0xff] %v7030_v21 }
 0x420   : > { %3918 = vst [vmem:[%s7182_s6 + $0x98] sm:$0xff] %v7039_v40  ;;  %3919 = vst [vmem:[%s7182_s6 + $0xa0] sm:$0xff] %v7049_v30 }
 0x421   : > { %3920 = vst [vmem:[%s7182_s6 + $0xa8] sm:$0xff] %v7052_v34  ;;  %3921 = vst [vmem:[%s7182_s6 + $0xb0] sm:$0xff] %v7055_v23 }
 0x422   : > { %3922 = vst [vmem:[%s7182_s6 + $0xb8] sm:$0xff] %v7058_v53  ;;  %3923 = vst [vmem:[%s7182_s6 + $0xc0] sm:$0xff] %v7061_v41 }
 0x423   : > { %3924 = vst [vmem:[%s7182_s6 + $0xc8] sm:$0xff] %v8091_v26  ;;  %3925 = vst [vmem:[%s7182_s6 + $0xd0] sm:$0xff] %v8092_v11  ;;  %v8098_v26 = vld [vmem:[#allocation155_spill] sm:$0xff]  ;;  %v8099_v11 = vld [vmem:[#allocation156_spill] sm:$0xff] }
 0x424   : > { %3926 = vst [vmem:[%s7182_s6 + $0xd8] sm:$0xff] %v8093_v25  ;;  %3927 = vst [vmem:[%s7182_s6 + $0xe0] sm:$0xff] %v8094_v38 }
 0x425   : > { %3928 = vst [vmem:[%s7182_s6 + $0xe8] sm:$0xff] %v8095_v62  ;;  %3929 = vst [vmem:[%s7182_s6 + $0xf0] sm:$0xff] %v8096_v24 }
 0x426   : > { %3930 = vst [vmem:[%s7182_s6 + $0xf8] sm:$0xff] %v8097_v10  ;;  %3931 = vst [vmem:[%s7182_s6 + $0x100] sm:$0xff] %v7085_v6 }
 0x427   : > { %3932 = vst [vmem:[%s7182_s6 + $0x108] sm:$0xff] %v8098_v26  ;;  %3933 = vst [vmem:[%s7182_s6 + $0x110] sm:$0xff] %v7091_v20 }
 0x428   : > { %3934 = vst [vmem:[%s7182_s6 + $0x118] sm:$0xff] %v7094_v36  ;;  %3935 = vst [vmem:[%s7182_s6 + $0x120] sm:$0xff] %v7097_v42 }
 0x429   : > { %3936 = vst [vmem:[%s7182_s6 + $0x128] sm:$0xff] %v7100_v27  ;;  %3937 = vst [vmem:[%s7182_s6 + $0x130] sm:$0xff] %v7103_v58 }
 0x42a   : > { %3938 = vst [vmem:[%s7182_s6 + $0x138] sm:$0xff] %v7106_v50  ;;  %3939 = vst [vmem:[%s7182_s6 + $0x140] sm:$0xff] %v7109_v57 }
 0x42b   : > { %3940 = vst [vmem:[%s7182_s6 + $0x148] sm:$0xff] %v8099_v11  ;;  %3941 = vst [vmem:[%s7182_s6 + $0x150] sm:$0xff] %v7115_v18 }
 0x42c   : > { %3942 = vst [vmem:[%s7182_s6 + $0x158] sm:$0xff] %v7118_v56  ;;  %3943 = vst [vmem:[%s7182_s6 + $0x160] sm:$0xff] %v7121_v19 }
 0x42d   : > { %3944 = vst [vmem:[%s7182_s6 + $0x168] sm:$0xff] %v7124_v4  ;;  %3945 = vst [vmem:[%s7182_s6 + $0x170] sm:$0xff] %v7127_v33 }
 0x42e   : > { %3946 = vst [vmem:[%s7182_s6 + $0x178] sm:$0xff] %v7130_v49  ;;  %3947 = vst [vmem:[%s7182_s6 + $0x180] sm:$0xff] %v7133_v55 }
 0x42f   : > { %3948 = vst [vmem:[%s7182_s6 + $0x188] sm:$0xff] %v7136_v14  ;;  %3949 = vst [vmem:[%s7182_s6 + $0x190] sm:$0xff] %v7139_v13 }
 0x430   : > { %3950 = vst [vmem:[%s7182_s6 + $0x198] sm:$0xff] %v7142_v8  ;;  %3951 = vst [vmem:[%s7182_s6 + $0x1a0] sm:$0xff] %v7145_v28 }
 0x431   : > { %3952 = vst [vmem:[%s7182_s6 + $0x1a8] sm:$0xff] %v7148_v5  ;;  %3953 = vst [vmem:[%s7182_s6 + $0x1b0] sm:$0xff] %v7151_v63 }
 0x432   : > { %3954 = vst [vmem:[%s7182_s6 + $0x1b8] sm:$0xff] %v7154_v31  ;;  %3955 = vst [vmem:[%s7182_s6 + $0x1c0] sm:$0xff] %v7157_v43 }
 0x433   : > { %3956 = vst [vmem:[%s7182_s6 + $0x1c8] sm:$0xff] %v7160_v15  ;;  %3957 = vst [vmem:[%s7182_s6 + $0x1d0] sm:$0xff] %v7163_v16 }
 0x434   : > { %3958 = vst [vmem:[%s7182_s6 + $0x1d8] sm:$0xff] %v7166_v2  ;;  %3959 = vst [vmem:[%s7182_s6 + $0x1e0] sm:$0xff] %v7169_v12 }
 0x435   : > { %3960 = vst [vmem:[%s7182_s6 + $0x1e8] sm:$0xff] %v7172_v17  ;;  %3961 = vst [vmem:[%s7182_s6 + $0x1f0] sm:$0xff] %v7175_v48 }
 0x436   : > { %3962 = vst [vmem:[%s7182_s6 + $0x1f8] sm:$0xff] %v7178_v35 }
 0x437 PF: > { %p4812_p12 = scmp.eq.s32.totalorder %s5660_s19, 0 }
 0x438   : > { %s7314_s8 = scalar_lea.vmem (!%p4812_p12), [#allocation8], %s5802_s14 }
 0x439   : > { %3966 = sbr.rel (%p4812_p12) target bundleno = 1125 (0x465), region = 90 }
 0x43e   : > { %v3968_v25 = vld [vmem:[%s7314_s8] sm:$0xff]  ;;  %v3969_v38 = vld [vmem:[%s7314_s8 + $0x8] sm:$0xff]  ;;  %v3970_v62 = vld [vmem:[%s7314_s8 + $0x10] sm:$0xff] }
 0x43f   : > { %v8100_v24 = vld [vmem:[#allocation28_spill] sm:$0xff]  ;;  %v8101_v26 = vld [vmem:[#allocation29_spill] sm:$0xff]  ;;  %v8102_v9 = vld [vmem:[#allocation30_spill] sm:$0xff] }
 0x440   : > { %v4032_v10 = vadd.f32 %v3968_v25, %v8100_v24  ;;  %v4033_v11 = vadd.f32 %v3969_v38, %v8101_v26  ;;  %v4034_v46 = vadd.f32 %v3970_v62, %v8102_v9  ;;  %v3971_v60 = vld [vmem:[%s7314_s8 + $0x18] sm:$0xff]  ;;  %v3972_v39 = vld [vmem:[%s7314_s8 + $0x20] sm:$0xff]  ;;  %v3973_v0 = vld [vmem:[%s7314_s8 + $0x28] sm:$0xff] }
 0x441   : > { %v8103_v51 = vld [vmem:[#allocation31_spill] sm:$0xff]  ;;  %v8104_v3 = vld [vmem:[#allocation32_spill] sm:$0xff]  ;;  %v4037_v35 = vadd.f32 %v3973_v0, %v6915_v22  ;;  %v3976_v38 = vld [vmem:[%s7314_s8 + $0x40] sm:$0xff] }
 0x442   : > { %v4035_v29 = vadd.f32 %v3971_v60, %v8103_v51  ;;  %v4036_v7 = vadd.f32 %v3972_v39, %v8104_v3  ;;  %v3974_v25 = vld [vmem:[%s7314_s8 + $0x30] sm:$0xff]  ;;  %v3975_v24 = vld [vmem:[%s7314_s8 + $0x38] sm:$0xff]  ;;  %4096 = vst [vmem:[%s7314_s8] sm:$0xff] %v4032_v10  ;;  %4097 = vst [vmem:[%s7314_s8 + $0x8] sm:$0xff] %v4033_v11  ;;  %v4040_v3 = vadd.f32 %v3976_v38, %v6940_v37 }
 0x443   : > { %4098 = vst [vmem:[%s7314_s8 + $0x10] sm:$0xff] %v4034_v46  ;;  %v4038_v9 = vadd.f32 %v3974_v25, %v6924_v45  ;;  %v4039_v51 = vadd.f32 %v3975_v24, %v6933_v61  ;;  %v3977_v39 = vld [vmem:[%s7314_s8 + $0x48] sm:$0xff]  ;;  %v3978_v22 = vld [vmem:[%s7314_s8 + $0x50] sm:$0xff]  ;;  %v3979_v0 = vld [vmem:[%s7314_s8 + $0x58] sm:$0xff] }
 0x444   : > { %4099 = vst [vmem:[%s7314_s8 + $0x18] sm:$0xff] %v4035_v29  ;;  %4100 = vst [vmem:[%s7314_s8 + $0x20] sm:$0xff] %v4036_v7  ;;  %v4041_v60 = vadd.f32 %v3977_v39, %v6949_v1  ;;  %v8105_v46 = vld [vmem:[#allocation40_spill] sm:$0xff]  ;;  %v8106_v62 = vld [vmem:[#allocation43_spill] sm:$0xff] }
 0x445   : > { %4101 = vst [vmem:[%s7314_s8 + $0x28] sm:$0xff] %v4037_v35  ;;  %v4042_v45 = vadd.f32 %v3978_v22, %v8105_v46  ;;  %v4043_v61 = vadd.f32 %v3979_v0, %v8106_v62  ;;  %v3980_v10 = vld [vmem:[%s7314_s8 + $0x60] sm:$0xff]  ;;  %v3981_v37 = vld [vmem:[%s7314_s8 + $0x68] sm:$0xff]  ;;  %v3982_v26 = vld [vmem:[%s7314_s8 + $0x70] sm:$0xff] }
 0x446   : > { %4102 = vst [vmem:[%s7314_s8 + $0x30] sm:$0xff] %v4038_v9  ;;  %4103 = vst [vmem:[%s7314_s8 + $0x38] sm:$0xff] %v4039_v51  ;;  %v4044_v7 = vadd.f32 %v3980_v10, %v6978_v47  ;;  %v4045_v1 = vadd.f32 %v3981_v37, %v6987_v32  ;;  %v4046_v29 = vadd.f32 %v3982_v26, %v6996_v52  ;;  %v3983_v35 = vld [vmem:[%s7314_s8 + $0x78] sm:$0xff]  ;;  %v3984_v11 = vld [vmem:[%s7314_s8 + $0x80] sm:$0xff] }
 0x447   : > { %4104 = vst [vmem:[%s7314_s8 + $0x40] sm:$0xff] %v4040_v3  ;;  %v3985_v25 = vld [vmem:[%s7314_s8 + $0x88] sm:$0xff]  ;;  %4105 = vst [vmem:[%s7314_s8 + $0x48] sm:$0xff] %v4041_v60  ;;  %v4047_v24 = vadd.f32 %v3983_v35, %v7005_v54  ;;  %v4048_v47 = vadd.f32 %v3984_v11, %v7012_v59  ;;  %v3986_v38 = vld [vmem:[%s7314_s8 + $0x90] sm:$0xff] }
 0x448   : > { %4106 = vst [vmem:[%s7314_s8 + $0x50] sm:$0xff] %v4042_v45  ;;  %4107 = vst [vmem:[%s7314_s8 + $0x58] sm:$0xff] %v4043_v61  ;;  %v4049_v32 = vadd.f32 %v3985_v25, %v7021_v44  ;;  %v3987_v52 = vld [vmem:[%s7314_s8 + $0x98] sm:$0xff]  ;;  %v3988_v9 = vld [vmem:[%s7314_s8 + $0xa0] sm:$0xff]  ;;  %v4050_v51 = vadd.f32 %v3986_v38, %v7030_v21 }
 0x449   : > { %4108 = vst [vmem:[%s7314_s8 + $0x60] sm:$0xff] %v4044_v7  ;;  %4109 = vst [vmem:[%s7314_s8 + $0x68] sm:$0xff] %v4045_v1  ;;  %v4051_v54 = vadd.f32 %v3987_v52, %v7039_v40  ;;  %v4052_v59 = vadd.f32 %v3988_v9, %v7049_v30  ;;  %v3989_v3 = vld [vmem:[%s7314_s8 + $0xa8] sm:$0xff]  ;;  %v3990_v44 = vld [vmem:[%s7314_s8 + $0xb0] sm:$0xff] }
 0x44a   : > { %4110 = vst [vmem:[%s7314_s8 + $0x70] sm:$0xff] %v4046_v29  ;;  %v3991_v39 = vld [vmem:[%s7314_s8 + $0xb8] sm:$0xff]  ;;  %4111 = vst [vmem:[%s7314_s8 + $0x78] sm:$0xff] %v4047_v24  ;;  %v4053_v22 = vadd.f32 %v3989_v3, %v7052_v34  ;;  %v4054_v21 = vadd.f32 %v3990_v44, %v7055_v23  ;;  %v3992_v0 = vld [vmem:[%s7314_s8 + $0xc0] sm:$0xff] }
 0x44b   : > { %4112 = vst [vmem:[%s7314_s8 + $0x80] sm:$0xff] %v4048_v47  ;;  %4113 = vst [vmem:[%s7314_s8 + $0x88] sm:$0xff] %v4049_v32  ;;  %v4055_v40 = vadd.f32 %v3991_v39, %v7058_v53  ;;  %v3993_v30 = vld [vmem:[%s7314_s8 + $0xc8] sm:$0xff]  ;;  %v3994_v60 = vld [vmem:[%s7314_s8 + $0xd0] sm:$0xff]  ;;  %v4056_v46 = vadd.f32 %v3992_v0, %v7061_v41 }
 0x44c   : > { %4114 = vst [vmem:[%s7314_s8 + $0x90] sm:$0xff] %v4050_v51  ;;  %4115 = vst [vmem:[%s7314_s8 + $0x98] sm:$0xff] %v4051_v54  ;;  %v8107_v45 = vld [vmem:[#allocation148_spill] sm:$0xff]  ;;  %v8108_v62 = vld [vmem:[#allocation149_spill] sm:$0xff] }
 0x44d   : > { %4116 = vst [vmem:[%s7314_s8 + $0xa0] sm:$0xff] %v4052_v59  ;;  %v4057_v34 = vadd.f32 %v3993_v30, %v8107_v45  ;;  %v4058_v23 = vadd.f32 %v3994_v60, %v8108_v62  ;;  %v3995_v61 = vld [vmem:[%s7314_s8 + $0xd8] sm:$0xff]  ;;  %v3996_v53 = vld [vmem:[%s7314_s8 + $0xe0] sm:$0xff]  ;;  %v3997_v10 = vld [vmem:[%s7314_s8 + $0xe8] sm:$0xff] }
 0x44e   : > { %4117 = vst [vmem:[%s7314_s8 + $0xa8] sm:$0xff] %v4053_v22  ;;  %4118 = vst [vmem:[%s7314_s8 + $0xb0] sm:$0xff] %v4054_v21  ;;  %v8109_v37 = vld [vmem:[#allocation150_spill] sm:$0xff]  ;;  %v8110_v7 = vld [vmem:[#allocation151_spill] sm:$0xff] }
 0x44f   : > { %4119 = vst [vmem:[%s7314_s8 + $0xb8] sm:$0xff] %v4055_v40  ;;  %v4059_v26 = vadd.f32 %v3995_v61, %v8109_v37  ;;  %v4060_v41 = vadd.f32 %v3996_v53, %v8110_v7  ;;  %v8111_v1 = vld [vmem:[#allocation152_spill] sm:$0xff]  ;;  %v3998_v35 = vld [vmem:[%s7314_s8 + $0xf0] sm:$0xff]  ;;  %v4000_v25 = vld [vmem:[%s7314_s8 + $0x100] sm:$0xff] }
 0x450   : > { %v4061_v29 = vadd.f32 %v3997_v10, %v8111_v1  ;;  %v3999_v11 = vld [vmem:[%s7314_s8 + $0xf8] sm:$0xff]  ;;  %4120 = vst [vmem:[%s7314_s8 + $0xc0] sm:$0xff] %v4056_v46  ;;  %4121 = vst [vmem:[%s7314_s8 + $0xc8] sm:$0xff] %v4057_v34  ;;  %v8112_v24 = vld [vmem:[#allocation153_spill] sm:$0xff]  ;;  %v4064_v52 = vadd.f32 %v4000_v25, %v7085_v6 }
 0x451   : > { %4122 = vst [vmem:[%s7314_s8 + $0xd0] sm:$0xff] %v4058_v23  ;;  %v4062_v47 = vadd.f32 %v3998_v35, %v8112_v24  ;;  %v8113_v32 = vld [vmem:[#allocation154_spill] sm:$0xff]  ;;  %v4002_v51 = vld [vmem:[%s7314_s8 + $0x110] sm:$0xff]  ;;  %v4003_v54 = vld [vmem:[%s7314_s8 + $0x118] sm:$0xff] }
 0x452   : > { %v4063_v38 = vadd.f32 %v3999_v11, %v8113_v32  ;;  %v4001_v9 = vld [vmem:[%s7314_s8 + $0x108] sm:$0xff]  ;;  %4123 = vst [vmem:[%s7314_s8 + $0xd8] sm:$0xff] %v4059_v26  ;;  %4124 = vst [vmem:[%s7314_s8 + $0xe0] sm:$0xff] %v4060_v41  ;;  %v8114_v59 = vld [vmem:[#allocation155_spill] sm:$0xff]  ;;  %v4066_v44 = vadd.f32 %v4002_v51, %v7091_v20  ;;  %v4067_v39 = vadd.f32 %v4003_v54, %v7094_v36 }
 0x453   : > { %4125 = vst [vmem:[%s7314_s8 + $0xe8] sm:$0xff] %v4061_v29  ;;  %v4065_v3 = vadd.f32 %v4001_v9, %v8114_v59  ;;  %v4004_v22 = vld [vmem:[%s7314_s8 + $0x120] sm:$0xff]  ;;  %v4005_v6 = vld [vmem:[%s7314_s8 + $0x128] sm:$0xff]  ;;  %v4006_v21 = vld [vmem:[%s7314_s8 + $0x130] sm:$0xff] }
 0x454   : > { %4126 = vst [vmem:[%s7314_s8 + $0xf0] sm:$0xff] %v4062_v47  ;;  %4127 = vst [vmem:[%s7314_s8 + $0xf8] sm:$0xff] %v4063_v38  ;;  %v4068_v40 = vadd.f32 %v4004_v22, %v7097_v42  ;;  %v4069_v0 = vadd.f32 %v4005_v6, %v7100_v27  ;;  %v4070_v20 = vadd.f32 %v4006_v21, %v7103_v58  ;;  %v4007_v30 = vld [vmem:[%s7314_s8 + $0x138] sm:$0xff]  ;;  %v4008_v36 = vld [vmem:[%s7314_s8 + $0x140] sm:$0xff] }
 0x455   : > { %4128 = vst [vmem:[%s7314_s8 + $0x100] sm:$0xff] %v4064_v52  ;;  %v4009_v60 = vld [vmem:[%s7314_s8 + $0x148] sm:$0xff]  ;;  %4129 = vst [vmem:[%s7314_s8 + $0x108] sm:$0xff] %v4065_v3  ;;  %v4071_v46 = vadd.f32 %v4007_v30, %v7106_v50  ;;  %v4072_v42 = vadd.f32 %v4008_v36, %v7109_v57  ;;  %v8115_v45 = vld [vmem:[#allocation156_spill] sm:$0xff] }
 0x456   : > { %4130 = vst [vmem:[%s7314_s8 + $0x110] sm:$0xff] %v4066_v44  ;;  %4131 = vst [vmem:[%s7314_s8 + $0x118] sm:$0xff] %v4067_v39  ;;  %v4073_v27 = vadd.f32 %v4009_v60, %v8115_v45  ;;  %v4010_v34 = vld [vmem:[%s7314_s8 + $0x150] sm:$0xff]  ;;  %v4011_v58 = vld [vmem:[%s7314_s8 + $0x158] sm:$0xff] }
 0x457   : > { %v4012_v62 = vld [vmem:[%s7314_s8 + $0x160] sm:$0xff]  ;;  %4132 = vst [vmem:[%s7314_s8 + $0x120] sm:$0xff] %v4068_v40  ;;  %4133 = vst [vmem:[%s7314_s8 + $0x128] sm:$0xff] %v4069_v0  ;;  %v4074_v23 = vadd.f32 %v4010_v34, %v7115_v18  ;;  %v4075_v50 = vadd.f32 %v4011_v58, %v7118_v56  ;;  %v4013_v61 = vld [vmem:[%s7314_s8 + $0x168] sm:$0xff] }
 0x458   : > { %4134 = vst [vmem:[%s7314_s8 + $0x130] sm:$0xff] %v4070_v20  ;;  %v4076_v57 = vadd.f32 %v4012_v62, %v7121_v19  ;;  %v4014_v53 = vld [vmem:[%s7314_s8 + $0x170] sm:$0xff]  ;;  %v4015_v10 = vld [vmem:[%s7314_s8 + $0x178] sm:$0xff]  ;;  %4135 = vst [vmem:[%s7314_s8 + $0x138] sm:$0xff] %v4071_v46  ;;  %v4077_v37 = vadd.f32 %v4013_v61, %v7124_v4 }
 0x459   : > { %4136 = vst [vmem:[%s7314_s8 + $0x140] sm:$0xff] %v4072_v42  ;;  %4137 = vst [vmem:[%s7314_s8 + $0x148] sm:$0xff] %v4073_v27  ;;  %v4078_v18 = vadd.f32 %v4014_v53, %v7127_v33  ;;  %v4079_v56 = vadd.f32 %v4015_v10, %v7130_v49  ;;  %v4016_v26 = vld [vmem:[%s7314_s8 + $0x180] sm:$0xff]  ;;  %v4017_v19 = vld [vmem:[%s7314_s8 + $0x188] sm:$0xff] }
 0x45a   : > { %v4018_v7 = vld [vmem:[%s7314_s8 + $0x190] sm:$0xff]  ;;  %4138 = vst [vmem:[%s7314_s8 + $0x150] sm:$0xff] %v4074_v23  ;;  %4139 = vst [vmem:[%s7314_s8 + $0x158] sm:$0xff] %v4075_v50  ;;  %v4080_v41 = vadd.f32 %v4016_v26, %v7133_v55  ;;  %v4081_v4 = vadd.f32 %v4017_v19, %v7136_v14  ;;  %v4019_v1 = vld [vmem:[%s7314_s8 + $0x198] sm:$0xff] }
 0x45b   : > { %4140 = vst [vmem:[%s7314_s8 + $0x160] sm:$0xff] %v4076_v57  ;;  %v4082_v33 = vadd.f32 %v4018_v7, %v7139_v13  ;;  %v4020_v49 = vld [vmem:[%s7314_s8 + $0x1a0] sm:$0xff]  ;;  %v4021_v29 = vld [vmem:[%s7314_s8 + $0x1a8] sm:$0xff]  ;;  %4141 = vst [vmem:[%s7314_s8 + $0x168] sm:$0xff] %v4077_v37  ;;  %v4083_v35 = vadd.f32 %v4019_v1, %v7142_v8 }
 0x45c   : > { %4142 = vst [vmem:[%s7314_s8 + $0x170] sm:$0xff] %v4078_v18  ;;  %4143 = vst [vmem:[%s7314_s8 + $0x178] sm:$0xff] %v4079_v56  ;;  %v4084_v55 = vadd.f32 %v4020_v49, %v7145_v28  ;;  %v4085_v14 = vadd.f32 %v4021_v29, %v7148_v5  ;;  %v4022_v11 = vld [vmem:[%s7314_s8 + $0x1b0] sm:$0xff]  ;;  %v4023_v13 = vld [vmem:[%s7314_s8 + $0x1b8] sm:$0xff] }
 0x45d   : > { %v4024_v25 = vld [vmem:[%s7314_s8 + $0x1c0] sm:$0xff]  ;;  %4144 = vst [vmem:[%s7314_s8 + $0x180] sm:$0xff] %v4080_v41  ;;  %4145 = vst [vmem:[%s7314_s8 + $0x188] sm:$0xff] %v4081_v4  ;;  %v4086_v24 = vadd.f32 %v4022_v11, %v7151_v63  ;;  %v4087_v8 = vadd.f32 %v4023_v13, %v7154_v31  ;;  %v4025_v47 = vld [vmem:[%s7314_s8 + $0x1c8] sm:$0xff] }
 0x45e   : > { %4146 = vst [vmem:[%s7314_s8 + $0x190] sm:$0xff] %v4082_v33  ;;  %v4088_v28 = vadd.f32 %v4024_v25, %v7157_v43  ;;  %v4026_v5 = vld [vmem:[%s7314_s8 + $0x1d0] sm:$0xff]  ;;  %v4027_v32 = vld [vmem:[%s7314_s8 + $0x1d8] sm:$0xff]  ;;  %4147 = vst [vmem:[%s7314_s8 + $0x198] sm:$0xff] %v4083_v35  ;;  %v4089_v38 = vadd.f32 %v4025_v47, %v7160_v15 }
 0x45f   : > { %4148 = vst [vmem:[%s7314_s8 + $0x1a0] sm:$0xff] %v4084_v55  ;;  %4149 = vst [vmem:[%s7314_s8 + $0x1a8] sm:$0xff] %v4085_v14  ;;  %v4090_v63 = vadd.f32 %v4026_v5, %v7163_v16  ;;  %v4091_v31 = vadd.f32 %v4027_v32, %v7166_v2  ;;  %v4028_v52 = vld [vmem:[%s7314_s8 + $0x1e0] sm:$0xff]  ;;  %v4029_v43 = vld [vmem:[%s7314_s8 + $0x1e8] sm:$0xff] }
 0x460   : > { %v4030_v9 = vld [vmem:[%s7314_s8 + $0x1f0] sm:$0xff]  ;;  %4150 = vst [vmem:[%s7314_s8 + $0x1b0] sm:$0xff] %v4086_v24  ;;  %4151 = vst [vmem:[%s7314_s8 + $0x1b8] sm:$0xff] %v4087_v8  ;;  %v4092_v51 = vadd.f32 %v4028_v52, %v7169_v12  ;;  %v4093_v54 = vadd.f32 %v4029_v43, %v7172_v17  ;;  %v4031_v59 = vld [vmem:[%s7314_s8 + $0x1f8] sm:$0xff] }
 0x461   : > { %4152 = vst [vmem:[%s7314_s8 + $0x1c0] sm:$0xff] %v4088_v28  ;;  %v4094_v15 = vadd.f32 %v4030_v9, %v7175_v48  ;;  %4153 = vst [vmem:[%s7314_s8 + $0x1c8] sm:$0xff] %v4089_v38  ;;  %v8116_v16 = vld [vmem:[#allocation157_spill] sm:$0xff] }
 0x462   : > { %4154 = vst [vmem:[%s7314_s8 + $0x1d0] sm:$0xff] %v4090_v63  ;;  %4155 = vst [vmem:[%s7314_s8 + $0x1d8] sm:$0xff] %v4091_v31  ;;  %v4095_v2 = vadd.f32 %v4031_v59, %v8116_v16 }
 0x463   : > { %4156 = vst [vmem:[%s7314_s8 + $0x1e0] sm:$0xff] %v4092_v51  ;;  %4157 = vst [vmem:[%s7314_s8 + $0x1e8] sm:$0xff] %v4093_v54 }
 0x464   : > { %4158 = vst [vmem:[%s7314_s8 + $0x1f0] sm:$0xff] %v4094_v15  ;;  %4159 = vst [vmem:[%s7314_s8 + $0x1f8] sm:$0xff] %v4095_v2 }
 0x465 PF: > { %v8117_v3 = vld [vmem:[#allocation37_spill] sm:$0xff]  ;;  %v8120_v17 = vld [vmem:[#allocation67_spill] sm:$0xff]  ;;  %s4256_s19 = ssub.s32 1, %s8262_s5  ;;  %s4481_s9 = sshra.s32 %s5802_s14, 3  ;;  %v8123_v40 = vld [vmem:[#allocation42_spill] sm:$0xff] }
 0x466   : > { %v8118_v44 = vld [vmem:[#allocation65_spill] sm:$0xff]  ;;  %v8121_v22 = vld [vmem:[#allocation39_spill] sm:$0xff]  ;;  %v8124_v0 = vld [vmem:[#allocation72_spill] sm:$0xff]  ;;  %s4877_s12 = sshll.u32 %s4256_s19, 7  ;;  %p7532_p13 = scmp.eq.s32.totalorder %s4666_s23, 5 }
 0x467   : > { %v4160_v12 = vmul.f32 %v8118_v44, %v8117_v3  ;;  %v8119_v39 = vld [vmem:[#allocation41_spill] sm:$0xff]  ;;  %v4163_v20 = vmul.f32 %v8124_v0, %v8123_v40  ;;  %v8125_v30 = vld [vmem:[#allocation44_spill] sm:$0xff]  ;;  %v8126_v36 = vld [vmem:[#allocation74_spill] sm:$0xff]  ;;  %s4484_s14 = sadd.s32 %s4877_s12, %s4481_s9  ;;  %s5678_s23 = smov [#allocation8]  }
 0x468   : > { %v4161_v48 = vmul.f32 %v8120_v17, %v8119_v39  ;;  %v8122_v6 = vld [vmem:[#allocation69_spill] sm:$0xff]  ;;  %v4164_v60 = vmul.f32 %v8126_v36, %v8125_v30  ;;  %v8127_v46 = vld [vmem:[#allocation46_spill] sm:$0xff]  ;;  %v8128_v42 = vld [vmem:[#allocation76_spill] sm:$0xff]  ;;  %s4878_s18 = sshll.u32 %s4484_s14, 2  ;;  %s4557_s10 = sshll.u32 %s5678_s23, 4  ;;  %s4558_s10 = int_to_ptr.vmem [resolvable:$true] %s4557_s10 }
 0x469   : > { %v4162_v21 = vmul.f32 %v8122_v6, %v8121_v22  ;;  %v4165_v45 = vmul.f32 %v8128_v42, %v8127_v46  ;;  %v8129_v27 = vld [vmem:[#allocation48_spill] sm:$0xff]  ;;  %v8130_v34 = vld [vmem:[#allocation79_spill] sm:$0xff]  ;;  %v8131_v62 = vld [vmem:[#allocation49_spill] sm:$0xff]  ;;  %s7546_s13 = scalar_lea.vmem [#allocation2], %s4878_s18  ;;  %s5576_s15 = scalar_lea.vmem %s4558_s10, 16384 }
 0x46a   : > { %v4166_v58 = vmul.f32 %v8130_v34, %v8129_v27  ;;  %v8132_v23 = vld [vmem:[#allocation81_spill] sm:$0xff]  ;;  %v4954_v57 = vpack.c.bf16 %v4161_v48, %v4160_v12  ;;  %v8133_v53 = vld [vmem:[#allocation51_spill] sm:$0xff]  ;;  %v8136_v56 = vld [vmem:[#allocation86_spill] sm:$0xff]  ;;  %p5577_p0 = scmp.ne.s32.totalorder %s4558_s10, %s5576_s15  ;;  %p5583_p3 = scmp.lt.s32.totalorder %s4558_s10, %s4558_s10 }
 0x46b   : > { %v4167_v50 = vmul.f32 %v8132_v23, %v8131_v62  ;;  %v4959_v61 = vpack.c.bf16 %v4163_v20, %v4162_v21  ;;  %v8134_v10 = vld [vmem:[#allocation83_spill] sm:$0xff]  ;;  %v8135_v18 = vld [vmem:[#allocation53_spill] sm:$0xff]  ;;  %v4964_v19 = vpack.c.bf16 %v4165_v45, %v4164_v60  ;;  %v8139_v4 = vld [vmem:[#allocation88_spill] sm:$0xff]  ;;  %p5584_p4 = scmp.lt.s32.totalorder %s5576_s15, %s5576_s15 }
 0x46c   : > { %v4168_v37 = vmul.f32 %v8134_v10, %v8133_v53  ;;  %v4169_v26 = vmul.f32 %v8136_v56, %v8135_v18  ;;  %v8138_v41 = vld [vmem:[#allocation55_spill] sm:$0xff]  ;;  %v8140_v1 = vld [vmem:[#allocation56_spill] sm:$0xff]  ;;  %v8142_v55 = vld [vmem:[#allocation58_spill] sm:$0xff]  ;;  %4955 = vst [vmem:[%s7546_s13] sm:$0xff] %v4954_v57   ;;  %p5578_p1 = pnand %p5577_p0, %p7532_p13 }
 0x46d   : > { %v4969_v7 = vpack.c.bf16 %v4167_v50, %v4166_v58  ;;  %v4170_v33 = vmul.f32 %v8139_v4, %v8138_v41  ;;  %v8141_v49 = vld [vmem:[#allocation91_spill] sm:$0xff]  ;;  %v8143_v14 = vld [vmem:[#allocation93_spill] sm:$0xff]  ;;  %v8144_v13 = vld [vmem:[#allocation60_spill] sm:$0xff]  ;;  %5111 = vst [vmem:[%s7546_s13 + $0x8] sm:$0xff] %v4959_v61   ;;  %p5585_p5 = por %p5584_p4, %p5583_p3 }
 0x46e   : > { %v4171_v29 = vmul.f32 %v8141_v49, %v8140_v1  ;;  %v4974_v35 = vpack.c.bf16 %v4169_v26, %v4168_v37  ;;  %v4172_v11 = vmul.f32 %v8143_v14, %v8142_v55  ;;  %v8145_v25 = vld [vmem:[#allocation95_spill] sm:$0xff]  ;;  %v8146_v8 = vld [vmem:[#allocation62_spill] sm:$0xff]  ;;  %5112 = vst [vmem:[%s7546_s13 + $0x10] sm:$0xff] %v4964_v19   ;;  %v8149_v38 = vld [vmem:[#allocation100_spill] sm:$0xff]  ;;  %p5579_p2 = pneg %p5578_p1 }
 0x46f   : > { %v4173_v24 = vmul.f32 %v8145_v25, %v8144_v13  ;;  %v8147_v28 = vld [vmem:[#allocation98_spill] sm:$0xff]  ;;  %5113 = vst [vmem:[%s7546_s13 + $0x18] sm:$0xff] %v4969_v7   ;;  %v8148_v32 = vld [vmem:[#allocation63_spill] sm:$0xff]  ;;  %v8150_v31 = vld [vmem:[#allocation64_spill] sm:$0xff] }
 0x470   : > { %v4174_v47 = vmul.f32 %v8147_v28, %v8146_v8  ;;  %v4979_v5 = vpack.c.bf16 %v4171_v29, %v4170_v33  ;;  %v4175_v63 = vmul.f32 %v8149_v38, %v8148_v32  ;;  %v8151_v52 = vld [vmem:[#allocation102_spill] sm:$0xff]  ;;  %v8153_v51 = vld [vmem:[#allocation105_spill] sm:$0xff]  ;;  %5114 = vst [vmem:[%s7546_s13 + $0x20] sm:$0xff] %v4974_v35   ;;  %v8154_v59 = vld [vmem:[#allocation68_spill] sm:$0xff]  ;;  %p5586_p6 = pnand %p5585_p5, %p5579_p2 }
 0x471   : > { %v4176_v43 = vmul.f32 %v8151_v52, %v8150_v31  ;;  %v8152_v9 = vld [vmem:[#allocation66_spill] sm:$0xff]  ;;  %v4984_v15 = vpack.c.bf16 %v4173_v24, %v4172_v11  ;;  %v8155_v16 = vld [vmem:[#allocation107_spill] sm:$0xff]  ;;  %v8157_v44 = vld [vmem:[#allocation109_spill] sm:$0xff] }
 0x472   : > { %v4177_v54 = vmul.f32 %v8153_v51, %v8152_v9  ;;  %v4178_v2 = vmul.f32 %v8155_v16, %v8154_v59  ;;  %v8156_v3 = vld [vmem:[#allocation70_spill] sm:$0xff]  ;;  %v8158_v39 = vld [vmem:[#allocation71_spill] sm:$0xff]  ;;  %v8159_v17 = vld [vmem:[#allocation112_spill] sm:$0xff]  ;;  %5115 = vst [vmem:[%s7546_s13 + $0x28] sm:$0xff] %v4979_v5   ;;  %v4989_v22 = vpack.c.bf16 %v4175_v63, %v4174_v47 }
 0x473   : > { %v4179_v12 = vmul.f32 %v8157_v44, %v8156_v3  ;;  %v4180_v48 = vmul.f32 %v8159_v17, %v8158_v39  ;;  %v8160_v21 = vld [vmem:[#allocation73_spill] sm:$0xff]  ;;  %v8161_v40 = vld [vmem:[#allocation114_spill] sm:$0xff]  ;;  %v8162_v20 = vld [vmem:[#allocation75_spill] sm:$0xff] }
 0x474   : > { %v4994_v6 = vpack.c.bf16 %v4177_v54, %v4176_v43  ;;  %v4181_v0 = vmul.f32 %v8161_v40, %v8160_v21  ;;  %v8163_v30 = vld [vmem:[#allocation116_spill] sm:$0xff] }
 0x475   : > { %v4182_v36 = vmul.f32 %v8163_v30, %v8162_v20 }
 0x476   : > { %5589 = shalt.err (!%p5586_p6)
}
 0x477   : > { %s5679_s26 = smov 128   ;;  %s5680_s27 = smov 8   ;;  %5116 = vst [vmem:[%s7546_s13 + $0x30] sm:$0xff] %v4984_v15   ;;  %v4999_v60 = vpack.c.bf16 %v4179_v12, %v4178_v2  ;;  %v8164_v46 = vld [vmem:[#allocation77_spill] sm:$0xff]  ;;  %v8165_v42 = vld [vmem:[#allocation119_spill] sm:$0xff]  ;;  %v8166_v27 = vld [vmem:[#allocation78_spill] sm:$0xff]  ;;  %v5004_v57 = vpack.c.bf16 %v4181_v0, %v4180_v48 }
 0x478   : > { %5145 = dma.vmem_to_hbm [thread:$0]  (%p7532_p13), %s4558_s10, 16384, %s7717_s4, [#allocation7], %s5679_s26, %s5679_s26, %s5680_s27   ;;  %v4183_v45 = vmul.f32 %v8165_v42, %v8164_v46  ;;  %v8167_v34 = vld [vmem:[#allocation121_spill] sm:$0xff]  ;;  %v8168_v62 = vld [vmem:[#allocation80_spill] sm:$0xff]  ;;  %v8169_v23 = vld [vmem:[#allocation123_spill] sm:$0xff] }
 0x479   : > { %v4184_v58 = vmul.f32 %v8167_v34, %v8166_v27  ;;  %v4185_v50 = vmul.f32 %v8169_v23, %v8168_v62  ;;  %5117 = vst [vmem:[%s7546_s13 + $0x38] sm:$0xff] %v4989_v22   ;;  %5118 = vst [vmem:[%s7546_s13 + $0x40] sm:$0xff] %v4994_v6   ;;  %v8170_v61 = vld [vmem:[#allocation82_spill] sm:$0xff]  ;;  %v8172_v37 = vld [vmem:[#allocation84_spill] sm:$0xff] }
 0x47a   : > { %v8171_v53 = vld [vmem:[#allocation126_spill] sm:$0xff]  ;;  %v8173_v18 = vld [vmem:[#allocation128_spill] sm:$0xff]  ;;  %v8174_v26 = vld [vmem:[#allocation85_spill] sm:$0xff]  ;;  %5119 = vst [vmem:[%s7546_s13 + $0x48] sm:$0xff] %v4999_v60   ;;  %v5009_v41 = vpack.c.bf16 %v4183_v45, %v4182_v36 }
 0x47b   : > { %v4186_v10 = vmul.f32 %v8171_v53, %v8170_v61  ;;  %v4187_v56 = vmul.f32 %v8173_v18, %v8172_v37  ;;  %v8175_v19 = vld [vmem:[#allocation130_spill] sm:$0xff]  ;;  %v5014_v4 = vpack.c.bf16 %v4185_v50, %v4184_v58  ;;  %v8176_v33 = vld [vmem:[#allocation87_spill] sm:$0xff]  ;;  %v8177_v1 = vld [vmem:[#allocation132_spill] sm:$0xff]  ;;  %5120 = vst [vmem:[%s7546_s13 + $0x50] sm:$0xff] %v5004_v57  }
 0x47c   : > { %v4188_v7 = vmul.f32 %v8175_v19, %v8174_v26  ;;  %v4189_v49 = vmul.f32 %v8177_v1, %v8176_v33  ;;  %v8178_v29 = vld [vmem:[#allocation89_spill] sm:$0xff]  ;;  %v8180_v11 = vld [vmem:[#allocation90_spill] sm:$0xff]  ;;  %v8182_v24 = vld [vmem:[#allocation92_spill] sm:$0xff]  ;;  %5121 = vst [vmem:[%s7546_s13 + $0x58] sm:$0xff] %v5009_v41  }
 0x47d   : > { %v8179_v35 = vld [vmem:[#allocation133_spill] sm:$0xff]  ;;  %v5019_v14 = vpack.c.bf16 %v4187_v56, %v4186_v10  ;;  %v8181_v13 = vld [vmem:[#allocation134_spill] sm:$0xff]  ;;  %v8183_v8 = vld [vmem:[#allocation136_spill] sm:$0xff]  ;;  %5122 = vst [vmem:[%s7546_s13 + $0x60] sm:$0xff] %v5014_v4  }
 0x47e   : > { %v4190_v55 = vmul.f32 %v8179_v35, %v8178_v29  ;;  %v4191_v25 = vmul.f32 %v8181_v13, %v8180_v11  ;;  %v4192_v28 = vmul.f32 %v8183_v8, %v8182_v24  ;;  %v8184_v47 = vld [vmem:[#allocation94_spill] sm:$0xff]  ;;  %v8185_v5 = vld [vmem:[#allocation137_spill] sm:$0xff]  ;;  %v5024_v38 = vpack.c.bf16 %v4189_v49, %v4188_v7  ;;  %v8186_v63 = vld [vmem:[#allocation96_spill] sm:$0xff] }
 0x47f   : > { %v4193_v32 = vmul.f32 %v8185_v5, %v8184_v47  ;;  %v8187_v31 = vld [vmem:[#allocation138_spill] sm:$0xff]  ;;  %v8188_v43 = vld [vmem:[#allocation97_spill] sm:$0xff]  ;;  %v8189_v9 = vld [vmem:[#allocation140_spill] sm:$0xff]  ;;  %5123 = vst [vmem:[%s7546_s13 + $0x68] sm:$0xff] %v5019_v14  }
 0x480   : > { %v4194_v52 = vmul.f32 %v8187_v31, %v8186_v63  ;;  %v4195_v51 = vmul.f32 %v8189_v9, %v8188_v43  ;;  %v8190_v54 = vld [vmem:[#allocation99_spill] sm:$0xff]  ;;  %v8191_v15 = vld [vmem:[#allocation20_spill] sm:$0xff]  ;;  %v5029_v16 = vpack.c.bf16 %v4191_v25, %v4190_v55  ;;  %v8192_v3 = vld [vmem:[#allocation101_spill] sm:$0xff]  ;;  %5124 = vst [vmem:[%s7546_s13 + $0x70] sm:$0xff] %v5024_v38  }
 0x481   : > { %v4196_v59 = vmul.f32 %v8191_v15, %v8190_v54  ;;  %v5034_v2 = vpack.c.bf16 %v4193_v32, %v4192_v28  ;;  %v8193_v44 = vld [vmem:[#allocation21_spill] sm:$0xff]  ;;  %v8194_v39 = vld [vmem:[#allocation103_spill] sm:$0xff]  ;;  %v8195_v17 = vld [vmem:[#allocation22_spill] sm:$0xff] }
 0x482   : > { %v4197_v12 = vmul.f32 %v8193_v44, %v8192_v3  ;;  %v4198_v48 = vmul.f32 %v8195_v17, %v8194_v39  ;;  %v5039_v22 = vpack.c.bf16 %v4195_v51, %v4194_v52  ;;  %v8196_v6 = vld [vmem:[#allocation104_spill] sm:$0xff]  ;;  %v8197_v21 = vld [vmem:[#allocation23_spill] sm:$0xff]  ;;  %v8198_v0 = vld [vmem:[#allocation106_spill] sm:$0xff]  ;;  %5125 = vst [vmem:[%s7546_s13 + $0x78] sm:$0xff] %v5029_v16  }
 0x483   : > { %v4199_v40 = vmul.f32 %v8197_v21, %v8196_v6  ;;  %v8199_v20 = vld [vmem:[#allocation24_spill] sm:$0xff]  ;;  %v8201_v60 = vld [vmem:[#allocation25_spill] sm:$0xff]  ;;  %5126 = vst [vmem:[%s7546_s13 + $0x80] sm:$0xff] %v5034_v2   ;;  %v8202_v45 = vld [vmem:[#allocation110_spill] sm:$0xff] }
 0x484   : > { %v4200_v30 = vmul.f32 %v8199_v20, %v8198_v0  ;;  %v8200_v36 = vld [vmem:[#allocation108_spill] sm:$0xff]  ;;  %v5044_v42 = vpack.c.bf16 %v4197_v12, %v4196_v59  ;;  %v8203_v27 = vld [vmem:[#allocation26_spill] sm:$0xff]  ;;  %v8204_v58 = vld [vmem:[#allocation111_spill] sm:$0xff]  ;;  %5127 = vst [vmem:[%s7546_s13 + $0x88] sm:$0xff] %v5039_v22  }
 0x485   : > { %v4201_v46 = vmul.f32 %v8201_v60, %v8200_v36  ;;  %v4202_v34 = vmul.f32 %v8203_v27, %v8202_v45  ;;  %v8205_v62 = vld [vmem:[#allocation27_spill] sm:$0xff]  ;;  %v8206_v50 = vld [vmem:[#allocation113_spill] sm:$0xff]  ;;  %v5049_v53 = vpack.c.bf16 %v4199_v40, %v4198_v48  ;;  %v8209_v18 = vld [vmem:[#allocation142_spill] sm:$0xff] }
 0x486   : > { %v4203_v23 = vmul.f32 %v8205_v62, %v8204_v58  ;;  %v8207_v57 = vld [vmem:[#allocation141_spill] sm:$0xff]  ;;  %v8208_v37 = vld [vmem:[#allocation115_spill] sm:$0xff]  ;;  %5128 = vst [vmem:[%s7546_s13 + $0x90] sm:$0xff] %v5044_v42   ;;  %v8212_v4 = vld [vmem:[#allocation118_spill] sm:$0xff] }
 0x487   : > { %v4204_v61 = vmul.f32 %v8207_v57, %v8206_v50  ;;  %v5054_v10 = vpack.c.bf16 %v4201_v46, %v4200_v30  ;;  %v4205_v56 = vmul.f32 %v8209_v18, %v8208_v37  ;;  %v8210_v26 = vld [vmem:[#allocation117_spill] sm:$0xff]  ;;  %v8211_v19 = vld [vmem:[#allocation143_spill] sm:$0xff]  ;;  %v8213_v33 = vld [vmem:[#allocation144_spill] sm:$0xff]  ;;  %5129 = vst [vmem:[%s7546_s13 + $0x98] sm:$0xff] %v5049_v53  }
 0x488   : > { %v4206_v7 = vmul.f32 %v8211_v19, %v8210_v26  ;;  %v5059_v41 = vpack.c.bf16 %v4203_v23, %v4202_v34  ;;  %v4207_v1 = vmul.f32 %v8213_v33, %v8212_v4  ;;  %v8214_v49 = vld [vmem:[#allocation120_spill] sm:$0xff]  ;;  %v8215_v29 = vld [vmem:[#allocation145_spill] sm:$0xff]  ;;  %v8216_v55 = vld [vmem:[#allocation122_spill] sm:$0xff] }
 0x489   : > { %v4208_v35 = vmul.f32 %v8215_v29, %v8214_v49  ;;  %v8217_v14 = vld [vmem:[#allocation33_spill] sm:$0xff]  ;;  %5130 = vst [vmem:[%s7546_s13 + $0xa0] sm:$0xff] %v5054_v10   ;;  %v5064_v13 = vpack.c.bf16 %v4205_v56, %v4204_v61  ;;  %v8218_v25 = vld [vmem:[#allocation124_spill] sm:$0xff]  ;;  %v8219_v24 = vld [vmem:[#allocation34_spill] sm:$0xff] }
 0x48a   : > { %v4209_v11 = vmul.f32 %v8217_v14, %v8216_v55  ;;  %v4210_v8 = vmul.f32 %v8219_v24, %v8218_v25  ;;  %v8220_v28 = vld [vmem:[#allocation125_spill] sm:$0xff]  ;;  %v8221_v47 = vld [vmem:[#allocation35_spill] sm:$0xff]  ;;  %v8223_v38 = vld [vmem:[#allocation36_spill] sm:$0xff]  ;;  %5131 = vst [vmem:[%s7546_s13 + $0xa8] sm:$0xff] %v5059_v41   ;;  %v5069_v31 = vpack.c.bf16 %v4207_v1, %v4206_v7 }
 0x48b   : > { %v4211_v5 = vmul.f32 %v8221_v47, %v8220_v28  ;;  %v8222_v32 = vld [vmem:[#allocation127_spill] sm:$0xff]  ;;  %v8224_v43 = vld [vmem:[#allocation129_spill] sm:$0xff]  ;;  %v8225_v9 = vld [vmem:[#allocation38_spill] sm:$0xff]  ;;  %5132 = vst [vmem:[%s7546_s13 + $0xb0] sm:$0xff] %v5064_v13  }
 0x48c   : > { %v4212_v63 = vmul.f32 %v8223_v38, %v8222_v32  ;;  %v5074_v52 = vpack.c.bf16 %v4209_v11, %v4208_v35  ;;  %v4213_v51 = vmul.f32 %v8225_v9, %v8224_v43  ;;  %v8226_v54 = vld [vmem:[#allocation13_spill] sm:$0xff]  ;;  %v8227_v15 = vld [vmem:[#allocation146_spill] sm:$0xff]  ;;  %v8228_v2 = vld [vmem:[#allocation131_spill] sm:$0xff]  ;;  %5133 = vst [vmem:[%s7546_s13 + $0xb8] sm:$0xff] %v5069_v31  }
 0x48d   : > { %v4214_v59 = vmul.f32 %v8227_v15, %v8226_v54  ;;  %v5079_v16 = vpack.c.bf16 %v4211_v5, %v4210_v8  ;;  %v8229_v3 = vld [vmem:[#allocation147_spill] sm:$0xff]  ;;  %v8230_v12 = vld [vmem:[#allocation14_spill] sm:$0xff]  ;;  %v8231_v39 = vld [vmem:[#allocation45_spill] sm:$0xff] }
 0x48e   : > { %v4215_v44 = vmul.f32 %v8229_v3, %v8228_v2  ;;  %v4216_v17 = vmul.f32 %v8231_v39, %v8230_v12  ;;  %v8232_v48 = vld [vmem:[#allocation15_spill] sm:$0xff]  ;;  %5134 = vst [vmem:[%s7546_s13 + $0xc0] sm:$0xff] %v5074_v52   ;;  %v5084_v21 = vpack.c.bf16 %v4213_v51, %v4212_v63  ;;  %v8234_v40 = vld [vmem:[#allocation16_spill] sm:$0xff]  ;;  %v8235_v0 = vld [vmem:[#allocation50_spill] sm:$0xff] }
 0x48f   : > { %v8233_v22 = vld [vmem:[#allocation47_spill] sm:$0xff]  ;;  %v4218_v20 = vmul.f32 %v8235_v0, %v8234_v40  ;;  %v8237_v36 = vld [vmem:[#allocation52_spill] sm:$0xff]  ;;  %v8238_v46 = vld [vmem:[#allocation17_spill] sm:$0xff]  ;;  %5135 = vst [vmem:[%s7546_s13 + $0xc8] sm:$0xff] %v5079_v16  }
 0x490   : > { %v4217_v6 = vmul.f32 %v8233_v22, %v8232_v48  ;;  %v8236_v30 = vld [vmem:[#allocation135_spill] sm:$0xff]  ;;  %v8239_v42 = vld [vmem:[#allocation54_spill] sm:$0xff]  ;;  %v5089_v27 = vpack.c.bf16 %v4215_v44, %v4214_v59  ;;  %v8241_v62 = vld [vmem:[#allocation57_spill] sm:$0xff]  ;;  %5136 = vst [vmem:[%s7546_s13 + $0xd0] sm:$0xff] %v5084_v21  }
 0x491   : > { %v4219_v60 = vmul.f32 %v8237_v36, %v8236_v30  ;;  %v4220_v45 = vmul.f32 %v8239_v42, %v8238_v46  ;;  %v8240_v58 = vld [vmem:[#allocation18_spill] sm:$0xff]  ;;  %v8242_v50 = vld [vmem:[#allocation19_spill] sm:$0xff]  ;;  %v8245_v37 = vld [vmem:[#allocation61_spill] sm:$0xff] }
 0x492   : > { %v5094_v34 = vpack.c.bf16 %v4217_v6, %v4216_v17  ;;  %v4221_v23 = vmul.f32 %v8241_v62, %v8240_v58  ;;  %v8243_v57 = vld [vmem:[#allocation59_spill] sm:$0xff]  ;;  %5137 = vst [vmem:[%s7546_s13 + $0xd8] sm:$0xff] %v5089_v27  }
 0x493   : > { %v4222_v61 = vmul.f32 %v8243_v57, %v8242_v50  ;;  %v5099_v53 = vpack.c.bf16 %v4219_v60, %v4218_v20  ;;  %v8244_v10 = vld [vmem:[#allocation139_spill] sm:$0xff] }
 0x494   : > { %v4223_v18 = vmul.f32 %v8245_v37, %v8244_v10  ;;  %5138 = vst [vmem:[%s7546_s13 + $0xe0] sm:$0xff] %v5094_v34   ;;  %v5104_v56 = vpack.c.bf16 %v4221_v23, %v4220_v45 }
 0x495   : > { %5139 = vst [vmem:[%s7546_s13 + $0xe8] sm:$0xff] %v5099_v53  }
 0x496   : > { %v5109_v26 = vpack.c.bf16 %v4223_v18, %v4222_v61  ;;  %5140 = vst [vmem:[%s7546_s13 + $0xf0] sm:$0xff] %v5104_v56  }
 0x498   : > { %5141 = vst [vmem:[%s7546_s13 + $0xf8] sm:$0xff] %v5109_v26  }
 0x499   : > { %5639 = dma.done.wait (%p7532_p13), [#allocation7], 16384  }
 0x49a   : > { %5641 = vsyncadd (%p7532_p13), [#allocation7], 4294950912 }
 0x49b PF: > { %s18_s22 = sadd.s32 1, %s5672_s22   ;;  %s8246_s15 = smov %s5648_s16 }
 0x49c   : > { %p15_p7 = scmp.ge.s32.totalorder %s18_s22, 8   ;;  %s8247_s16 = smov %s5652_s17 }
 0x49d   : > { %s8248_s17 = smov %s5764_s29  ;;  %s8249_s18 = smov %s5664_s20 }
 0x49e   : > { %s8250_s19 = smov %s5668_s21  ;;  %s8251_s20 = smov %s8254_s24 }
 0x49f   : > { %s8252_s21 = smov %s8258_s25  ;;  %17 = sbr.rel (!%p15_p7) target bundleno = 6 (0x6), region = 138 }
 0x4a4   :  { %4573 = vsyncpa [#allocation6], 1 }
 0x4a5   :  { %4575 = vsyncpa [#allocation6 + $0x1], 1 }
 0x4a6   :  { %4576 = vsyncpa [#allocation7], 1 }
 0x4a7   :  { %4578 = vsyncpa [#allocation7 + $0x1], 1 }
 0x4a8   :  { %4579 = vsyncmov [#allocation4] }
 0x4ab   :  { %s4580_s11 = vpop.sfrf %4579 }
 0x4ac   :  { %p4883_p8 = scmp.ne.s32.totalorder %s4580_s11, 0 }
 0x4ae   :  { %4584 = shalt.err (%p4883_p8)  }

</bundles_post_ra>
